<compile_context>
chip_gen: v7x
topology: tpu7x:2x2x1
jax: 0.10.0
libtpu: 0.0.40
codegen_flags: <defaults>
</compile_context>

<pallas_src>
import jax
import jax.numpy as jnp
from jax import lax
from jax.experimental import pallas as pl
from jax.experimental.pallas import tpu as pltpu

# ----------------------------- model constants ------------------------------
N_NODES = 16                     # graph nodes ("batch" of the GNN/RNN)
ENTITY_DIM = 8
STATIC_SPARSE_DIMS = [5, 7]
DYNAMIC_SPARSE_DIMS = [6, 4]
STATIC_DENSE = 16
DYNAMIC_DENSE = 16
WINDOW = 4                       # window_size
N_EDGES = 32
GNN_IN = len(DYNAMIC_SPARSE_DIMS) * ENTITY_DIM + DYNAMIC_DENSE   # 32
GNN_OUT = 32                     # = rnn_in_dim
STATIC_IN = len(STATIC_SPARSE_DIMS) * ENTITY_DIM + STATIC_DENSE  # 32
HIDDEN = 32                      # rnn_hidden_dim (== static encoder out)
VOCAB_PAD = 8                    # all sparse vocabularies padded to 8 for one-hot gather
WN = WINDOW * N_NODES            # 64  (windows stacked along sublanes)
WE = WINDOW * N_EDGES            # 128 (all windows' edges packed along lanes)


# --------------------------- fused Pallas kernel -----------------------------
def _temgnn_kernel(sdense_ref, ssparse_ref, ddense_ref, dsparse_ref,
                   edst_ref, esrc_ref, ewts_ref,
                   tabs_ref, sw_ref, sb_ref, gw_ref, gb_ref,
                   wih_ref, whh_ref, bih_ref, bhh_ref, attw_ref,
                   o_ref, xbuf):
    f32 = jnp.float32
    i32 = jnp.int32
    H = HIDDEN

    # ---- static encoder: relu(concat(emb0, emb1, dense) @ Ws + bs) -----------
    # Embedding gather as one-hot matmul (exact: indices < vocab, pad rows are 0).
    ssp = ssparse_ref[0]                                          # (N, 2) i32
    lane8 = lax.broadcasted_iota(i32, (N_NODES, VOCAB_PAD), 1)
    oh_s0 = (ssp[:, 0:1] == lane8).astype(f32)                    # (16, 8)
    oh_s1 = (ssp[:, 1:2] == lane8).astype(f32)
    emb_s0 = jnp.dot(oh_s0, tabs_ref[0], preferred_element_type=f32)   # (16, 8)
    emb_s1 = jnp.dot(oh_s1, tabs_ref[1], preferred_element_type=f32)
    ws = sw_ref[...]                                              # (32, 32)
    static_pre = (
        jnp.dot(emb_s0, ws[0:ENTITY_DIM, :], preferred_element_type=f32)
        + jnp.dot(emb_s1, ws[ENTITY_DIM:2 * ENTITY_DIM, :], preferred_element_type=f32)
        + jnp.dot(sdense_ref[0], ws[2 * ENTITY_DIM:, :], preferred_element_type=f32)
        + sb_ref[...])
    static_embed = jnp.maximum(static_pre, 0.0)                   # (16, 32)

    # ---- dynamic features for all 4 windows, stacked along sublanes (64, 32) --
    dsp = dsparse_ref[0]                                          # (64, 2) i32
    lane8w = lax.broadcasted_iota(i32, (WN, VOCAB_PAD), 1)
    oh_d0 = (dsp[:, 0:1] == lane8w).astype(f32)                   # (64, 8)
    oh_d1 = (dsp[:, 1:2] == lane8w).astype(f32)
    emb_d0 = jnp.dot(oh_d0, tabs_ref[2], preferred_element_type=f32)    # (64, 8)
    emb_d1 = jnp.dot(oh_d1, tabs_ref[3], preferred_element_type=f32)    # (64, 8)
    xbuf[:, 0:ENTITY_DIM] = emb_d0
    xbuf[:, ENTITY_DIM:2 * ENTITY_DIM] = emb_d1
    xbuf[:, 2 * ENTITY_DIM:] = ddense_ref[0]                      # (64, 16)

    # ---- block-diagonal weighted adjacency, built in-kernel -------------------
    # A_bd[d, s] = sum_e w_e * [gdst_e == d] * [gsrc_e == s]  (+ I for self loops)
    # gdst/gsrc are already offset by w*N in the wrapper, so edges of window w land
    # in diagonal block w — duplicates accumulate exactly like scatter-add.
    dst = edst_ref[0]                                             # (1, 128) i32
    srcc = esrc_ref[0]                                            # (128, 1) i32
    wts = ewts_ref[0]                                             # (1, 128) f32
    node_row = lax.broadcasted_iota(i32, (WN, WE), 0)             # node id along sublanes
    dst_oh_w = jnp.where(node_row == dst, wts, 0.0)               # (64, 128) weighted one-hot
    node_lane = lax.broadcasted_iota(i32, (WE, WN), 1)            # node id along lanes
    src_oh_t = (node_lane == srcc).astype(f32)                    # (128, 64)
    a_bd = jnp.dot(dst_oh_w, src_oh_t, preferred_element_type=f32)  # (64, 64)
    eye = (lax.broadcasted_iota(i32, (WN, WN), 0)
           == lax.broadcasted_iota(i32, (WN, WN), 1)).astype(f32)
    a_bd = a_bd + eye
    # TODO(synk): self-loop + no degree normalization assumed (GNN class not given).

    # ---- GCN: relu((A_w @ X_w) @ Wg_w + b_w), A stage batched over windows ----
    ax = jnp.dot(a_bd, xbuf[...], preferred_element_type=f32)     # (64, 32)
    gb = gb_ref[...]                                              # (64, 32) per-window bias (row-repeated)
    for w in range(WINDOW):
        lo, hi = w * N_NODES, (w + 1) * N_NODES
        g_w = jnp.maximum(
            jnp.dot(ax[lo:hi, :], gw_ref[w], preferred_element_type=f32) + gb[lo:hi, :],
            0.0)                                                  # (16, 32)
        xbuf[lo:hi, :] = g_w                                      # reuse scratch: now holds G_all

    # ---- GRU input gates for ALL steps in one matmul (hoisted off recurrence) --
    gi_all = jnp.dot(xbuf[...], wih_ref[...],
                     preferred_element_type=f32) + bih_ref[...]   # (64, 96)

    # ---- serial GRU recurrence: only h @ Whh + gate elementwise per step ------
    whh = whh_ref[...]                                            # (32, 96)
    bhh = bhh_ref[...]                                            # (1, 96)
    h = jnp.zeros((N_NODES, H), f32)
    embeds = [static_embed]                                       # time order: static first
    for w in range(WINDOW):
        lo, hi = w * N_NODES, (w + 1) * N_NODES
        gi = gi_all[lo:hi, :]                                     # (16, 96)
        gh = jnp.dot(h, whh, preferred_element_type=f32) + bhh    # (16, 96)
        r = jax.nn.sigmoid(gi[:, 0:H] + gh[:, 0:H])
        z = jax.nn.sigmoid(gi[:, H:2 * H] + gh[:, H:2 * H])
        c = jnp.tanh(gi[:, 2 * H:] + r * gh[:, 2 * H:])
        h = (1.0 - z) * c + z * h
        embeds.append(h)

    # ---- attention pooling over T = W+1 (softmax over time, bias cancels) -----
    attw = attw_ref[...]                                          # (1, 32)
    logits = [jnp.sum(jnp.tanh(e) * attw, axis=-1, keepdims=True) for e in embeds]
    m = logits[0]
    for lg in logits[1:]:
        m = jnp.maximum(m, lg)
    ps = [jnp.exp(lg - m) for lg in logits]
    denom = ps[0]
    for p in ps[1:]:
        denom = denom + p
    inv = pl.reciprocal(denom, approx=True)                       # EUP slot
    out = embeds[0] * (ps[0] * inv)
    for e, p in zip(embeds[1:], ps[1:]):
        out = out + e * (p * inv)
    o_ref[0] = out                                                # (16, 32)


# ------------------------------ cost estimate --------------------------------
def _cost_estimate(batch):
    per_graph_flops = (
        2 * WN * WE * WN                                   # adjacency one-hot matmul
        + 2 * (WN + N_NODES) * VOCAB_PAD * ENTITY_DIM * 2  # embedding one-hot gathers
        + 2 * N_NODES * STATIC_IN * HIDDEN                 # static encoder
        + 2 * WN * WN * GNN_OUT                            # A_bd @ X
        + 2 * WN * GNN_IN * GNN_OUT                        # per-window GNN weights
        + 2 * WN * GNN_OUT * 3 * HIDDEN                    # batched gi
        + WINDOW * 2 * N_NODES * HIDDEN * 3 * HIDDEN       # gh per step
        + WINDOW * 12 * N_NODES * HIDDEN                   # gate elementwise
        + (WINDOW + 1) * 4 * N_NODES * HIDDEN)             # attention pool
    per_graph_trans = (WINDOW * N_NODES * 3 * HIDDEN
                       + (WINDOW + 1) * N_NODES * (HIDDEN + 1) + N_NODES)
    weight_bytes = 4 * (4 * VOCAB_PAD * ENTITY_DIM + STATIC_IN * HIDDEN + HIDDEN
                        + WINDOW * GNN_IN * GNN_OUT + WN * GNN_OUT
                        + GNN_OUT * 3 * HIDDEN + HIDDEN * 3 * HIDDEN
                        + 2 * 3 * HIDDEN + HIDDEN)
    per_graph_bytes = 4 * (N_NODES * STATIC_DENSE + N_NODES * 2
                           + WN * DYNAMIC_DENSE + WN * 2 + 3 * WE
                           + N_NODES * HIDDEN)
    return pl.CostEstimate(flops=batch * per_graph_flops,
                           transcendentals=batch * per_graph_trans,
                           bytes_accessed=weight_bytes + batch * per_graph_bytes)


# ------------------------------ pallas wrapper --------------------------------
def _graph_spec(*shape):
    zeros = (0,) * len(shape)
    return pl.BlockSpec((1,) + tuple(shape), lambda b: (b,) + zeros)


def _weight_spec(*shape):
    zeros = (0,) * len(shape)
    return pl.BlockSpec(tuple(shape), lambda b: zeros)


def temgnn_fused(graph_inputs, params):
    sdense, ssparse, ddense, dsparse, edst, esrc, ewts = graph_inputs
    batch = sdense.shape[0]
    in_specs = [
        _graph_spec(N_NODES, STATIC_DENSE),        # static dense
        _graph_spec(N_NODES, 2),                   # static sparse indices
        _graph_spec(WN, DYNAMIC_DENSE),            # dynamic dense (window-stacked)
        _graph_spec(WN, 2),                        # dynamic sparse indices
        _graph_spec(1, WE),                        # edge dst (global node ids)
        _graph_spec(WE, 1),                        # edge src (global node ids)
        _graph_spec(1, WE),                        # edge weights
        # resident weights: constant block index across the parallel batch axis
        _weight_spec(4, VOCAB_PAD, ENTITY_DIM),    # embedding tables [s0, s1, d0, d1]
        _weight_spec(STATIC_IN, HIDDEN),           # static encoder W
        _weight_spec(1, HIDDEN),                   # static encoder b
        _weight_spec(WINDOW, GNN_IN, GNN_OUT),     # per-window GNN W (dense, no block-diag)
        _weight_spec(WN, GNN_OUT),                 # per-window GNN b (row-repeated)
        _weight_spec(GNN_OUT, 3 * HIDDEN),         # GRU W_ih (gates [r,z,n] on lanes)
        _weight_spec(HIDDEN, 3 * HIDDEN),          # GRU W_hh
        _weight_spec(1, 3 * HIDDEN),               # GRU b_ih
        _weight_spec(1, 3 * HIDDEN),               # GRU b_hh
        _weight_spec(1, HIDDEN),                   # attention weight (bias cancels)
    ]
    out_spec = pl.BlockSpec((1, N_NODES, HIDDEN), lambda b: (b, 0, 0))
    return pl.pallas_call(
        _temgnn_kernel,
        out_shape=jax.ShapeDtypeStruct((batch, N_NODES, HIDDEN), jnp.float32),
        grid=(batch,),
        in_specs=in_specs,
        out_specs=out_spec,
        scratch_shapes=[pltpu.VMEM((WN, GNN_OUT), jnp.float32)],
        compiler_params=pltpu.CompilerParams(dimension_semantics=("parallel",)),
        cost_estimate=_cost_estimate(batch),
    )(sdense, ssparse, ddense, dsparse, edst, esrc, ewts,
      params["emb_tabs"], params["static_W"], params["static_b"],
      params["gnn_W"], params["gnn_b_rep"],
      params["gru_wih"], params["gru_whh"], params["gru_bih"], params["gru_bhh"],
      params["att_w"])


# ------------------------------ params & glue --------------------------------
def init_params(key):
    ks = jax.random.split(key, 16)

    def rnd(k, shape, scale=0.1):
        return (scale * jax.random.normal(k, shape)).astype(jnp.float32)

    def padded_table(k, vocab):
        t = rnd(k, (vocab, ENTITY_DIM))
        return jnp.pad(t, ((0, VOCAB_PAD - vocab), (0, 0)))

    emb_tabs = jnp.stack([
        padded_table(ks[0], STATIC_SPARSE_DIMS[0]),
        padded_table(ks[1], STATIC_SPARSE_DIMS[1]),
        padded_table(ks[2], DYNAMIC_SPARSE_DIMS[0]),
        padded_table(ks[3], DYNAMIC_SPARSE_DIMS[1]),
    ], axis=0)                                                    # (4, 8, 8)

    gnn_b = rnd(ks[6], (WINDOW, GNN_OUT))
    params = {
        "emb_tabs": emb_tabs,
        # static MLP (Linear + ReLU)
        "static_W": rnd(ks[4], (STATIC_IN, HIDDEN)),
        "static_b": rnd(ks[5], (1, HIDDEN)),
        # per-window GNN encoders (dense (4,32,32); bias repeated per node so the
        # window-stacked (64,32) add is a plain vector add in-kernel)
        "gnn_W": rnd(ks[7], (WINDOW, GNN_IN, GNN_OUT)),
        "gnn_b_rep": jnp.repeat(gnn_b, N_NODES, axis=0),          # (64, 32)
        # single-layer GRU, gate order [r, z, n], pre-transposed to (Din, 3H)
        "gru_wih": rnd(ks[8], (GNN_OUT, 3 * HIDDEN)),
        "gru_whh": rnd(ks[9], (HIDDEN, 3 * HIDDEN)),
        "gru_bih": rnd(ks[10], (1, 3 * HIDDEN)),
        "gru_bhh": rnd(ks[11], (1, 3 * HIDDEN)),
        # attention head att_w: Linear(HIDDEN, 1); its bias adds the same constant
        # to every time step and cancels in the softmax, so it is not used in-kernel.
        "att_w": rnd(ks[12], (1, HIDDEN)),
        "att_b": rnd(ks[13], (1, 1)),
    }
    return params


def temgnn_forward(params, static_dense_x, static_sparse_x,
                   dynamic_dense_x, dynamic_sparse_x, edges, weights):
    """Batched TemGNN forward. All gathers / scatters happen inside the kernel;
    the wrapper only does trivial reshapes and a constant window-offset add."""
    batch = static_dense_x.shape[0]
    ddense = dynamic_dense_x.reshape(batch, WN, DYNAMIC_DENSE)
    dsparse = dynamic_sparse_x.reshape(batch, WN, len(DYNAMIC_SPARSE_DIMS)).astype(jnp.int32)
    # global (block-diagonal) node ids: window w's nodes occupy rows [w*N, (w+1)*N)
    offs = (jnp.arange(WINDOW, dtype=jnp.int32) * N_NODES)[None, :, None, None]
    gedges = edges.astype(jnp.int32) + offs                        # (B, W, 2, E)
    edst = gedges[:, :, 0, :].reshape(batch, 1, WE)
    esrc = gedges[:, :, 1, :].reshape(batch, WE, 1)
    ewts = weights.astype(jnp.float32).reshape(batch, 1, WE)
    return temgnn_fused(
        (static_dense_x.astype(jnp.float32), static_sparse_x.astype(jnp.int32),
         ddense.astype(jnp.float32), dsparse, edst, esrc, ewts),
        params)                                                    # (B, N, HIDDEN)


# ---------------------------------- main -------------------------------------
if __name__ == "__main__":
    key = jax.random.PRNGKey(0)
    k_in, k_par = jax.random.split(key)
    ks = jax.random.split(k_in, 6)
    B = 2   # batch of graphs (amortizes launch/weight-DMA; feeds v7x's 2nd core)

    static_dense_x = jax.random.normal(ks[0], (B, N_NODES, STATIC_DENSE), jnp.float32)
    static_sparse_x = jnp.stack(
        [jax.random.randint(jax.random.fold_in(ks[1], i), (B, N_NODES), 0, d)
         for i, d in enumerate(STATIC_SPARSE_DIMS)], axis=-1).astype(jnp.int32)
    dynamic_dense_x = jax.random.normal(ks[2], (B, WINDOW, N_NODES, DYNAMIC_DENSE),
                                        jnp.float32)
    dynamic_sparse_x = jnp.stack(
        [jax.random.randint(jax.random.fold_in(ks[3], i), (B, WINDOW, N_NODES), 0, d)
         for i, d in enumerate(DYNAMIC_SPARSE_DIMS)], axis=-1).astype(jnp.int32)
    edges = jax.random.randint(ks[4], (B, WINDOW, 2, N_EDGES), 0, N_NODES).astype(jnp.int32)
    weights = jax.nn.softplus(jax.random.normal(ks[5], (B, WINDOW, N_EDGES), jnp.float32))

    params = init_params(k_par)

    fwd = jax.jit(temgnn_forward)
    out = fwd(params, static_dense_x, static_sparse_x,
              dynamic_dense_x, dynamic_sparse_x, edges, weights)
    jax.block_until_ready(out)
    assert out.shape == (B, N_NODES, HIDDEN) and out.dtype == jnp.float32
    print("KERNEL_OK")
</pallas_src>

<mosaic_0001>
module attributes {stable_mosaic.version = 11 : i64} {
  func.func @_temgnn_kernel(%arg0: i32, %arg1: memref<1x16x16xf32, #tpu.memory_space<vmem>>, %arg2: memref<1x16x2xi32, #tpu.memory_space<vmem>>, %arg3: memref<1x64x16xf32, #tpu.memory_space<vmem>>, %arg4: memref<1x64x2xi32, #tpu.memory_space<vmem>>, %arg5: memref<1x1x128xi32, #tpu.memory_space<vmem>>, %arg6: memref<1x128x1xi32, #tpu.memory_space<vmem>>, %arg7: memref<1x1x128xf32, #tpu.memory_space<vmem>>, %arg8: memref<4x8x8xf32, #tpu.memory_space<vmem>>, %arg9: memref<32x32xf32, #tpu.memory_space<vmem>>, %arg10: memref<1x32xf32, #tpu.memory_space<vmem>>, %arg11: memref<4x32x32xf32, #tpu.memory_space<vmem>>, %arg12: memref<64x32xf32, #tpu.memory_space<vmem>>, %arg13: memref<32x96xf32, #tpu.memory_space<vmem>>, %arg14: memref<32x96xf32, #tpu.memory_space<vmem>>, %arg15: memref<1x96xf32, #tpu.memory_space<vmem>>, %arg16: memref<1x96xf32, #tpu.memory_space<vmem>>, %arg17: memref<1x32xf32, #tpu.memory_space<vmem>>, %arg18: memref<1x16x32xf32, #tpu.memory_space<vmem>>, %arg19: memref<64x32xf32, #tpu.memory_space<vmem>>) attributes {dimension_semantics = [#tpu.dimension_semantics<parallel>], iteration_bounds = array<i64: 2>, scalar_prefetch = 0 : i64, scratch_operands = 1 : i64, tpu.core_type = #tpu.core_type<tc>, window_params = [{transform_indices = @transform_0, window_bounds = array<i64: 1, 16, 16>}, {transform_indices = @transform_1, window_bounds = array<i64: 1, 16, 2>}, {transform_indices = @transform_2, window_bounds = array<i64: 1, 64, 16>}, {transform_indices = @transform_3, window_bounds = array<i64: 1, 64, 2>}, {transform_indices = @transform_4, window_bounds = array<i64: 1, 1, 128>}, {transform_indices = @transform_5, window_bounds = array<i64: 1, 128, 1>}, {transform_indices = @transform_6, window_bounds = array<i64: 1, 1, 128>}, {pipeline_mode = #tpu.pipeline_mode<synchronous>, transform_indices = @transform_7, window_bounds = array<i64: 4, 8, 8>}, {pipeline_mode = #tpu.pipeline_mode<synchronous>, transform_indices = @transform_8, window_bounds = array<i64: 32, 32>}, {pipeline_mode = #tpu.pipeline_mode<synchronous>, transform_indices = @transform_9, window_bounds = array<i64: 1, 32>}, {pipeline_mode = #tpu.pipeline_mode<synchronous>, transform_indices = @transform_10, window_bounds = array<i64: 4, 32, 32>}, {pipeline_mode = #tpu.pipeline_mode<synchronous>, transform_indices = @transform_11, window_bounds = array<i64: 64, 32>}, {pipeline_mode = #tpu.pipeline_mode<synchronous>, transform_indices = @transform_12, window_bounds = array<i64: 32, 96>}, {pipeline_mode = #tpu.pipeline_mode<synchronous>, transform_indices = @transform_13, window_bounds = array<i64: 32, 96>}, {pipeline_mode = #tpu.pipeline_mode<synchronous>, transform_indices = @transform_14, window_bounds = array<i64: 1, 96>}, {pipeline_mode = #tpu.pipeline_mode<synchronous>, transform_indices = @transform_15, window_bounds = array<i64: 1, 96>}, {pipeline_mode = #tpu.pipeline_mode<synchronous>, transform_indices = @transform_16, window_bounds = array<i64: 1, 32>}, {transform_indices = @transform_17, window_bounds = array<i64: 1, 16, 32>}]} {
    %c0 = arith.constant 0 : index
    %c0_0 = arith.constant 0 : index
    %c0_1 = arith.constant 0 : index
    %0 = vector.load %arg2[%c0, %c0_0, %c0_1] : memref<1x16x2xi32, #tpu.memory_space<vmem>>, vector<1x16x2xi32>
    %1 = vector.shape_cast %0 : vector<1x16x2xi32> to vector<16x2xi32>
    %2 = tpu.iota {dimensions = array<i32: 1>} : vector<16x8xi32>
    %3 = vector.extract_strided_slice %1 {offsets = [0, 0], sizes = [16, 1], strides = [1, 1]} : vector<16x2xi32> to vector<16x1xi32>
    %4 = vector.broadcast %3 : vector<16x1xi32> to vector<16x8xi32>
    %5 = arith.cmpi eq, %4, %2 : vector<16x8xi32>
    %6 = arith.extui %5 : vector<16x8xi1> to vector<16x8xi32>
    %7 = arith.sitofp %6 : vector<16x8xi32> to vector<16x8xf32>
    %8 = vector.extract_strided_slice %1 {offsets = [0, 1], sizes = [16, 1], strides = [1, 1]} : vector<16x2xi32> to vector<16x1xi32>
    %9 = vector.broadcast %8 : vector<16x1xi32> to vector<16x8xi32>
    %10 = arith.cmpi eq, %9, %2 : vector<16x8xi32>
    %11 = arith.extui %10 : vector<16x8xi1> to vector<16x8xi32>
    %12 = arith.sitofp %11 : vector<16x8xi32> to vector<16x8xf32>
    %c0_2 = arith.constant 0 : index
    %c0_3 = arith.constant 0 : index
    %c0_4 = arith.constant 0 : index
    %13 = vector.load %arg8[%c0_2, %c0_3, %c0_4] : memref<4x8x8xf32, #tpu.memory_space<vmem>>, vector<1x8x8xf32>
    %14 = vector.shape_cast %13 : vector<1x8x8xf32> to vector<8x8xf32>
    %cst = arith.constant dense<0.000000e+00> : vector<16x8xf32>
    %15 = tpu.matmul %7, %14, %cst {dimension_numbers = #tpu.dot_dimension_numbers<[1], [0], [0], [1], [0, 0, 1, 1], [], []>} : vector<16x8xf32>, vector<8x8xf32>, vector<16x8xf32> -> vector<16x8xf32>
    %c1 = arith.constant 1 : index
    %c0_5 = arith.constant 0 : index
    %c0_6 = arith.constant 0 : index
    %16 = vector.load %arg8[%c1, %c0_5, %c0_6] : memref<4x8x8xf32, #tpu.memory_space<vmem>>, vector<1x8x8xf32>
    %17 = vector.shape_cast %16 : vector<1x8x8xf32> to vector<8x8xf32>
    %cst_7 = arith.constant dense<0.000000e+00> : vector<16x8xf32>
    %18 = tpu.matmul %12, %17, %cst_7 {dimension_numbers = #tpu.dot_dimension_numbers<[1], [0], [0], [1], [0, 0, 1, 1], [], []>} : vector<16x8xf32>, vector<8x8xf32>, vector<16x8xf32> -> vector<16x8xf32>
    %c0_8 = arith.constant 0 : index
    %c0_9 = arith.constant 0 : index
    %19 = vector.load %arg9[%c0_8, %c0_9] : memref<32x32xf32, #tpu.memory_space<vmem>>, vector<32x32xf32>
    %20 = vector.extract_strided_slice %19 {offsets = [0, 0], sizes = [8, 32], strides = [1, 1]} : vector<32x32xf32> to vector<8x32xf32>
    %cst_10 = arith.constant dense<0.000000e+00> : vector<16x32xf32>
    %21 = tpu.matmul %15, %20, %cst_10 {dimension_numbers = #tpu.dot_dimension_numbers<[1], [0], [0], [1], [0, 0, 1, 1], [], []>} : vector<16x8xf32>, vector<8x32xf32>, vector<16x32xf32> -> vector<16x32xf32>
    %22 = vector.extract_strided_slice %19 {offsets = [8, 0], sizes = [8, 32], strides = [1, 1]} : vector<32x32xf32> to vector<8x32xf32>
    %cst_11 = arith.constant dense<0.000000e+00> : vector<16x32xf32>
    %23 = tpu.matmul %18, %22, %cst_11 {dimension_numbers = #tpu.dot_dimension_numbers<[1], [0], [0], [1], [0, 0, 1, 1], [], []>} : vector<16x8xf32>, vector<8x32xf32>, vector<16x32xf32> -> vector<16x32xf32>
    %24 = arith.addf %21, %23 : vector<16x32xf32>
    %c0_12 = arith.constant 0 : index
    %c0_13 = arith.constant 0 : index
    %c0_14 = arith.constant 0 : index
    %25 = vector.load %arg1[%c0_12, %c0_13, %c0_14] : memref<1x16x16xf32, #tpu.memory_space<vmem>>, vector<1x16x16xf32>
    %26 = vector.shape_cast %25 : vector<1x16x16xf32> to vector<16x16xf32>
    %27 = vector.extract_strided_slice %19 {offsets = [16, 0], sizes = [16, 32], strides = [1, 1]} : vector<32x32xf32> to vector<16x32xf32>
    %cst_15 = arith.constant dense<0.000000e+00> : vector<16x32xf32>
    %28 = tpu.matmul %26, %27, %cst_15 {dimension_numbers = #tpu.dot_dimension_numbers<[1], [0], [0], [1], [0, 0, 1, 1], [], []>} : vector<16x16xf32>, vector<16x32xf32>, vector<16x32xf32> -> vector<16x32xf32>
    %29 = arith.addf %24, %28 : vector<16x32xf32>
    %c0_16 = arith.constant 0 : index
    %c0_17 = arith.constant 0 : index
    %30 = vector.load %arg10[%c0_16, %c0_17] : memref<1x32xf32, #tpu.memory_space<vmem>>, vector<1x32xf32>
    %31 = vector.broadcast %30 : vector<1x32xf32> to vector<16x32xf32>
    %32 = arith.addf %29, %31 : vector<16x32xf32>
    %cst_18 = arith.constant 0.000000e+00 : f32
    %33 = vector.broadcast %cst_18 : f32 to vector<16x32xf32>
    %34 = arith.maximumf %32, %33 : vector<16x32xf32>
    %c0_19 = arith.constant 0 : index
    %c0_20 = arith.constant 0 : index
    %c0_21 = arith.constant 0 : index
    %35 = vector.load %arg4[%c0_19, %c0_20, %c0_21] : memref<1x64x2xi32, #tpu.memory_space<vmem>>, vector<1x64x2xi32>
    %36 = vector.shape_cast %35 : vector<1x64x2xi32> to vector<64x2xi32>
    %37 = tpu.iota {dimensions = array<i32: 1>} : vector<64x8xi32>
    %38 = vector.extract_strided_slice %36 {offsets = [0, 0], sizes = [64, 1], strides = [1, 1]} : vector<64x2xi32> to vector<64x1xi32>
    %39 = vector.broadcast %38 : vector<64x1xi32> to vector<64x8xi32>
    %40 = arith.cmpi eq, %39, %37 : vector<64x8xi32>
    %41 = arith.extui %40 : vector<64x8xi1> to vector<64x8xi32>
    %42 = arith.sitofp %41 : vector<64x8xi32> to vector<64x8xf32>
    %43 = vector.extract_strided_slice %36 {offsets = [0, 1], sizes = [64, 1], strides = [1, 1]} : vector<64x2xi32> to vector<64x1xi32>
    %44 = vector.broadcast %43 : vector<64x1xi32> to vector<64x8xi32>
    %45 = arith.cmpi eq, %44, %37 : vector<64x8xi32>
    %46 = arith.extui %45 : vector<64x8xi1> to vector<64x8xi32>
    %47 = arith.sitofp %46 : vector<64x8xi32> to vector<64x8xf32>
    %c2 = arith.constant 2 : index
    %c0_22 = arith.constant 0 : index
    %c0_23 = arith.constant 0 : index
    %48 = vector.load %arg8[%c2, %c0_22, %c0_23] : memref<4x8x8xf32, #tpu.memory_space<vmem>>, vector<1x8x8xf32>
    %49 = vector.shape_cast %48 : vector<1x8x8xf32> to vector<8x8xf32>
    %cst_24 = arith.constant dense<0.000000e+00> : vector<64x8xf32>
    %50 = tpu.matmul %42, %49, %cst_24 {dimension_numbers = #tpu.dot_dimension_numbers<[1], [0], [0], [1], [0, 0, 1, 1], [], []>} : vector<64x8xf32>, vector<8x8xf32>, vector<64x8xf32> -> vector<64x8xf32>
    %c3 = arith.constant 3 : index
    %c0_25 = arith.constant 0 : index
    %c0_26 = arith.constant 0 : index
    %51 = vector.load %arg8[%c3, %c0_25, %c0_26] : memref<4x8x8xf32, #tpu.memory_space<vmem>>, vector<1x8x8xf32>
    %52 = vector.shape_cast %51 : vector<1x8x8xf32> to vector<8x8xf32>
    %cst_27 = arith.constant dense<0.000000e+00> : vector<64x8xf32>
    %53 = tpu.matmul %47, %52, %cst_27 {dimension_numbers = #tpu.dot_dimension_numbers<[1], [0], [0], [1], [0, 0, 1, 1], [], []>} : vector<64x8xf32>, vector<8x8xf32>, vector<64x8xf32> -> vector<64x8xf32>
    %c0_28 = arith.constant 0 : index
    %c0_29 = arith.constant 0 : index
    %54 = vector.load %arg19[%c0_28, %c0_29] : memref<64x32xf32, #tpu.memory_space<vmem>>, vector<64x8xf32>
    tpu.vector_store %arg19[%c0_28, %c0_29], %50 {strides = array<i32>} : memref<64x32xf32, #tpu.memory_space<vmem>>, vector<64x8xf32>,
    %c0_30 = arith.constant 0 : index
    %c8 = arith.constant 8 : index
    %55 = vector.load %arg19[%c0_30, %c8] : memref<64x32xf32, #tpu.memory_space<vmem>>, vector<64x8xf32>
    tpu.vector_store %arg19[%c0_30, %c8], %53 {strides = array<i32>} : memref<64x32xf32, #tpu.memory_space<vmem>>, vector<64x8xf32>,
    %c0_31 = arith.constant 0 : index
    %c0_32 = arith.constant 0 : index
    %c0_33 = arith.constant 0 : index
    %56 = vector.load %arg3[%c0_31, %c0_32, %c0_33] : memref<1x64x16xf32, #tpu.memory_space<vmem>>, vector<1x64x16xf32>
    %57 = vector.shape_cast %56 : vector<1x64x16xf32> to vector<64x16xf32>
    %c0_34 = arith.constant 0 : index
    %c16 = arith.constant 16 : index
    %58 = vector.load %arg19[%c0_34, %c16] : memref<64x32xf32, #tpu.memory_space<vmem>>, vector<64x16xf32>
    tpu.vector_store %arg19[%c0_34, %c16], %57 {strides = array<i32>} : memref<64x32xf32, #tpu.memory_space<vmem>>, vector<64x16xf32>,
    %c0_35 = arith.constant 0 : index
    %c0_36 = arith.constant 0 : index
    %c0_37 = arith.constant 0 : index
    %59 = vector.load %arg5[%c0_35, %c0_36, %c0_37] : memref<1x1x128xi32, #tpu.memory_space<vmem>>, vector<1x1x128xi32>
    %60 = vector.shape_cast %59 : vector<1x1x128xi32> to vector<1x128xi32>
    %c0_38 = arith.constant 0 : index
    %c0_39 = arith.constant 0 : index
    %c0_40 = arith.constant 0 : index
    %61 = vector.load %arg6[%c0_38, %c0_39, %c0_40] : memref<1x128x1xi32, #tpu.memory_space<vmem>>, vector<1x128x1xi32>
    %62 = vector.shape_cast %61 : vector<1x128x1xi32> to vector<128x1xi32>
    %c0_41 = arith.constant 0 : index
    %c0_42 = arith.constant 0 : index
    %c0_43 = arith.constant 0 : index
    %63 = vector.load %arg7[%c0_41, %c0_42, %c0_43] : memref<1x1x128xf32, #tpu.memory_space<vmem>>, vector<1x1x128xf32>
    %64 = vector.shape_cast %63 : vector<1x1x128xf32> to vector<1x128xf32>
    %65 = tpu.iota {dimensions = array<i32: 0>} : vector<64x128xi32>
    %66 = vector.broadcast %60 : vector<1x128xi32> to vector<64x128xi32>
    %67 = arith.cmpi eq, %65, %66 : vector<64x128xi32>
    %cst_44 = arith.constant 0.000000e+00 : f32
    %68 = vector.shape_cast %64 : vector<1x128xf32> to vector<1x128xf32>
    %69 = vector.broadcast %68 : vector<1x128xf32> to vector<64x128xf32>
    %70 = vector.broadcast %cst_44 : f32 to vector<64x128xf32>
    %71 = arith.select %67, %69, %70 : vector<64x128xi1>, vector<64x128xf32>
    %72 = tpu.iota {dimensions = array<i32: 1>} : vector<128x64xi32>
    %73 = vector.broadcast %62 : vector<128x1xi32> to vector<128x64xi32>
    %74 = arith.cmpi eq, %72, %73 : vector<128x64xi32>
    %75 = arith.extui %74 : vector<128x64xi1> to vector<128x64xi32>
    %76 = arith.sitofp %75 : vector<128x64xi32> to vector<128x64xf32>
    %cst_45 = arith.constant dense<0.000000e+00> : vector<64x64xf32>
    %77 = tpu.matmul %71, %76, %cst_45 {dimension_numbers = #tpu.dot_dimension_numbers<[1], [0], [0], [1], [0, 0, 1, 1], [], []>} : vector<64x128xf32>, vector<128x64xf32>, vector<64x64xf32> -> vector<64x64xf32>
    %78 = tpu.iota {dimensions = array<i32: 0>} : vector<64x64xi32>
    %79 = tpu.iota {dimensions = array<i32: 1>} : vector<64x64xi32>
    %80 = arith.cmpi eq, %78, %79 : vector<64x64xi32>
    %81 = arith.extui %80 : vector<64x64xi1> to vector<64x64xi32>
    %82 = arith.sitofp %81 : vector<64x64xi32> to vector<64x64xf32>
    %83 = arith.addf %77, %82 : vector<64x64xf32>
    %c0_46 = arith.constant 0 : index
    %c0_47 = arith.constant 0 : index
    %84 = vector.load %arg19[%c0_46, %c0_47] : memref<64x32xf32, #tpu.memory_space<vmem>>, vector<64x32xf32>
    %cst_48 = arith.constant dense<0.000000e+00> : vector<64x32xf32>
    %85 = tpu.matmul %83, %84, %cst_48 {dimension_numbers = #tpu.dot_dimension_numbers<[1], [0], [0], [1], [0, 0, 1, 1], [], []>} : vector<64x64xf32>, vector<64x32xf32>, vector<64x32xf32> -> vector<64x32xf32>
    %c0_49 = arith.constant 0 : index
    %c0_50 = arith.constant 0 : index
    %86 = vector.load %arg12[%c0_49, %c0_50] : memref<64x32xf32, #tpu.memory_space<vmem>>, vector<64x32xf32>
    %87 = vector.extract_strided_slice %85 {offsets = [0, 0], sizes = [16, 32], strides = [1, 1]} : vector<64x32xf32> to vector<16x32xf32>
    %c0_51 = arith.constant 0 : index
    %c0_52 = arith.constant 0 : index
    %c0_53 = arith.constant 0 : index
    %88 = vector.load %arg11[%c0_51, %c0_52, %c0_53] : memref<4x32x32xf32, #tpu.memory_space<vmem>>, vector<1x32x32xf32>
    %89 = vector.shape_cast %88 : vector<1x32x32xf32> to vector<32x32xf32>
    %cst_54 = arith.constant dense<0.000000e+00> : vector<16x32xf32>
    %90 = tpu.matmul %87, %89, %cst_54 {dimension_numbers = #tpu.dot_dimension_numbers<[1], [0], [0], [1], [0, 0, 1, 1], [], []>} : vector<16x32xf32>, vector<32x32xf32>, vector<16x32xf32> -> vector<16x32xf32>
    %91 = vector.extract_strided_slice %86 {offsets = [0, 0], sizes = [16, 32], strides = [1, 1]} : vector<64x32xf32> to vector<16x32xf32>
    %92 = arith.addf %90, %91 : vector<16x32xf32>
    %cst_55 = arith.constant 0.000000e+00 : f32
    %93 = vector.broadcast %cst_55 : f32 to vector<16x32xf32>
    %94 = arith.maximumf %92, %93 : vector<16x32xf32>
    %c0_56 = arith.constant 0 : index
    %c0_57 = arith.constant 0 : index
    %95 = vector.load %arg19[%c0_56, %c0_57] : memref<64x32xf32, #tpu.memory_space<vmem>>, vector<16x32xf32>
    tpu.vector_store %arg19[%c0_56, %c0_57], %94 {strides = array<i32>} : memref<64x32xf32, #tpu.memory_space<vmem>>, vector<16x32xf32>,
    %96 = vector.extract_strided_slice %85 {offsets = [16, 0], sizes = [16, 32], strides = [1, 1]} : vector<64x32xf32> to vector<16x32xf32>
    %c1_58 = arith.constant 1 : index
    %c0_59 = arith.constant 0 : index
    %c0_60 = arith.constant 0 : index
    %97 = vector.load %arg11[%c1_58, %c0_59, %c0_60] : memref<4x32x32xf32, #tpu.memory_space<vmem>>, vector<1x32x32xf32>
    %98 = vector.shape_cast %97 : vector<1x32x32xf32> to vector<32x32xf32>
    %cst_61 = arith.constant dense<0.000000e+00> : vector<16x32xf32>
    %99 = tpu.matmul %96, %98, %cst_61 {dimension_numbers = #tpu.dot_dimension_numbers<[1], [0], [0], [1], [0, 0, 1, 1], [], []>} : vector<16x32xf32>, vector<32x32xf32>, vector<16x32xf32> -> vector<16x32xf32>
    %100 = vector.extract_strided_slice %86 {offsets = [16, 0], sizes = [16, 32], strides = [1, 1]} : vector<64x32xf32> to vector<16x32xf32>
    %101 = arith.addf %99, %100 : vector<16x32xf32>
    %cst_62 = arith.constant 0.000000e+00 : f32
    %102 = vector.broadcast %cst_62 : f32 to vector<16x32xf32>
    %103 = arith.maximumf %101, %102 : vector<16x32xf32>
    %c16_63 = arith.constant 16 : index
    %c0_64 = arith.constant 0 : index
    %104 = vector.load %arg19[%c16_63, %c0_64] : memref<64x32xf32, #tpu.memory_space<vmem>>, vector<16x32xf32>
    tpu.vector_store %arg19[%c16_63, %c0_64], %103 {strides = array<i32>} : memref<64x32xf32, #tpu.memory_space<vmem>>, vector<16x32xf32>,
    %105 = vector.extract_strided_slice %85 {offsets = [32, 0], sizes = [16, 32], strides = [1, 1]} : vector<64x32xf32> to vector<16x32xf32>
    %c2_65 = arith.constant 2 : index
    %c0_66 = arith.constant 0 : index
    %c0_67 = arith.constant 0 : index
    %106 = vector.load %arg11[%c2_65, %c0_66, %c0_67] : memref<4x32x32xf32, #tpu.memory_space<vmem>>, vector<1x32x32xf32>
    %107 = vector.shape_cast %106 : vector<1x32x32xf32> to vector<32x32xf32>
    %cst_68 = arith.constant dense<0.000000e+00> : vector<16x32xf32>
    %108 = tpu.matmul %105, %107, %cst_68 {dimension_numbers = #tpu.dot_dimension_numbers<[1], [0], [0], [1], [0, 0, 1, 1], [], []>} : vector<16x32xf32>, vector<32x32xf32>, vector<16x32xf32> -> vector<16x32xf32>
    %109 = vector.extract_strided_slice %86 {offsets = [32, 0], sizes = [16, 32], strides = [1, 1]} : vector<64x32xf32> to vector<16x32xf32>
    %110 = arith.addf %108, %109 : vector<16x32xf32>
    %cst_69 = arith.constant 0.000000e+00 : f32
    %111 = vector.broadcast %cst_69 : f32 to vector<16x32xf32>
    %112 = arith.maximumf %110, %111 : vector<16x32xf32>
    %c32 = arith.constant 32 : index
    %c0_70 = arith.constant 0 : index
    %113 = vector.load %arg19[%c32, %c0_70] : memref<64x32xf32, #tpu.memory_space<vmem>>, vector<16x32xf32>
    tpu.vector_store %arg19[%c32, %c0_70], %112 {strides = array<i32>} : memref<64x32xf32, #tpu.memory_space<vmem>>, vector<16x32xf32>,
    %114 = vector.extract_strided_slice %85 {offsets = [48, 0], sizes = [16, 32], strides = [1, 1]} : vector<64x32xf32> to vector<16x32xf32>
    %c3_71 = arith.constant 3 : index
    %c0_72 = arith.constant 0 : index
    %c0_73 = arith.constant 0 : index
    %115 = vector.load %arg11[%c3_71, %c0_72, %c0_73] : memref<4x32x32xf32, #tpu.memory_space<vmem>>, vector<1x32x32xf32>
    %116 = vector.shape_cast %115 : vector<1x32x32xf32> to vector<32x32xf32>
    %cst_74 = arith.constant dense<0.000000e+00> : vector<16x32xf32>
    %117 = tpu.matmul %114, %116, %cst_74 {dimension_numbers = #tpu.dot_dimension_numbers<[1], [0], [0], [1], [0, 0, 1, 1], [], []>} : vector<16x32xf32>, vector<32x32xf32>, vector<16x32xf32> -> vector<16x32xf32>
    %118 = vector.extract_strided_slice %86 {offsets = [48, 0], sizes = [16, 32], strides = [1, 1]} : vector<64x32xf32> to vector<16x32xf32>
    %119 = arith.addf %117, %118 : vector<16x32xf32>
    %cst_75 = arith.constant 0.000000e+00 : f32
    %120 = vector.broadcast %cst_75 : f32 to vector<16x32xf32>
    %121 = arith.maximumf %119, %120 : vector<16x32xf32>
    %c48 = arith.constant 48 : index
    %c0_76 = arith.constant 0 : index
    %122 = vector.load %arg19[%c48, %c0_76] : memref<64x32xf32, #tpu.memory_space<vmem>>, vector<16x32xf32>
    tpu.vector_store %arg19[%c48, %c0_76], %121 {strides = array<i32>} : memref<64x32xf32, #tpu.memory_space<vmem>>, vector<16x32xf32>,
    %c0_77 = arith.constant 0 : index
    %c0_78 = arith.constant 0 : index
    %123 = vector.load %arg19[%c0_77, %c0_78] : memref<64x32xf32, #tpu.memory_space<vmem>>, vector<64x32xf32>
    %c0_79 = arith.constant 0 : index
    %c0_80 = arith.constant 0 : index
    %124 = vector.load %arg13[%c0_79, %c0_80] : memref<32x96xf32, #tpu.memory_space<vmem>>, vector<32x96xf32>
    %cst_81 = arith.constant dense<0.000000e+00> : vector<64x96xf32>
    %125 = tpu.matmul %123, %124, %cst_81 {dimension_numbers = #tpu.dot_dimension_numbers<[1], [0], [0], [1], [0, 0, 1, 1], [], []>} : vector<64x32xf32>, vector<32x96xf32>, vector<64x96xf32> -> vector<64x96xf32>
    %c0_82 = arith.constant 0 : index
    %c0_83 = arith.constant 0 : index
    %126 = vector.load %arg15[%c0_82, %c0_83] : memref<1x96xf32, #tpu.memory_space<vmem>>, vector<1x96xf32>
    %127 = vector.broadcast %126 : vector<1x96xf32> to vector<64x96xf32>
    %128 = arith.addf %125, %127 : vector<64x96xf32>
    %c0_84 = arith.constant 0 : index
    %c0_85 = arith.constant 0 : index
    %129 = vector.load %arg14[%c0_84, %c0_85] : memref<32x96xf32, #tpu.memory_space<vmem>>, vector<32x96xf32>
    %c0_86 = arith.constant 0 : index
    %c0_87 = arith.constant 0 : index
    %130 = vector.load %arg16[%c0_86, %c0_87] : memref<1x96xf32, #tpu.memory_space<vmem>>, vector<1x96xf32>
    %cst_88 = arith.constant 0.000000e+00 : f32
    %131 = vector.broadcast %cst_88 : f32 to vector<16x32xf32>
    %132 = vector.extract_strided_slice %128 {offsets = [0, 0], sizes = [16, 96], strides = [1, 1]} : vector<64x96xf32> to vector<16x96xf32>
    %cst_89 = arith.constant dense<0.000000e+00> : vector<16x96xf32>
    %133 = tpu.matmul %131, %129, %cst_89 {dimension_numbers = #tpu.dot_dimension_numbers<[1], [0], [0], [1], [0, 0, 1, 1], [], []>} : vector<16x32xf32>, vector<32x96xf32>, vector<16x96xf32> -> vector<16x96xf32>
    %134 = vector.broadcast %130 : vector<1x96xf32> to vector<16x96xf32>
    %135 = arith.addf %133, %134 : vector<16x96xf32>
    %136 = vector.extract_strided_slice %132 {offsets = [0, 0], sizes = [16, 32], strides = [1, 1]} : vector<16x96xf32> to vector<16x32xf32>
    %137 = vector.extract_strided_slice %135 {offsets = [0, 0], sizes = [16, 32], strides = [1, 1]} : vector<16x96xf32> to vector<16x32xf32>
    %138 = arith.addf %136, %137 : vector<16x32xf32>
    %139 = arith.negf %138 : vector<16x32xf32>
    %140 = math.exp %139 : vector<16x32xf32>
    %cst_90 = arith.constant 1.000000e+00 : f32
    %141 = vector.broadcast %cst_90 : f32 to vector<16x32xf32>
    %142 = arith.addf %141, %140 : vector<16x32xf32>
    %143 = arith.divf %141, %142 : vector<16x32xf32>
    %144 = vector.extract_strided_slice %132 {offsets = [0, 32], sizes = [16, 32], strides = [1, 1]} : vector<16x96xf32> to vector<16x32xf32>
    %145 = vector.extract_strided_slice %135 {offsets = [0, 32], sizes = [16, 32], strides = [1, 1]} : vector<16x96xf32> to vector<16x32xf32>
    %146 = arith.addf %144, %145 : vector<16x32xf32>
    %147 = arith.negf %146 : vector<16x32xf32>
    %148 = math.exp %147 : vector<16x32xf32>
    %cst_91 = arith.constant 1.000000e+00 : f32
    %149 = vector.broadcast %cst_91 : f32 to vector<16x32xf32>
    %150 = arith.addf %149, %148 : vector<16x32xf32>
    %151 = arith.divf %149, %150 : vector<16x32xf32>
    %152 = vector.extract_strided_slice %132 {offsets = [0, 64], sizes = [16, 32], strides = [1, 1]} : vector<16x96xf32> to vector<16x32xf32>
    %153 = vector.extract_strided_slice %135 {offsets = [0, 64], sizes = [16, 32], strides = [1, 1]} : vector<16x96xf32> to vector<16x32xf32>
    %154 = arith.mulf %143, %153 : vector<16x32xf32>
    %155 = arith.addf %152, %154 : vector<16x32xf32>
    %156 = math.tanh %155 : vector<16x32xf32>
    %cst_92 = arith.constant 1.000000e+00 : f32
    %157 = vector.broadcast %cst_92 : f32 to vector<16x32xf32>
    %158 = arith.subf %157, %151 : vector<16x32xf32>
    %159 = arith.mulf %158, %156 : vector<16x32xf32>
    %160 = arith.mulf %151, %131 : vector<16x32xf32>
    %161 = arith.addf %159, %160 : vector<16x32xf32>
    %162 = vector.extract_strided_slice %128 {offsets = [16, 0], sizes = [16, 96], strides = [1, 1]} : vector<64x96xf32> to vector<16x96xf32>
    %cst_93 = arith.constant dense<0.000000e+00> : vector<16x96xf32>
    %163 = tpu.matmul %161, %129, %cst_93 {dimension_numbers = #tpu.dot_dimension_numbers<[1], [0], [0], [1], [0, 0, 1, 1], [], []>} : vector<16x32xf32>, vector<32x96xf32>, vector<16x96xf32> -> vector<16x96xf32>
    %164 = vector.broadcast %130 : vector<1x96xf32> to vector<16x96xf32>
    %165 = arith.addf %163, %164 : vector<16x96xf32>
    %166 = vector.extract_strided_slice %162 {offsets = [0, 0], sizes = [16, 32], strides = [1, 1]} : vector<16x96xf32> to vector<16x32xf32>
    %167 = vector.extract_strided_slice %165 {offsets = [0, 0], sizes = [16, 32], strides = [1, 1]} : vector<16x96xf32> to vector<16x32xf32>
    %168 = arith.addf %166, %167 : vector<16x32xf32>
    %169 = arith.negf %168 : vector<16x32xf32>
    %170 = math.exp %169 : vector<16x32xf32>
    %cst_94 = arith.constant 1.000000e+00 : f32
    %171 = vector.broadcast %cst_94 : f32 to vector<16x32xf32>
    %172 = arith.addf %171, %170 : vector<16x32xf32>
    %173 = arith.divf %171, %172 : vector<16x32xf32>
    %174 = vector.extract_strided_slice %162 {offsets = [0, 32], sizes = [16, 32], strides = [1, 1]} : vector<16x96xf32> to vector<16x32xf32>
    %175 = vector.extract_strided_slice %165 {offsets = [0, 32], sizes = [16, 32], strides = [1, 1]} : vector<16x96xf32> to vector<16x32xf32>
    %176 = arith.addf %174, %175 : vector<16x32xf32>
    %177 = arith.negf %176 : vector<16x32xf32>
    %178 = math.exp %177 : vector<16x32xf32>
    %cst_95 = arith.constant 1.000000e+00 : f32
    %179 = vector.broadcast %cst_95 : f32 to vector<16x32xf32>
    %180 = arith.addf %179, %178 : vector<16x32xf32>
    %181 = arith.divf %179, %180 : vector<16x32xf32>
    %182 = vector.extract_strided_slice %162 {offsets = [0, 64], sizes = [16, 32], strides = [1, 1]} : vector<16x96xf32> to vector<16x32xf32>
    %183 = vector.extract_strided_slice %165 {offsets = [0, 64], sizes = [16, 32], strides = [1, 1]} : vector<16x96xf32> to vector<16x32xf32>
    %184 = arith.mulf %173, %183 : vector<16x32xf32>
    %185 = arith.addf %182, %184 : vector<16x32xf32>
    %186 = math.tanh %185 : vector<16x32xf32>
    %cst_96 = arith.constant 1.000000e+00 : f32
    %187 = vector.broadcast %cst_96 : f32 to vector<16x32xf32>
    %188 = arith.subf %187, %181 : vector<16x32xf32>
    %189 = arith.mulf %188, %186 : vector<16x32xf32>
    %190 = arith.mulf %181, %161 : vector<16x32xf32>
    %191 = arith.addf %189, %190 : vector<16x32xf32>
    %192 = vector.extract_strided_slice %128 {offsets = [32, 0], sizes = [16, 96], strides = [1, 1]} : vector<64x96xf32> to vector<16x96xf32>
    %cst_97 = arith.constant dense<0.000000e+00> : vector<16x96xf32>
    %193 = tpu.matmul %191, %129, %cst_97 {dimension_numbers = #tpu.dot_dimension_numbers<[1], [0], [0], [1], [0, 0, 1, 1], [], []>} : vector<16x32xf32>, vector<32x96xf32>, vector<16x96xf32> -> vector<16x96xf32>
    %194 = vector.broadcast %130 : vector<1x96xf32> to vector<16x96xf32>
    %195 = arith.addf %193, %194 : vector<16x96xf32>
    %196 = vector.extract_strided_slice %192 {offsets = [0, 0], sizes = [16, 32], strides = [1, 1]} : vector<16x96xf32> to vector<16x32xf32>
    %197 = vector.extract_strided_slice %195 {offsets = [0, 0], sizes = [16, 32], strides = [1, 1]} : vector<16x96xf32> to vector<16x32xf32>
    %198 = arith.addf %196, %197 : vector<16x32xf32>
    %199 = arith.negf %198 : vector<16x32xf32>
    %200 = math.exp %199 : vector<16x32xf32>
    %cst_98 = arith.constant 1.000000e+00 : f32
    %201 = vector.broadcast %cst_98 : f32 to vector<16x32xf32>
    %202 = arith.addf %201, %200 : vector<16x32xf32>
    %203 = arith.divf %201, %202 : vector<16x32xf32>
    %204 = vector.extract_strided_slice %192 {offsets = [0, 32], sizes = [16, 32], strides = [1, 1]} : vector<16x96xf32> to vector<16x32xf32>
    %205 = vector.extract_strided_slice %195 {offsets = [0, 32], sizes = [16, 32], strides = [1, 1]} : vector<16x96xf32> to vector<16x32xf32>
    %206 = arith.addf %204, %205 : vector<16x32xf32>
    %207 = arith.negf %206 : vector<16x32xf32>
    %208 = math.exp %207 : vector<16x32xf32>
    %cst_99 = arith.constant 1.000000e+00 : f32
    %209 = vector.broadcast %cst_99 : f32 to vector<16x32xf32>
    %210 = arith.addf %209, %208 : vector<16x32xf32>
    %211 = arith.divf %209, %210 : vector<16x32xf32>
    %212 = vector.extract_strided_slice %192 {offsets = [0, 64], sizes = [16, 32], strides = [1, 1]} : vector<16x96xf32> to vector<16x32xf32>
    %213 = vector.extract_strided_slice %195 {offsets = [0, 64], sizes = [16, 32], strides = [1, 1]} : vector<16x96xf32> to vector<16x32xf32>
    %214 = arith.mulf %203, %213 : vector<16x32xf32>
    %215 = arith.addf %212, %214 : vector<16x32xf32>
    %216 = math.tanh %215 : vector<16x32xf32>
    %cst_100 = arith.constant 1.000000e+00 : f32
    %217 = vector.broadcast %cst_100 : f32 to vector<16x32xf32>
    %218 = arith.subf %217, %211 : vector<16x32xf32>
    %219 = arith.mulf %218, %216 : vector<16x32xf32>
    %220 = arith.mulf %211, %191 : vector<16x32xf32>
    %221 = arith.addf %219, %220 : vector<16x32xf32>
    %222 = vector.extract_strided_slice %128 {offsets = [48, 0], sizes = [16, 96], strides = [1, 1]} : vector<64x96xf32> to vector<16x96xf32>
    %cst_101 = arith.constant dense<0.000000e+00> : vector<16x96xf32>
    %223 = tpu.matmul %221, %129, %cst_101 {dimension_numbers = #tpu.dot_dimension_numbers<[1], [0], [0], [1], [0, 0, 1, 1], [], []>} : vector<16x32xf32>, vector<32x96xf32>, vector<16x96xf32> -> vector<16x96xf32>
    %224 = vector.broadcast %130 : vector<1x96xf32> to vector<16x96xf32>
    %225 = arith.addf %223, %224 : vector<16x96xf32>
    %226 = vector.extract_strided_slice %222 {offsets = [0, 0], sizes = [16, 32], strides = [1, 1]} : vector<16x96xf32> to vector<16x32xf32>
    %227 = vector.extract_strided_slice %225 {offsets = [0, 0], sizes = [16, 32], strides = [1, 1]} : vector<16x96xf32> to vector<16x32xf32>
    %228 = arith.addf %226, %227 : vector<16x32xf32>
    %229 = arith.negf %228 : vector<16x32xf32>
    %230 = math.exp %229 : vector<16x32xf32>
    %cst_102 = arith.constant 1.000000e+00 : f32
    %231 = vector.broadcast %cst_102 : f32 to vector<16x32xf32>
    %232 = arith.addf %231, %230 : vector<16x32xf32>
    %233 = arith.divf %231, %232 : vector<16x32xf32>
    %234 = vector.extract_strided_slice %222 {offsets = [0, 32], sizes = [16, 32], strides = [1, 1]} : vector<16x96xf32> to vector<16x32xf32>
    %235 = vector.extract_strided_slice %225 {offsets = [0, 32], sizes = [16, 32], strides = [1, 1]} : vector<16x96xf32> to vector<16x32xf32>
    %236 = arith.addf %234, %235 : vector<16x32xf32>
    %237 = arith.negf %236 : vector<16x32xf32>
    %238 = math.exp %237 : vector<16x32xf32>
    %cst_103 = arith.constant 1.000000e+00 : f32
    %239 = vector.broadcast %cst_103 : f32 to vector<16x32xf32>
    %240 = arith.addf %239, %238 : vector<16x32xf32>
    %241 = arith.divf %239, %240 : vector<16x32xf32>
    %242 = vector.extract_strided_slice %222 {offsets = [0, 64], sizes = [16, 32], strides = [1, 1]} : vector<16x96xf32> to vector<16x32xf32>
    %243 = vector.extract_strided_slice %225 {offsets = [0, 64], sizes = [16, 32], strides = [1, 1]} : vector<16x96xf32> to vector<16x32xf32>
    %244 = arith.mulf %233, %243 : vector<16x32xf32>
    %245 = arith.addf %242, %244 : vector<16x32xf32>
    %246 = math.tanh %245 : vector<16x32xf32>
    %cst_104 = arith.constant 1.000000e+00 : f32
    %247 = vector.broadcast %cst_104 : f32 to vector<16x32xf32>
    %248 = arith.subf %247, %241 : vector<16x32xf32>
    %249 = arith.mulf %248, %246 : vector<16x32xf32>
    %250 = arith.mulf %241, %221 : vector<16x32xf32>
    %251 = arith.addf %249, %250 : vector<16x32xf32>
    %c0_105 = arith.constant 0 : index
    %c0_106 = arith.constant 0 : index
    %252 = vector.load %arg17[%c0_105, %c0_106] : memref<1x32xf32, #tpu.memory_space<vmem>>, vector<1x32xf32>
    %253 = math.tanh %34 : vector<16x32xf32>
    %254 = vector.broadcast %252 : vector<1x32xf32> to vector<16x32xf32>
    %255 = arith.mulf %253, %254 : vector<16x32xf32>
    %cst_107 = arith.constant dense<0.000000e+00> : vector<16xf32>
    %256 = vector.multi_reduction <add>, %255, %cst_107 [1] : vector<16x32xf32> to vector<16xf32>
    %257 = vector.shape_cast %256 : vector<16xf32> to vector<16x1xf32>
    %258 = math.tanh %161 : vector<16x32xf32>
    %259 = vector.broadcast %252 : vector<1x32xf32> to vector<16x32xf32>
    %260 = arith.mulf %258, %259 : vector<16x32xf32>
    %cst_108 = arith.constant dense<0.000000e+00> : vector<16xf32>
    %261 = vector.multi_reduction <add>, %260, %cst_108 [1] : vector<16x32xf32> to vector<16xf32>
    %262 = vector.shape_cast %261 : vector<16xf32> to vector<16x1xf32>
    %263 = math.tanh %191 : vector<16x32xf32>
    %264 = vector.broadcast %252 : vector<1x32xf32> to vector<16x32xf32>
    %265 = arith.mulf %263, %264 : vector<16x32xf32>
    %cst_109 = arith.constant dense<0.000000e+00> : vector<16xf32>
    %266 = vector.multi_reduction <add>, %265, %cst_109 [1] : vector<16x32xf32> to vector<16xf32>
    %267 = vector.shape_cast %266 : vector<16xf32> to vector<16x1xf32>
    %268 = math.tanh %221 : vector<16x32xf32>
    %269 = vector.broadcast %252 : vector<1x32xf32> to vector<16x32xf32>
    %270 = arith.mulf %268, %269 : vector<16x32xf32>
    %cst_110 = arith.constant dense<0.000000e+00> : vector<16xf32>
    %271 = vector.multi_reduction <add>, %270, %cst_110 [1] : vector<16x32xf32> to vector<16xf32>
    %272 = vector.shape_cast %271 : vector<16xf32> to vector<16x1xf32>
    %273 = math.tanh %251 : vector<16x32xf32>
    %274 = vector.broadcast %252 : vector<1x32xf32> to vector<16x32xf32>
    %275 = arith.mulf %273, %274 : vector<16x32xf32>
    %cst_111 = arith.constant dense<0.000000e+00> : vector<16xf32>
    %276 = vector.multi_reduction <add>, %275, %cst_111 [1] : vector<16x32xf32> to vector<16xf32>
    %277 = vector.shape_cast %276 : vector<16xf32> to vector<16x1xf32>
    %278 = arith.maximumf %257, %262 : vector<16x1xf32>
    %279 = arith.maximumf %278, %267 : vector<16x1xf32>
    %280 = arith.maximumf %279, %272 : vector<16x1xf32>
    %281 = arith.maximumf %280, %277 : vector<16x1xf32>
    %282 = arith.subf %257, %281 : vector<16x1xf32>
    %283 = math.exp %282 : vector<16x1xf32>
    %284 = arith.subf %262, %281 : vector<16x1xf32>
    %285 = math.exp %284 : vector<16x1xf32>
    %286 = arith.subf %267, %281 : vector<16x1xf32>
    %287 = math.exp %286 : vector<16x1xf32>
    %288 = arith.subf %272, %281 : vector<16x1xf32>
    %289 = math.exp %288 : vector<16x1xf32>
    %290 = arith.subf %277, %281 : vector<16x1xf32>
    %291 = math.exp %290 : vector<16x1xf32>
    %292 = arith.addf %283, %285 : vector<16x1xf32>
    %293 = arith.addf %292, %287 : vector<16x1xf32>
    %294 = arith.addf %293, %289 : vector<16x1xf32>
    %295 = arith.addf %294, %291 : vector<16x1xf32>
    %296 = tpu.reciprocal %295 {approx = true} : vector<16x1xf32> -> vector<16x1xf32>
    %297 = arith.mulf %283, %296 : vector<16x1xf32>
    %298 = vector.broadcast %297 : vector<16x1xf32> to vector<16x32xf32>
    %299 = arith.mulf %34, %298 : vector<16x32xf32>
    %300 = arith.mulf %285, %296 : vector<16x1xf32>
    %301 = vector.broadcast %300 : vector<16x1xf32> to vector<16x32xf32>
    %302 = arith.mulf %161, %301 : vector<16x32xf32>
    %303 = arith.addf %299, %302 : vector<16x32xf32>
    %304 = arith.mulf %287, %296 : vector<16x1xf32>
    %305 = vector.broadcast %304 : vector<16x1xf32> to vector<16x32xf32>
    %306 = arith.mulf %191, %305 : vector<16x32xf32>
    %307 = arith.addf %303, %306 : vector<16x32xf32>
    %308 = arith.mulf %289, %296 : vector<16x1xf32>
    %309 = vector.broadcast %308 : vector<16x1xf32> to vector<16x32xf32>
    %310 = arith.mulf %221, %309 : vector<16x32xf32>
    %311 = arith.addf %307, %310 : vector<16x32xf32>
    %312 = arith.mulf %291, %296 : vector<16x1xf32>
    %313 = vector.broadcast %312 : vector<16x1xf32> to vector<16x32xf32>
    %314 = arith.mulf %251, %313 : vector<16x32xf32>
    %315 = arith.addf %311, %314 : vector<16x32xf32>
    %c0_112 = arith.constant 0 : index
    %c0_113 = arith.constant 0 : index
    %c0_114 = arith.constant 0 : index
    %316 = vector.load %arg18[%c0_112, %c0_113, %c0_114] : memref<1x16x32xf32, #tpu.memory_space<vmem>>, vector<1x16x32xf32>
    %317 = vector.shape_cast %316 : vector<1x16x32xf32> to vector<16x32xf32>
    %318 = vector.shape_cast %315 : vector<16x32xf32> to vector<1x16x32xf32>
    tpu.vector_store %arg18[%c0_112, %c0_113, %c0_114], %318 {strides = array<i32>} : memref<1x16x32xf32, #tpu.memory_space<vmem>>, vector<1x16x32xf32>,
    return
  }
  func.func @transform_0(%arg0: i32) -> (i32, i32, i32) {
    %c0_i32 = arith.constant 0 : i32
    %c0_i32_0 = arith.constant 0 : i32
    %c0_i32_1 = arith.constant 0 : i32
    return %arg0, %c0_i32, %c0_i32_0 : i32, i32, i32
  }
  func.func @transform_1(%arg0: i32) -> (i32, i32, i32) {
    %c0_i32 = arith.constant 0 : i32
    %c0_i32_0 = arith.constant 0 : i32
    %c0_i32_1 = arith.constant 0 : i32
    return %arg0, %c0_i32, %c0_i32_0 : i32, i32, i32
  }
  func.func @transform_2(%arg0: i32) -> (i32, i32, i32) {
    %c0_i32 = arith.constant 0 : i32
    %c0_i32_0 = arith.constant 0 : i32
    %c0_i32_1 = arith.constant 0 : i32
    return %arg0, %c0_i32, %c0_i32_0 : i32, i32, i32
  }
  func.func @transform_3(%arg0: i32) -> (i32, i32, i32) {
    %c0_i32 = arith.constant 0 : i32
    %c0_i32_0 = arith.constant 0 : i32
    %c0_i32_1 = arith.constant 0 : i32
    return %arg0, %c0_i32, %c0_i32_0 : i32, i32, i32
  }
  func.func @transform_4(%arg0: i32) -> (i32, i32, i32) {
    %c0_i32 = arith.constant 0 : i32
    %c0_i32_0 = arith.constant 0 : i32
    %c0_i32_1 = arith.constant 0 : i32
    return %arg0, %c0_i32, %c0_i32_0 : i32, i32, i32
  }
  func.func @transform_5(%arg0: i32) -> (i32, i32, i32) {
    %c0_i32 = arith.constant 0 : i32
    %c0_i32_0 = arith.constant 0 : i32
    %c0_i32_1 = arith.constant 0 : i32
    return %arg0, %c0_i32, %c0_i32_0 : i32, i32, i32
  }
  func.func @transform_6(%arg0: i32) -> (i32, i32, i32) {
    %c0_i32 = arith.constant 0 : i32
    %c0_i32_0 = arith.constant 0 : i32
    %c0_i32_1 = arith.constant 0 : i32
    return %arg0, %c0_i32, %c0_i32_0 : i32, i32, i32
  }
  func.func @transform_7(%arg0: i32) -> (i32, i32, i32) {
    %c0_i32 = arith.constant 0 : i32
    %c0_i32_0 = arith.constant 0 : i32
    %c0_i32_1 = arith.constant 0 : i32
    %c0_i32_2 = arith.constant 0 : i32
    return %c0_i32, %c0_i32_0, %c0_i32_1 : i32, i32, i32
  }
  func.func @transform_8(%arg0: i32) -> (i32, i32) {
    %c0_i32 = arith.constant 0 : i32
    %c0_i32_0 = arith.constant 0 : i32
    %c0_i32_1 = arith.constant 0 : i32
    return %c0_i32, %c0_i32_0 : i32, i32
  }
  func.func @transform_9(%arg0: i32) -> (i32, i32) {
    %c0_i32 = arith.constant 0 : i32
    %c0_i32_0 = arith.constant 0 : i32
    %c0_i32_1 = arith.constant 0 : i32
    return %c0_i32, %c0_i32_0 : i32, i32
  }
  func.func @transform_10(%arg0: i32) -> (i32, i32, i32) {
    %c0_i32 = arith.constant 0 : i32
    %c0_i32_0 = arith.constant 0 : i32
    %c0_i32_1 = arith.constant 0 : i32
    %c0_i32_2 = arith.constant 0 : i32
    return %c0_i32, %c0_i32_0, %c0_i32_1 : i32, i32, i32
  }
  func.func @transform_11(%arg0: i32) -> (i32, i32) {
    %c0_i32 = arith.constant 0 : i32
    %c0_i32_0 = arith.constant 0 : i32
    %c0_i32_1 = arith.constant 0 : i32
    return %c0_i32, %c0_i32_0 : i32, i32
  }
  func.func @transform_12(%arg0: i32) -> (i32, i32) {
    %c0_i32 = arith.constant 0 : i32
    %c0_i32_0 = arith.constant 0 : i32
    %c0_i32_1 = arith.constant 0 : i32
    return %c0_i32, %c0_i32_0 : i32, i32
  }
  func.func @transform_13(%arg0: i32) -> (i32, i32) {
    %c0_i32 = arith.constant 0 : i32
    %c0_i32_0 = arith.constant 0 : i32
    %c0_i32_1 = arith.constant 0 : i32
    return %c0_i32, %c0_i32_0 : i32, i32
  }
  func.func @transform_14(%arg0: i32) -> (i32, i32) {
    %c0_i32 = arith.constant 0 : i32
    %c0_i32_0 = arith.constant 0 : i32
    %c0_i32_1 = arith.constant 0 : i32
    return %c0_i32, %c0_i32_0 : i32, i32
  }
  func.func @transform_15(%arg0: i32) -> (i32, i32) {
    %c0_i32 = arith.constant 0 : i32
    %c0_i32_0 = arith.constant 0 : i32
    %c0_i32_1 = arith.constant 0 : i32
    return %c0_i32, %c0_i32_0 : i32, i32
  }
  func.func @transform_16(%arg0: i32) -> (i32, i32) {
    %c0_i32 = arith.constant 0 : i32
    %c0_i32_0 = arith.constant 0 : i32
    %c0_i32_1 = arith.constant 0 : i32
    return %c0_i32, %c0_i32_0 : i32, i32
  }
  func.func @transform_17(%arg0: i32) -> (i32, i32, i32) {
    %c0_i32 = arith.constant 0 : i32
    %c0_i32_0 = arith.constant 0 : i32
    %c0_i32_1 = arith.constant 0 : i32
    return %arg0, %c0_i32, %c0_i32_0 : i32, i32, i32
  }
}

</mosaic_0001>

<bundles_post_ra>
// kernel: squeeze.2
= control target key start
LH: loop header
LB: loop body
LE: loop exit
PB: predicated region body
PF: predicated region fallthrough
CT: control target
= control target key end

     0   :  { %s29_s10 = smov 3  ;;  %s10_s11 = smov 3  ;;  %vm12_vm0 = vcmask 261120   ;;  %vm19_vm1 = vcmask 1048320   ;;  %vm26_vm2 = vcmask 785920   ;;  %vm33_vm3 = vcmask 523520   ;;  %s67_s0 = inlined_call_operand.vmem [shape: s32[2,4,32], index: 0, kind: input, shape index: {}]   ;;  %s68_s1 = inlined_call_operand.vmem [shape: s32[2,1,128], index: 1, kind: output, shape index: {}]  }
   0x1   :  { %v41_v0 = vld [vmem:[%s67_s0 + $0x4] sm:$0xf]  ;;  %v8_v1 = vld [vmem:[%s67_s0] sm:$0xf]  ;;  %s15_s0 = smov 3  ;;  %s22_s12 = smov 3 }
   0x2   :  { %7 = vst [vmem:[#allocation1 + $0x8] sm:$0xf] %v41_v0  ;;  %9 = vst [vmem:[#allocation1] sm:$0xf] %v8_v1  ;;  %s45_s13 = smov 96   ;;  %s46_s14 = smov 32  }
   0x3   :  { %s47_s15 = smov 64  }
   0x9   :  { %v16_v2 = vld [vmem:[#allocation1 + $0x3] ss:$8 sm:%s15_s0]   ;;  %v30_v3 = vld [vmem:[#allocation1 + $0x1] ss:$8 sm:%s29_s10]   ;;  %v11_v4 = vld [vmem:[#allocation1] ss:$8 sm:%s10_s11]  }
   0xa   :  { %17 = vrot.lane.b32.xlu0 %v16_v2, %s45_s13  ;;  %31 = vrot.lane.b32.xlu1 %v30_v3, %s46_s14  ;;  %v23_v5 = vld [vmem:[#allocation1 + $0x2] ss:$8 sm:%s22_s12]   ;;  %13 = vst.msk [vmem:[#allocation0] sm:$0x3] %vm12_vm0, %v11_v4  }
   0xe   :  { %24 = vrot.lane.b32.xlu0 %v23_v5, %s47_s15 }
  0x7c   :  { %v18_v6 = vpop.permute.xlu0 %17   ;;  %v32_v7 = vpop.permute.xlu1 %31  }
  0x7d   :  { %20 = vst.msk [vmem:[#allocation0] sm:$0x3] %vm19_vm1, %v18_v6  }
  0x80   :  { %v25_v8 = vpop.permute.xlu0 %24  }
  0x81   :  { %27 = vst.msk [vmem:[#allocation0] sm:$0x3] %vm26_vm2, %v25_v8  }
  0x82   :  { %34 = vst.msk [vmem:[#allocation0] sm:$0x3] %vm33_vm3, %v32_v7  }
  0x89   :  { %v38_v9 = vld [vmem:[#allocation0] sm:$0x3] }
  0x8a   :  { %40 = vst [vmem:[%s68_s1] sm:$0x3] %v38_v9 }

// kernel: squeeze.0
= control target key start
LH: loop header
LB: loop body
LE: loop exit
PB: predicated region body
PF: predicated region fallthrough
CT: control target
= control target key end

     0   :  { %s938_s10 = smov 125   ;;  %s939_s11 = smov 126   ;;  %vm11_vm0 = vcmask 7168   ;;  %s2041_s0 = inlined_call_operand.vmem [shape: s32[2,4,32], index: 0, kind: input, shape index: {}]   ;;  %s2042_s1 = inlined_call_operand.vmem [shape: s32[2,128,1], index: 1, kind: output, shape index: {}]  }
   0x1   :  { %v650_v0 = vld [vmem:[%s2041_s0 + $0x4] sm:$0xf]  ;;  %v8_v1 = vld [vmem:[%s2041_s0] sm:$0xf]  ;;  %s937_s0 = smov 127   ;;  %s940_s12 = smov 124  }
   0x2   :  { %7 = vst [vmem:[#allocation0 + $0x8] sm:$0xf] %v650_v0  ;;  %9 = vst [vmem:[#allocation0] sm:$0xf] %v8_v1  ;;  %s941_s13 = smov 123   ;;  %s942_s14 = smov 122  }
   0x3   :  { %s943_s15 = smov 121   ;;  %s944_s16 = smov 120  }
   0x4   :  { %s945_s17 = smov 119   ;;  %s946_s18 = smov 118  }
   0x5   :  { %s947_s19 = smov 117   ;;  %s948_s20 = smov 116  }
   0x6   :  { %s949_s21 = smov 115   ;;  %s950_s22 = smov 114  }
   0x7   :  { %s951_s23 = smov 113   ;;  %s952_s24 = smov 112  }
   0x8   :  { %s953_s25 = smov 111   ;;  %s954_s26 = smov 110  }
   0x9   :  { %v984_v2 = vld.sshfl [vmem:[#allocation0] sm:$0xff pattern:$0xba983210]   ;;  %s955_s27 = smov 109   ;;  %s956_s28 = smov 108  }
   0xa   :  { %31 = vrot.lane.b32.xlu0 %v984_v2, %s937_s0  ;;  %71 = vrot.lane.b32.xlu1 %v984_v2, %s938_s10  ;;  %s957_s29 = smov 107   ;;  %s958_s30 = smov 106   ;;  %v10_v3 = vld [vmem:[#allocation0] sm:$0xf]   ;;  %v20_v4 = vld [vmem:[#allocation0 + $0x8] sm:$0xf]  }
   0xb   :  { %s959_s2 = smov 105   ;;  %s960_s3 = smov 104   ;;  %12 = vst.msk [vmem:[%s2042_s1] sm:$0x1] %vm11_vm0, %v10_v3   ;;  %651 = vst.msk [vmem:[%s2042_s1 + $0x1f] sm:$0x2] %vm11_vm0, %v10_v3  }
   0xc   :  { %652 = vst.msk [vmem:[%s2042_s1 + $0x3e] sm:$0x4] %vm11_vm0, %v10_v3   ;;  %653 = vst.msk [vmem:[%s2042_s1 + $0x5d] sm:$0x8] %vm11_vm0, %v10_v3  }
   0xd   :  { %654 = vst.msk [vmem:[%s2042_s1 + $0x80] sm:$0x1] %vm11_vm0, %v20_v4   ;;  %655 = vst.msk [vmem:[%s2042_s1 + $0x9f] sm:$0x2] %vm11_vm0, %v20_v4  }
   0xe   :  { %51 = vrot.lane.b32.xlu0 %v984_v2, %s939_s11  ;;  %91 = vrot.lane.b32.xlu1 %v984_v2, %s940_s12  ;;  %656 = vst.msk [vmem:[%s2042_s1 + $0xbe] sm:$0x4] %vm11_vm0, %v20_v4   ;;  %657 = vst.msk [vmem:[%s2042_s1 + $0xdd] sm:$0x8] %vm11_vm0, %v20_v4  }
  0x12   :  { %111 = vrot.lane.b32.xlu0 %v984_v2, %s941_s13  ;;  %131 = vrot.lane.b32.xlu1 %v984_v2, %s942_s14 }
  0x16   :  { %151 = vrot.lane.b32.xlu0 %v984_v2, %s943_s15  ;;  %171 = vrot.lane.b32.xlu1 %v984_v2, %s944_s16 }
  0x1a   :  { %191 = vrot.lane.b32.xlu0 %v984_v2, %s945_s17  ;;  %211 = vrot.lane.b32.xlu1 %v984_v2, %s946_s18 }
  0x1e   :  { %231 = vrot.lane.b32.xlu0 %v984_v2, %s947_s19  ;;  %251 = vrot.lane.b32.xlu1 %v984_v2, %s948_s20  ;;  %s961_s19 = smov 103   ;;  %s962_s20 = smov 102  }
  0x22   :  { %271 = vrot.lane.b32.xlu0 %v984_v2, %s949_s21  ;;  %291 = vrot.lane.b32.xlu1 %v984_v2, %s950_s22  ;;  %s963_s21 = smov 101   ;;  %s964_s22 = smov 100  }
  0x26   :  { %311 = vrot.lane.b32.xlu0 %v984_v2, %s951_s23  ;;  %331 = vrot.lane.b32.xlu1 %v984_v2, %s952_s24  ;;  %s965_s23 = smov 99   ;;  %s966_s24 = smov 98  }
  0x2a   :  { %351 = vrot.lane.b32.xlu0 %v984_v2, %s953_s25  ;;  %371 = vrot.lane.b32.xlu1 %v984_v2, %s954_s26  ;;  %s967_s25 = smov 97  }
  0x2e   :  { %391 = vrot.lane.b32.xlu0 %v984_v2, %s955_s27  ;;  %411 = vrot.lane.b32.xlu1 %v984_v2, %s956_s28 }
  0x32   :  { %431 = vrot.lane.b32.xlu0 %v984_v2, %s957_s29  ;;  %451 = vrot.lane.b32.xlu1 %v984_v2, %s958_s30 }
  0x36   :  { %471 = vrot.lane.b32.xlu0 %v984_v2, %s959_s2  ;;  %491 = vrot.lane.b32.xlu1 %v984_v2, %s960_s3 }
  0x3a   :  { %511 = vrot.lane.b32.xlu0 %v984_v2, %s961_s19  ;;  %531 = vrot.lane.b32.xlu1 %v984_v2, %s962_s20 }
  0x3e   :  { %551 = vrot.lane.b32.xlu0 %v984_v2, %s963_s21  ;;  %571 = vrot.lane.b32.xlu1 %v984_v2, %s964_s22 }
  0x42   :  { %591 = vrot.lane.b32.xlu0 %v984_v2, %s965_s23  ;;  %611 = vrot.lane.b32.xlu1 %v984_v2, %s966_s24 }
  0x46   :  { %631 = vrot.lane.b32.xlu0 %v984_v2, %s967_s25 }
  0x7c   :  { %v32_v5 = vpop.permute.xlu0 %31   ;;  %v72_v6 = vpop.permute.xlu1 %71  }
  0x7d   :  { %658 = vst.msk [vmem:[%s2042_s1 + $0x1] sm:$0x1] %vm11_vm0, %v32_v5   ;;  %659 = vst.msk [vmem:[%s2042_s1 + $0x20] sm:$0x2] %vm11_vm0, %v32_v5  }
  0x7e   :  { %660 = vst.msk [vmem:[%s2042_s1 + $0x3f] sm:$0x4] %vm11_vm0, %v32_v5   ;;  %661 = vst.msk [vmem:[%s2042_s1 + $0x5e] sm:$0x8] %vm11_vm0, %v32_v5  }
  0x7f   :  { %662 = vst.msk [vmem:[%s2042_s1 + $0x7d] sm:$0x10] %vm11_vm0, %v32_v5   ;;  %663 = vst.msk [vmem:[%s2042_s1 + $0x9c] sm:$0x20] %vm11_vm0, %v32_v5  }
  0x80   :  { %664 = vst.msk [vmem:[%s2042_s1 + $0xbb] sm:$0x40] %vm11_vm0, %v32_v5   ;;  %665 = vst.msk [vmem:[%s2042_s1 + $0xda] sm:$0x80] %vm11_vm0, %v32_v5   ;;  %v52_v7 = vpop.permute.xlu0 %51   ;;  %v92_v8 = vpop.permute.xlu1 %91  }
  0x81   :  { %674 = vst.msk [vmem:[%s2042_s1 + $0x3] sm:$0x1] %vm11_vm0, %v72_v6   ;;  %675 = vst.msk [vmem:[%s2042_s1 + $0x22] sm:$0x2] %vm11_vm0, %v72_v6  }
  0x82   :  { %676 = vst.msk [vmem:[%s2042_s1 + $0x41] sm:$0x4] %vm11_vm0, %v72_v6   ;;  %677 = vst.msk [vmem:[%s2042_s1 + $0x60] sm:$0x8] %vm11_vm0, %v72_v6  }
  0x83   :  { %678 = vst.msk [vmem:[%s2042_s1 + $0x7f] sm:$0x10] %vm11_vm0, %v72_v6   ;;  %679 = vst.msk [vmem:[%s2042_s1 + $0x9e] sm:$0x20] %vm11_vm0, %v72_v6  }
  0x84   :  { %680 = vst.msk [vmem:[%s2042_s1 + $0xbd] sm:$0x40] %vm11_vm0, %v72_v6   ;;  %681 = vst.msk [vmem:[%s2042_s1 + $0xdc] sm:$0x80] %vm11_vm0, %v72_v6   ;;  %v112_v9 = vpop.permute.xlu0 %111   ;;  %v132_v10 = vpop.permute.xlu1 %131  }
  0x85   :  { %666 = vst.msk [vmem:[%s2042_s1 + $0x2] sm:$0x1] %vm11_vm0, %v52_v7   ;;  %667 = vst.msk [vmem:[%s2042_s1 + $0x21] sm:$0x2] %vm11_vm0, %v52_v7  }
  0x86   :  { %668 = vst.msk [vmem:[%s2042_s1 + $0x40] sm:$0x4] %vm11_vm0, %v52_v7   ;;  %669 = vst.msk [vmem:[%s2042_s1 + $0x5f] sm:$0x8] %vm11_vm0, %v52_v7  }
  0x87   :  { %670 = vst.msk [vmem:[%s2042_s1 + $0x7e] sm:$0x10] %vm11_vm0, %v52_v7   ;;  %671 = vst.msk [vmem:[%s2042_s1 + $0x9d] sm:$0x20] %vm11_vm0, %v52_v7  }
  0x88   :  { %672 = vst.msk [vmem:[%s2042_s1 + $0xbc] sm:$0x40] %vm11_vm0, %v52_v7   ;;  %673 = vst.msk [vmem:[%s2042_s1 + $0xdb] sm:$0x80] %vm11_vm0, %v52_v7   ;;  %v152_v11 = vpop.permute.xlu0 %151   ;;  %v172_v12 = vpop.permute.xlu1 %171  }
  0x89   :  { %682 = vst.msk [vmem:[%s2042_s1 + $0x4] sm:$0x1] %vm11_vm0, %v92_v8   ;;  %683 = vst.msk [vmem:[%s2042_s1 + $0x23] sm:$0x2] %vm11_vm0, %v92_v8  }
  0x8a   :  { %684 = vst.msk [vmem:[%s2042_s1 + $0x42] sm:$0x4] %vm11_vm0, %v92_v8   ;;  %685 = vst.msk [vmem:[%s2042_s1 + $0x61] sm:$0x8] %vm11_vm0, %v92_v8  }
  0x8b   :  { %686 = vst.msk [vmem:[%s2042_s1 + $0x80] sm:$0x10] %vm11_vm0, %v92_v8   ;;  %687 = vst.msk [vmem:[%s2042_s1 + $0x9f] sm:$0x20] %vm11_vm0, %v92_v8  }
  0x8c   :  { %688 = vst.msk [vmem:[%s2042_s1 + $0xbe] sm:$0x40] %vm11_vm0, %v92_v8   ;;  %689 = vst.msk [vmem:[%s2042_s1 + $0xdd] sm:$0x80] %vm11_vm0, %v92_v8   ;;  %v192_v13 = vpop.permute.xlu0 %191   ;;  %v212_v14 = vpop.permute.xlu1 %211  }
  0x8d   :  { %690 = vst.msk [vmem:[%s2042_s1 + $0x5] sm:$0x1] %vm11_vm0, %v112_v9   ;;  %691 = vst.msk [vmem:[%s2042_s1 + $0x24] sm:$0x2] %vm11_vm0, %v112_v9  }
  0x8e   :  { %692 = vst.msk [vmem:[%s2042_s1 + $0x43] sm:$0x4] %vm11_vm0, %v112_v9   ;;  %693 = vst.msk [vmem:[%s2042_s1 + $0x62] sm:$0x8] %vm11_vm0, %v112_v9  }
  0x8f   :  { %694 = vst.msk [vmem:[%s2042_s1 + $0x81] sm:$0x10] %vm11_vm0, %v112_v9   ;;  %695 = vst.msk [vmem:[%s2042_s1 + $0xa0] sm:$0x20] %vm11_vm0, %v112_v9  }
  0x90   :  { %696 = vst.msk [vmem:[%s2042_s1 + $0xbf] sm:$0x40] %vm11_vm0, %v112_v9   ;;  %697 = vst.msk [vmem:[%s2042_s1 + $0xde] sm:$0x80] %vm11_vm0, %v112_v9   ;;  %v232_v15 = vpop.permute.xlu0 %231   ;;  %v252_v16 = vpop.permute.xlu1 %251  }
  0x91   :  { %698 = vst.msk [vmem:[%s2042_s1 + $0x6] sm:$0x1] %vm11_vm0, %v132_v10   ;;  %699 = vst.msk [vmem:[%s2042_s1 + $0x25] sm:$0x2] %vm11_vm0, %v132_v10  }
  0x92   :  { %700 = vst.msk [vmem:[%s2042_s1 + $0x44] sm:$0x4] %vm11_vm0, %v132_v10   ;;  %701 = vst.msk [vmem:[%s2042_s1 + $0x63] sm:$0x8] %vm11_vm0, %v132_v10  }
  0x93   :  { %702 = vst.msk [vmem:[%s2042_s1 + $0x82] sm:$0x10] %vm11_vm0, %v132_v10   ;;  %703 = vst.msk [vmem:[%s2042_s1 + $0xa1] sm:$0x20] %vm11_vm0, %v132_v10  }
  0x94   :  { %704 = vst.msk [vmem:[%s2042_s1 + $0xc0] sm:$0x40] %vm11_vm0, %v132_v10   ;;  %705 = vst.msk [vmem:[%s2042_s1 + $0xdf] sm:$0x80] %vm11_vm0, %v132_v10   ;;  %v272_v17 = vpop.permute.xlu0 %271   ;;  %v292_v18 = vpop.permute.xlu1 %291  }
  0x95   :  { %706 = vst.msk [vmem:[%s2042_s1 + $0x7] sm:$0x1] %vm11_vm0, %v152_v11   ;;  %707 = vst.msk [vmem:[%s2042_s1 + $0x26] sm:$0x2] %vm11_vm0, %v152_v11  }
  0x96   :  { %708 = vst.msk [vmem:[%s2042_s1 + $0x45] sm:$0x4] %vm11_vm0, %v152_v11   ;;  %709 = vst.msk [vmem:[%s2042_s1 + $0x64] sm:$0x8] %vm11_vm0, %v152_v11  }
  0x97   :  { %710 = vst.msk [vmem:[%s2042_s1 + $0x83] sm:$0x10] %vm11_vm0, %v152_v11   ;;  %711 = vst.msk [vmem:[%s2042_s1 + $0xa2] sm:$0x20] %vm11_vm0, %v152_v11  }
  0x98   :  { %712 = vst.msk [vmem:[%s2042_s1 + $0xc1] sm:$0x40] %vm11_vm0, %v152_v11   ;;  %713 = vst.msk [vmem:[%s2042_s1 + $0xe0] sm:$0x80] %vm11_vm0, %v152_v11   ;;  %v312_v19 = vpop.permute.xlu0 %311   ;;  %v332_v20 = vpop.permute.xlu1 %331  }
  0x99   :  { %714 = vst.msk [vmem:[%s2042_s1 + $0x8] sm:$0x1] %vm11_vm0, %v172_v12   ;;  %715 = vst.msk [vmem:[%s2042_s1 + $0x27] sm:$0x2] %vm11_vm0, %v172_v12  }
  0x9a   :  { %716 = vst.msk [vmem:[%s2042_s1 + $0x46] sm:$0x4] %vm11_vm0, %v172_v12   ;;  %717 = vst.msk [vmem:[%s2042_s1 + $0x65] sm:$0x8] %vm11_vm0, %v172_v12  }
  0x9b   :  { %718 = vst.msk [vmem:[%s2042_s1 + $0x84] sm:$0x10] %vm11_vm0, %v172_v12   ;;  %719 = vst.msk [vmem:[%s2042_s1 + $0xa3] sm:$0x20] %vm11_vm0, %v172_v12  }
  0x9c   :  { %720 = vst.msk [vmem:[%s2042_s1 + $0xc2] sm:$0x40] %vm11_vm0, %v172_v12   ;;  %721 = vst.msk [vmem:[%s2042_s1 + $0xe1] sm:$0x80] %vm11_vm0, %v172_v12   ;;  %v352_v21 = vpop.permute.xlu0 %351   ;;  %v372_v22 = vpop.permute.xlu1 %371  }
  0x9d   :  { %722 = vst.msk [vmem:[%s2042_s1 + $0x9] sm:$0x1] %vm11_vm0, %v192_v13   ;;  %723 = vst.msk [vmem:[%s2042_s1 + $0x28] sm:$0x2] %vm11_vm0, %v192_v13  }
  0x9e   :  { %724 = vst.msk [vmem:[%s2042_s1 + $0x47] sm:$0x4] %vm11_vm0, %v192_v13   ;;  %725 = vst.msk [vmem:[%s2042_s1 + $0x66] sm:$0x8] %vm11_vm0, %v192_v13  }
  0x9f   :  { %726 = vst.msk [vmem:[%s2042_s1 + $0x85] sm:$0x10] %vm11_vm0, %v192_v13   ;;  %727 = vst.msk [vmem:[%s2042_s1 + $0xa4] sm:$0x20] %vm11_vm0, %v192_v13  }
  0xa0   :  { %728 = vst.msk [vmem:[%s2042_s1 + $0xc3] sm:$0x40] %vm11_vm0, %v192_v13   ;;  %729 = vst.msk [vmem:[%s2042_s1 + $0xe2] sm:$0x80] %vm11_vm0, %v192_v13   ;;  %v392_v23 = vpop.permute.xlu0 %391   ;;  %v412_v24 = vpop.permute.xlu1 %411  }
  0xa1   :  { %730 = vst.msk [vmem:[%s2042_s1 + $0xa] sm:$0x1] %vm11_vm0, %v212_v14   ;;  %731 = vst.msk [vmem:[%s2042_s1 + $0x29] sm:$0x2] %vm11_vm0, %v212_v14  }
  0xa2   :  { %732 = vst.msk [vmem:[%s2042_s1 + $0x48] sm:$0x4] %vm11_vm0, %v212_v14   ;;  %733 = vst.msk [vmem:[%s2042_s1 + $0x67] sm:$0x8] %vm11_vm0, %v212_v14  }
  0xa3   :  { %734 = vst.msk [vmem:[%s2042_s1 + $0x86] sm:$0x10] %vm11_vm0, %v212_v14   ;;  %735 = vst.msk [vmem:[%s2042_s1 + $0xa5] sm:$0x20] %vm11_vm0, %v212_v14  }
  0xa4   :  { %736 = vst.msk [vmem:[%s2042_s1 + $0xc4] sm:$0x40] %vm11_vm0, %v212_v14   ;;  %737 = vst.msk [vmem:[%s2042_s1 + $0xe3] sm:$0x80] %vm11_vm0, %v212_v14   ;;  %v432_v25 = vpop.permute.xlu0 %431   ;;  %v452_v26 = vpop.permute.xlu1 %451  }
  0xa5   :  { %738 = vst.msk [vmem:[%s2042_s1 + $0xb] sm:$0x1] %vm11_vm0, %v232_v15   ;;  %739 = vst.msk [vmem:[%s2042_s1 + $0x2a] sm:$0x2] %vm11_vm0, %v232_v15  }
  0xa6   :  { %740 = vst.msk [vmem:[%s2042_s1 + $0x49] sm:$0x4] %vm11_vm0, %v232_v15   ;;  %741 = vst.msk [vmem:[%s2042_s1 + $0x68] sm:$0x8] %vm11_vm0, %v232_v15  }
  0xa7   :  { %742 = vst.msk [vmem:[%s2042_s1 + $0x87] sm:$0x10] %vm11_vm0, %v232_v15   ;;  %743 = vst.msk [vmem:[%s2042_s1 + $0xa6] sm:$0x20] %vm11_vm0, %v232_v15  }
  0xa8   :  { %744 = vst.msk [vmem:[%s2042_s1 + $0xc5] sm:$0x40] %vm11_vm0, %v232_v15   ;;  %745 = vst.msk [vmem:[%s2042_s1 + $0xe4] sm:$0x80] %vm11_vm0, %v232_v15   ;;  %v472_v27 = vpop.permute.xlu0 %471   ;;  %v492_v28 = vpop.permute.xlu1 %491  }
  0xa9   :  { %746 = vst.msk [vmem:[%s2042_s1 + $0xc] sm:$0x1] %vm11_vm0, %v252_v16   ;;  %747 = vst.msk [vmem:[%s2042_s1 + $0x2b] sm:$0x2] %vm11_vm0, %v252_v16  }
  0xaa   :  { %748 = vst.msk [vmem:[%s2042_s1 + $0x4a] sm:$0x4] %vm11_vm0, %v252_v16   ;;  %749 = vst.msk [vmem:[%s2042_s1 + $0x69] sm:$0x8] %vm11_vm0, %v252_v16  }
  0xab   :  { %750 = vst.msk [vmem:[%s2042_s1 + $0x88] sm:$0x10] %vm11_vm0, %v252_v16   ;;  %751 = vst.msk [vmem:[%s2042_s1 + $0xa7] sm:$0x20] %vm11_vm0, %v252_v16  }
  0xac   :  { %752 = vst.msk [vmem:[%s2042_s1 + $0xc6] sm:$0x40] %vm11_vm0, %v252_v16   ;;  %753 = vst.msk [vmem:[%s2042_s1 + $0xe5] sm:$0x80] %vm11_vm0, %v252_v16   ;;  %v512_v29 = vpop.permute.xlu0 %511   ;;  %v532_v30 = vpop.permute.xlu1 %531  }
  0xad   :  { %754 = vst.msk [vmem:[%s2042_s1 + $0xd] sm:$0x1] %vm11_vm0, %v272_v17   ;;  %755 = vst.msk [vmem:[%s2042_s1 + $0x2c] sm:$0x2] %vm11_vm0, %v272_v17  }
  0xae   :  { %756 = vst.msk [vmem:[%s2042_s1 + $0x4b] sm:$0x4] %vm11_vm0, %v272_v17   ;;  %757 = vst.msk [vmem:[%s2042_s1 + $0x6a] sm:$0x8] %vm11_vm0, %v272_v17  }
  0xaf   :  { %758 = vst.msk [vmem:[%s2042_s1 + $0x89] sm:$0x10] %vm11_vm0, %v272_v17   ;;  %759 = vst.msk [vmem:[%s2042_s1 + $0xa8] sm:$0x20] %vm11_vm0, %v272_v17  }
  0xb0   :  { %760 = vst.msk [vmem:[%s2042_s1 + $0xc7] sm:$0x40] %vm11_vm0, %v272_v17   ;;  %761 = vst.msk [vmem:[%s2042_s1 + $0xe6] sm:$0x80] %vm11_vm0, %v272_v17   ;;  %v552_v31 = vpop.permute.xlu0 %551   ;;  %v572_v32 = vpop.permute.xlu1 %571  }
  0xb1   :  { %762 = vst.msk [vmem:[%s2042_s1 + $0xe] sm:$0x1] %vm11_vm0, %v292_v18   ;;  %763 = vst.msk [vmem:[%s2042_s1 + $0x2d] sm:$0x2] %vm11_vm0, %v292_v18  }
  0xb2   :  { %764 = vst.msk [vmem:[%s2042_s1 + $0x4c] sm:$0x4] %vm11_vm0, %v292_v18   ;;  %765 = vst.msk [vmem:[%s2042_s1 + $0x6b] sm:$0x8] %vm11_vm0, %v292_v18  }
  0xb3   :  { %766 = vst.msk [vmem:[%s2042_s1 + $0x8a] sm:$0x10] %vm11_vm0, %v292_v18   ;;  %767 = vst.msk [vmem:[%s2042_s1 + $0xa9] sm:$0x20] %vm11_vm0, %v292_v18  }
  0xb4   :  { %768 = vst.msk [vmem:[%s2042_s1 + $0xc8] sm:$0x40] %vm11_vm0, %v292_v18   ;;  %769 = vst.msk [vmem:[%s2042_s1 + $0xe7] sm:$0x80] %vm11_vm0, %v292_v18   ;;  %v592_v33 = vpop.permute.xlu0 %591   ;;  %v612_v34 = vpop.permute.xlu1 %611  }
  0xb5   :  { %770 = vst.msk [vmem:[%s2042_s1 + $0xf] sm:$0x1] %vm11_vm0, %v312_v19   ;;  %771 = vst.msk [vmem:[%s2042_s1 + $0x2e] sm:$0x2] %vm11_vm0, %v312_v19  }
  0xb6   :  { %772 = vst.msk [vmem:[%s2042_s1 + $0x4d] sm:$0x4] %vm11_vm0, %v312_v19   ;;  %773 = vst.msk [vmem:[%s2042_s1 + $0x6c] sm:$0x8] %vm11_vm0, %v312_v19  }
  0xb7   :  { %774 = vst.msk [vmem:[%s2042_s1 + $0x8b] sm:$0x10] %vm11_vm0, %v312_v19   ;;  %775 = vst.msk [vmem:[%s2042_s1 + $0xaa] sm:$0x20] %vm11_vm0, %v312_v19  }
  0xb8   :  { %776 = vst.msk [vmem:[%s2042_s1 + $0xc9] sm:$0x40] %vm11_vm0, %v312_v19   ;;  %777 = vst.msk [vmem:[%s2042_s1 + $0xe8] sm:$0x80] %vm11_vm0, %v312_v19   ;;  %v632_v35 = vpop.permute.xlu0 %631  }
  0xb9   :  { %778 = vst.msk [vmem:[%s2042_s1 + $0x10] sm:$0x1] %vm11_vm0, %v332_v20   ;;  %779 = vst.msk [vmem:[%s2042_s1 + $0x2f] sm:$0x2] %vm11_vm0, %v332_v20  }
  0xba   :  { %780 = vst.msk [vmem:[%s2042_s1 + $0x4e] sm:$0x4] %vm11_vm0, %v332_v20   ;;  %781 = vst.msk [vmem:[%s2042_s1 + $0x6d] sm:$0x8] %vm11_vm0, %v332_v20  }
  0xbb   :  { %782 = vst.msk [vmem:[%s2042_s1 + $0x8c] sm:$0x10] %vm11_vm0, %v332_v20   ;;  %783 = vst.msk [vmem:[%s2042_s1 + $0xab] sm:$0x20] %vm11_vm0, %v332_v20  }
  0xbc   :  { %784 = vst.msk [vmem:[%s2042_s1 + $0xca] sm:$0x40] %vm11_vm0, %v332_v20   ;;  %785 = vst.msk [vmem:[%s2042_s1 + $0xe9] sm:$0x80] %vm11_vm0, %v332_v20  }
  0xbd   :  { %786 = vst.msk [vmem:[%s2042_s1 + $0x11] sm:$0x1] %vm11_vm0, %v352_v21   ;;  %787 = vst.msk [vmem:[%s2042_s1 + $0x30] sm:$0x2] %vm11_vm0, %v352_v21  }
  0xbe   :  { %788 = vst.msk [vmem:[%s2042_s1 + $0x4f] sm:$0x4] %vm11_vm0, %v352_v21   ;;  %789 = vst.msk [vmem:[%s2042_s1 + $0x6e] sm:$0x8] %vm11_vm0, %v352_v21  }
  0xbf   :  { %790 = vst.msk [vmem:[%s2042_s1 + $0x8d] sm:$0x10] %vm11_vm0, %v352_v21   ;;  %791 = vst.msk [vmem:[%s2042_s1 + $0xac] sm:$0x20] %vm11_vm0, %v352_v21  }
  0xc0   :  { %792 = vst.msk [vmem:[%s2042_s1 + $0xcb] sm:$0x40] %vm11_vm0, %v352_v21   ;;  %793 = vst.msk [vmem:[%s2042_s1 + $0xea] sm:$0x80] %vm11_vm0, %v352_v21  }
  0xc1   :  { %794 = vst.msk [vmem:[%s2042_s1 + $0x12] sm:$0x1] %vm11_vm0, %v372_v22   ;;  %795 = vst.msk [vmem:[%s2042_s1 + $0x31] sm:$0x2] %vm11_vm0, %v372_v22  }
  0xc2   :  { %796 = vst.msk [vmem:[%s2042_s1 + $0x50] sm:$0x4] %vm11_vm0, %v372_v22   ;;  %797 = vst.msk [vmem:[%s2042_s1 + $0x6f] sm:$0x8] %vm11_vm0, %v372_v22  }
  0xc3   :  { %798 = vst.msk [vmem:[%s2042_s1 + $0x8e] sm:$0x10] %vm11_vm0, %v372_v22   ;;  %799 = vst.msk [vmem:[%s2042_s1 + $0xad] sm:$0x20] %vm11_vm0, %v372_v22  }
  0xc4   :  { %800 = vst.msk [vmem:[%s2042_s1 + $0xcc] sm:$0x40] %vm11_vm0, %v372_v22   ;;  %801 = vst.msk [vmem:[%s2042_s1 + $0xeb] sm:$0x80] %vm11_vm0, %v372_v22  }
  0xc5   :  { %802 = vst.msk [vmem:[%s2042_s1 + $0x13] sm:$0x1] %vm11_vm0, %v392_v23   ;;  %803 = vst.msk [vmem:[%s2042_s1 + $0x32] sm:$0x2] %vm11_vm0, %v392_v23  }
  0xc6   :  { %804 = vst.msk [vmem:[%s2042_s1 + $0x51] sm:$0x4] %vm11_vm0, %v392_v23   ;;  %805 = vst.msk [vmem:[%s2042_s1 + $0x70] sm:$0x8] %vm11_vm0, %v392_v23  }
  0xc7   :  { %806 = vst.msk [vmem:[%s2042_s1 + $0x8f] sm:$0x10] %vm11_vm0, %v392_v23   ;;  %807 = vst.msk [vmem:[%s2042_s1 + $0xae] sm:$0x20] %vm11_vm0, %v392_v23  }
  0xc8   :  { %808 = vst.msk [vmem:[%s2042_s1 + $0xcd] sm:$0x40] %vm11_vm0, %v392_v23   ;;  %809 = vst.msk [vmem:[%s2042_s1 + $0xec] sm:$0x80] %vm11_vm0, %v392_v23  }
  0xc9   :  { %810 = vst.msk [vmem:[%s2042_s1 + $0x14] sm:$0x1] %vm11_vm0, %v412_v24   ;;  %811 = vst.msk [vmem:[%s2042_s1 + $0x33] sm:$0x2] %vm11_vm0, %v412_v24  }
  0xca   :  { %812 = vst.msk [vmem:[%s2042_s1 + $0x52] sm:$0x4] %vm11_vm0, %v412_v24   ;;  %813 = vst.msk [vmem:[%s2042_s1 + $0x71] sm:$0x8] %vm11_vm0, %v412_v24  }
  0xcb   :  { %814 = vst.msk [vmem:[%s2042_s1 + $0x90] sm:$0x10] %vm11_vm0, %v412_v24   ;;  %815 = vst.msk [vmem:[%s2042_s1 + $0xaf] sm:$0x20] %vm11_vm0, %v412_v24  }
  0xcc   :  { %816 = vst.msk [vmem:[%s2042_s1 + $0xce] sm:$0x40] %vm11_vm0, %v412_v24   ;;  %817 = vst.msk [vmem:[%s2042_s1 + $0xed] sm:$0x80] %vm11_vm0, %v412_v24  }
  0xcd   :  { %818 = vst.msk [vmem:[%s2042_s1 + $0x15] sm:$0x1] %vm11_vm0, %v432_v25   ;;  %819 = vst.msk [vmem:[%s2042_s1 + $0x34] sm:$0x2] %vm11_vm0, %v432_v25  }
  0xce   :  { %820 = vst.msk [vmem:[%s2042_s1 + $0x53] sm:$0x4] %vm11_vm0, %v432_v25   ;;  %821 = vst.msk [vmem:[%s2042_s1 + $0x72] sm:$0x8] %vm11_vm0, %v432_v25  }
  0xcf   :  { %822 = vst.msk [vmem:[%s2042_s1 + $0x91] sm:$0x10] %vm11_vm0, %v432_v25   ;;  %823 = vst.msk [vmem:[%s2042_s1 + $0xb0] sm:$0x20] %vm11_vm0, %v432_v25  }
  0xd0   :  { %824 = vst.msk [vmem:[%s2042_s1 + $0xcf] sm:$0x40] %vm11_vm0, %v432_v25   ;;  %825 = vst.msk [vmem:[%s2042_s1 + $0xee] sm:$0x80] %vm11_vm0, %v432_v25  }
  0xd1   :  { %826 = vst.msk [vmem:[%s2042_s1 + $0x16] sm:$0x1] %vm11_vm0, %v452_v26   ;;  %827 = vst.msk [vmem:[%s2042_s1 + $0x35] sm:$0x2] %vm11_vm0, %v452_v26  }
  0xd2   :  { %828 = vst.msk [vmem:[%s2042_s1 + $0x54] sm:$0x4] %vm11_vm0, %v452_v26   ;;  %829 = vst.msk [vmem:[%s2042_s1 + $0x73] sm:$0x8] %vm11_vm0, %v452_v26  }
  0xd3   :  { %830 = vst.msk [vmem:[%s2042_s1 + $0x92] sm:$0x10] %vm11_vm0, %v452_v26   ;;  %831 = vst.msk [vmem:[%s2042_s1 + $0xb1] sm:$0x20] %vm11_vm0, %v452_v26  }
  0xd4   :  { %832 = vst.msk [vmem:[%s2042_s1 + $0xd0] sm:$0x40] %vm11_vm0, %v452_v26   ;;  %833 = vst.msk [vmem:[%s2042_s1 + $0xef] sm:$0x80] %vm11_vm0, %v452_v26  }
  0xd5   :  { %834 = vst.msk [vmem:[%s2042_s1 + $0x17] sm:$0x1] %vm11_vm0, %v472_v27   ;;  %835 = vst.msk [vmem:[%s2042_s1 + $0x36] sm:$0x2] %vm11_vm0, %v472_v27  }
  0xd6   :  { %836 = vst.msk [vmem:[%s2042_s1 + $0x55] sm:$0x4] %vm11_vm0, %v472_v27   ;;  %837 = vst.msk [vmem:[%s2042_s1 + $0x74] sm:$0x8] %vm11_vm0, %v472_v27  }
  0xd7   :  { %838 = vst.msk [vmem:[%s2042_s1 + $0x93] sm:$0x10] %vm11_vm0, %v472_v27   ;;  %839 = vst.msk [vmem:[%s2042_s1 + $0xb2] sm:$0x20] %vm11_vm0, %v472_v27  }
  0xd8   :  { %840 = vst.msk [vmem:[%s2042_s1 + $0xd1] sm:$0x40] %vm11_vm0, %v472_v27   ;;  %841 = vst.msk [vmem:[%s2042_s1 + $0xf0] sm:$0x80] %vm11_vm0, %v472_v27  }
  0xd9   :  { %842 = vst.msk [vmem:[%s2042_s1 + $0x18] sm:$0x1] %vm11_vm0, %v492_v28   ;;  %843 = vst.msk [vmem:[%s2042_s1 + $0x37] sm:$0x2] %vm11_vm0, %v492_v28  }
  0xda   :  { %844 = vst.msk [vmem:[%s2042_s1 + $0x56] sm:$0x4] %vm11_vm0, %v492_v28   ;;  %845 = vst.msk [vmem:[%s2042_s1 + $0x75] sm:$0x8] %vm11_vm0, %v492_v28  }
  0xdb   :  { %846 = vst.msk [vmem:[%s2042_s1 + $0x94] sm:$0x10] %vm11_vm0, %v492_v28   ;;  %847 = vst.msk [vmem:[%s2042_s1 + $0xb3] sm:$0x20] %vm11_vm0, %v492_v28  }
  0xdc   :  { %848 = vst.msk [vmem:[%s2042_s1 + $0xd2] sm:$0x40] %vm11_vm0, %v492_v28   ;;  %849 = vst.msk [vmem:[%s2042_s1 + $0xf1] sm:$0x80] %vm11_vm0, %v492_v28  }
  0xdd   :  { %850 = vst.msk [vmem:[%s2042_s1 + $0x19] sm:$0x1] %vm11_vm0, %v512_v29   ;;  %851 = vst.msk [vmem:[%s2042_s1 + $0x38] sm:$0x2] %vm11_vm0, %v512_v29  }
  0xde   :  { %852 = vst.msk [vmem:[%s2042_s1 + $0x57] sm:$0x4] %vm11_vm0, %v512_v29   ;;  %853 = vst.msk [vmem:[%s2042_s1 + $0x76] sm:$0x8] %vm11_vm0, %v512_v29  }
  0xdf   :  { %854 = vst.msk [vmem:[%s2042_s1 + $0x95] sm:$0x10] %vm11_vm0, %v512_v29   ;;  %855 = vst.msk [vmem:[%s2042_s1 + $0xb4] sm:$0x20] %vm11_vm0, %v512_v29  }
  0xe0   :  { %856 = vst.msk [vmem:[%s2042_s1 + $0xd3] sm:$0x40] %vm11_vm0, %v512_v29   ;;  %857 = vst.msk [vmem:[%s2042_s1 + $0xf2] sm:$0x80] %vm11_vm0, %v512_v29  }
  0xe1   :  { %858 = vst.msk [vmem:[%s2042_s1 + $0x1a] sm:$0x1] %vm11_vm0, %v532_v30   ;;  %859 = vst.msk [vmem:[%s2042_s1 + $0x39] sm:$0x2] %vm11_vm0, %v532_v30  }
  0xe2   :  { %860 = vst.msk [vmem:[%s2042_s1 + $0x58] sm:$0x4] %vm11_vm0, %v532_v30   ;;  %861 = vst.msk [vmem:[%s2042_s1 + $0x77] sm:$0x8] %vm11_vm0, %v532_v30  }
  0xe3   :  { %862 = vst.msk [vmem:[%s2042_s1 + $0x96] sm:$0x10] %vm11_vm0, %v532_v30   ;;  %863 = vst.msk [vmem:[%s2042_s1 + $0xb5] sm:$0x20] %vm11_vm0, %v532_v30  }
  0xe4   :  { %864 = vst.msk [vmem:[%s2042_s1 + $0xd4] sm:$0x40] %vm11_vm0, %v532_v30   ;;  %865 = vst.msk [vmem:[%s2042_s1 + $0xf3] sm:$0x80] %vm11_vm0, %v532_v30  }
  0xe5   :  { %866 = vst.msk [vmem:[%s2042_s1 + $0x1b] sm:$0x1] %vm11_vm0, %v552_v31   ;;  %867 = vst.msk [vmem:[%s2042_s1 + $0x3a] sm:$0x2] %vm11_vm0, %v552_v31  }
  0xe6   :  { %868 = vst.msk [vmem:[%s2042_s1 + $0x59] sm:$0x4] %vm11_vm0, %v552_v31   ;;  %869 = vst.msk [vmem:[%s2042_s1 + $0x78] sm:$0x8] %vm11_vm0, %v552_v31  }
  0xe7   :  { %870 = vst.msk [vmem:[%s2042_s1 + $0x97] sm:$0x10] %vm11_vm0, %v552_v31   ;;  %871 = vst.msk [vmem:[%s2042_s1 + $0xb6] sm:$0x20] %vm11_vm0, %v552_v31  }
  0xe8   :  { %872 = vst.msk [vmem:[%s2042_s1 + $0xd5] sm:$0x40] %vm11_vm0, %v552_v31   ;;  %873 = vst.msk [vmem:[%s2042_s1 + $0xf4] sm:$0x80] %vm11_vm0, %v552_v31  }
  0xe9   :  { %874 = vst.msk [vmem:[%s2042_s1 + $0x1c] sm:$0x1] %vm11_vm0, %v572_v32   ;;  %875 = vst.msk [vmem:[%s2042_s1 + $0x3b] sm:$0x2] %vm11_vm0, %v572_v32  }
  0xea   :  { %876 = vst.msk [vmem:[%s2042_s1 + $0x5a] sm:$0x4] %vm11_vm0, %v572_v32   ;;  %877 = vst.msk [vmem:[%s2042_s1 + $0x79] sm:$0x8] %vm11_vm0, %v572_v32  }
  0xeb   :  { %878 = vst.msk [vmem:[%s2042_s1 + $0x98] sm:$0x10] %vm11_vm0, %v572_v32   ;;  %879 = vst.msk [vmem:[%s2042_s1 + $0xb7] sm:$0x20] %vm11_vm0, %v572_v32  }
  0xec   :  { %880 = vst.msk [vmem:[%s2042_s1 + $0xd6] sm:$0x40] %vm11_vm0, %v572_v32   ;;  %881 = vst.msk [vmem:[%s2042_s1 + $0xf5] sm:$0x80] %vm11_vm0, %v572_v32  }
  0xed   :  { %882 = vst.msk [vmem:[%s2042_s1 + $0x1d] sm:$0x1] %vm11_vm0, %v592_v33   ;;  %883 = vst.msk [vmem:[%s2042_s1 + $0x3c] sm:$0x2] %vm11_vm0, %v592_v33  }
  0xee   :  { %884 = vst.msk [vmem:[%s2042_s1 + $0x5b] sm:$0x4] %vm11_vm0, %v592_v33   ;;  %885 = vst.msk [vmem:[%s2042_s1 + $0x7a] sm:$0x8] %vm11_vm0, %v592_v33  }
  0xef   :  { %886 = vst.msk [vmem:[%s2042_s1 + $0x99] sm:$0x10] %vm11_vm0, %v592_v33   ;;  %887 = vst.msk [vmem:[%s2042_s1 + $0xb8] sm:$0x20] %vm11_vm0, %v592_v33  }
  0xf0   :  { %888 = vst.msk [vmem:[%s2042_s1 + $0xd7] sm:$0x40] %vm11_vm0, %v592_v33   ;;  %889 = vst.msk [vmem:[%s2042_s1 + $0xf6] sm:$0x80] %vm11_vm0, %v592_v33  }
  0xf1   :  { %890 = vst.msk [vmem:[%s2042_s1 + $0x1e] sm:$0x1] %vm11_vm0, %v612_v34   ;;  %891 = vst.msk [vmem:[%s2042_s1 + $0x3d] sm:$0x2] %vm11_vm0, %v612_v34  }
  0xf2   :  { %892 = vst.msk [vmem:[%s2042_s1 + $0x5c] sm:$0x4] %vm11_vm0, %v612_v34   ;;  %893 = vst.msk [vmem:[%s2042_s1 + $0x7b] sm:$0x8] %vm11_vm0, %v612_v34  }
  0xf3   :  { %894 = vst.msk [vmem:[%s2042_s1 + $0x9a] sm:$0x10] %vm11_vm0, %v612_v34   ;;  %895 = vst.msk [vmem:[%s2042_s1 + $0xb9] sm:$0x20] %vm11_vm0, %v612_v34  }
  0xf4   :  { %896 = vst.msk [vmem:[%s2042_s1 + $0xd8] sm:$0x40] %vm11_vm0, %v612_v34   ;;  %897 = vst.msk [vmem:[%s2042_s1 + $0xf7] sm:$0x80] %vm11_vm0, %v612_v34  }
  0xf5   :  { %898 = vst.msk [vmem:[%s2042_s1 + $0x1f] sm:$0x1] %vm11_vm0, %v632_v35   ;;  %899 = vst.msk [vmem:[%s2042_s1 + $0x3e] sm:$0x2] %vm11_vm0, %v632_v35  }
  0xf6   :  { %900 = vst.msk [vmem:[%s2042_s1 + $0x5d] sm:$0x4] %vm11_vm0, %v632_v35   ;;  %901 = vst.msk [vmem:[%s2042_s1 + $0x7c] sm:$0x8] %vm11_vm0, %v632_v35  }
  0xf7   :  { %902 = vst.msk [vmem:[%s2042_s1 + $0x9b] sm:$0x10] %vm11_vm0, %v632_v35   ;;  %903 = vst.msk [vmem:[%s2042_s1 + $0xba] sm:$0x20] %vm11_vm0, %v632_v35  }
  0xf8   :  { %904 = vst.msk [vmem:[%s2042_s1 + $0xd9] sm:$0x40] %vm11_vm0, %v632_v35   ;;  %905 = vst.msk [vmem:[%s2042_s1 + $0xf8] sm:$0x80] %vm11_vm0, %v632_v35  }

// kernel: temgnn_forward.1
= control target key start
LH: loop header
LB: loop body
LE: loop exit
PB: predicated region body
PF: predicated region fallthrough
CT: control target
= control target key end

     0   :  { %s5182_s0 = inlined_call_operand.vmem [shape: f32[2,16,16], index: 0, kind: input, shape index: {}]   ;;  %s5183_s1 = inlined_call_operand.vmem [shape: s32[2,16,2], index: 1, kind: input, shape index: {}]   ;;  %s5184_s2 = inlined_call_operand.vmem [shape: f32[2,64,16], index: 2, kind: input, shape index: {}]   ;;  %s5185_s3 = inlined_call_operand.vmem [shape: s32[2,64,2], index: 3, kind: input, shape index: {}]   ;;  %s5186_s4 = inlined_call_operand.vmem [shape: s32[2,1,128], index: 4, kind: input, shape index: {}]   ;;  %s5187_s5 = inlined_call_operand.vmem [shape: s32[2,128,1], index: 5, kind: input, shape index: {}]   ;;  %s5188_s6 = inlined_call_operand.vmem [shape: f32[2,1,128], index: 6, kind: input, shape index: {}]   ;;  %s5189_s7 = inlined_call_operand.vmem [shape: f32[4,8,8], index: 7, kind: input, shape index: {}]   ;;  %s5190_s8 = inlined_call_operand.vmem [shape: f32[32,32], index: 8, kind: input, shape index: {}]   ;;  %s5191_s9 = inlined_call_operand.vmem [shape: f32[1,32], index: 9, kind: input, shape index: {}]   ;;  %s5192_s10 = inlined_call_operand.vmem [shape: f32[4,32,32], index: 10, kind: input, shape index: {}]   ;;  %s5193_s11 = inlined_call_operand.vmem [shape: f32[64,32], index: 11, kind: input, shape index: {}]   ;;  %s5194_s12 = inlined_call_operand.vmem [shape: f32[32,96], index: 12, kind: input, shape index: {}]   ;;  %s5195_s13 = inlined_call_operand.vmem [shape: f32[32,96], index: 13, kind: input, shape index: {}]   ;;  %s5196_s14 = inlined_call_operand.vmem [shape: f32[1,96], index: 14, kind: input, shape index: {}]   ;;  %s5197_s15 = inlined_call_operand.vmem [shape: f32[1,96], index: 15, kind: input, shape index: {}]   ;;  %s5198_s16 = inlined_call_operand.vmem [shape: f32[1,32], index: 16, kind: input, shape index: {}]   ;;  %s5199_s17 = inlined_call_operand.hbm [shape: f32[2,16,32], index: 17, kind: output, shape index: {}]  }
   0x1   :  { %5206 = sst [smem:[#allocation12_spill]] %s5182_s0 }
   0x2   :  { %5207 = sst [smem:[#allocation13_spill]] %s5183_s1 }
   0x3   :  { %22 = vsyncpa [#allocation4], 0 }
   0x4   :  { %24 = vsyncpa [#allocation4 + $0x1], 0  ;;  %s4391_s24 = smov 0   ;;  %s4393_s25 = smov 0  }
   0x5   :  { %s4395_s26 = smov 0   ;;  %s4397_s27 = smov 0  }
   0x6 LB: > { %5208 = sst [smem:[#allocation6_spill]] %s4276_s24  ;;  %s4412_s28 = sadd.s32 4294967295, %s4288_s27   ;;  %s4288_s27 = sphi %s4397_s27, %s5221_s27   ;;  %s4284_s26 = sphi %s4395_s26, %s5223_s26   ;;  %s4280_s25 = sphi %s4393_s25, %s5225_s25   ;;  %s4276_s24 = sphi %s4391_s24, %s5224_s24  }
   0x7   : > { %5209 = sst [smem:[#allocation7_spill]] %s4284_s26  ;;  %s3404_s29 = sadd.s32 4294967294, %s4288_s27  }
   0x8   : > { %5210 = sst [smem:[#allocation8_spill]] %s4288_s27  ;;  %s4416_s0 = sadd.s32 1, %s4288_s27  }
   0x9   : > { %5211 = sst [smem:[#allocation9_spill]] %s4416_s0  ;;  %s429_s30 = sadd.s32 1, %s4284_s26 }
   0xa   : > { %s426_s18 = ssub.s32 %s4288_s27, %s4416_s0  ;;  %p439_p0 = scmp.ne.s32.totalorder %s4284_s26, %s4280_s25 }
   0xb   : > { %p427_p1 = scmp.eq.s32.totalorder %s426_s18, 0  ;;  %p440_p2 = scmp.eq.s32.totalorder %s4412_s28, 1 }
   0xc   : > { %p445_p3 = scmp.ne.s32.totalorder %s4280_s25, %s4276_s24  ;;  %p446_p4 = scmp.eq.s32.totalorder %s3404_s29, 1 }
   0xd   : > { %s4427_s19 = scalar_select %p427_p1, %s4284_s26, %s429_s30  }
   0xe   : > { %p4429_p5 = por %p440_p2, %p439_p0  ;;  %p4433_p6 = por %p446_p4, %p445_p3 }
   0xf   : > { %5212 = sst [smem:[#allocation10_spill]] %s4427_s19  ;;  %p3407_p7 = scmp.ge.s32.totalorder %s4288_s27, 1 }
  0x10   : > { %s5214_s20 = scalar_select %p4433_p6, 1, 0 }
  0x11   : > { %p546_p8 = scmp.lt.s32.totalorder %s4288_s27, 3 }
  0x12   : > { %5215 = sst [smem:[#allocation11_spill]] %s5214_s20 }
  0x13   : > { %p547_p9 = pnand %p3407_p7, %p546_p8 }
  0x14   : > { %p624_p10 = scmp.lt.s32.totalorder (!%p547_p9), %s4412_s28, 1  ;;  %v4290_v0 = vmov (!%p547_p9), 1   ;;  %v4291_v1 = vmov (!%p547_p9), 0   ;;  %s5216_s30 = sld [smem:[#allocation13_spill]] (!%p547_p9)  ;;  %v3425_v4 = vld [vmem:[%s5189_s7 + $0x8] sm:$0xff] (!%p547_p9)  ;;  %v683_v6 = vld [vmem:[%s5189_s7] sm:$0xff] (!%p547_p9)  ;;  %v657_v31 = vlaneseq (!%p547_p9) }
  0x15   : > { %550 = sbr.rel (%p547_p9) target bundleno = 4241 (0x1091), region = 88  ;;  %4129 = vset.pattern.permute.xlu0 (!%p547_p9), %v4290_v0  ;;  %4130 = vset.pattern.permute.xlu1 (!%p547_p9), %v4291_v1  ;;  %v4474_v13 = vld [vmem:[%s5190_s8 + $0x8] sm:$0xff] (!%p547_p9)  ;;  %vm684_vm0 = vcmask (!%p547_p9), 64512   ;;  %v4292_v35 = vmov (!%p547_p9), 0.0   ;;  %v4518_v42 = vld [vmem:[%s5190_s8] sm:$0xff] (!%p547_p9)  ;;  %v3451_v53 = vld [vmem:[%s5189_s7 + $0x10] sm:$0xff] (!%p547_p9) }
  0x16   : > { %3722 = vmatprep.subr.mxu1 (!%p547_p9), %v3425_v4  ;;  %3717 = vmatprep.subr.mxu0 (!%p547_p9), %v683_v6  ;;  %v4500_v32 = vand.u32 (!%p547_p9), 127, %v657_v31  ;;  %v4294_v62 = vmov (!%p547_p9), 1.0|1.0   ;;  %s5217_s29 = sld [smem:[#allocation12_spill]] (!%p547_p9)  ;;  %s4298_s23 = smov (!%p547_p9), 32  }
  0x17   : > { %3723 = vmatpush3.msra.mxu1 (!%p547_p9), %v3425_v4  ;;  %3718 = vmatpush3.msra.mxu0 (!%p547_p9), %v683_v6  ;;  %s621_s26 = sand.u32 (!%p547_p9), 1, %s4280_s25  }
  0x18   : > { %3727 = vmatprep.subr.mxu0 (!%p547_p9), %v4474_v13  ;;  %3744 = vmatprep.subr.mxu1 (!%p547_p9), %v3451_v53  ;;  %s3408_s27 = sshll.u32 (!%p547_p9), %s621_s26, 4 }
  0x1c   : > { %s4441_s21 = scalar_select %p624_p10, %s4412_s28, 1 }
  0x1e   : > { %s3577_s22 = sshll.u32 %s4441_s21, 4  ;;  %s3579_s19 = sshll.u32 %s4441_s21, 6 }
  0x1f   : > { %s633_s18 = scalar_lea.vmem %s5216_s30, %s3577_s22  ;;  %s4455_s20 = scalar_lea.vmem %s5185_s3, %s3579_s19 }
  0x20   : > { %v655_v2 = vld [vmem:[%s633_s18] sm:$0xff]  ;;  %v656_v3 = vld [vmem:[%s633_s18 + $0x8] sm:$0xff]  ;;  %v1114_v7 = vld [vmem:[%s4455_s20 + $0x10] sm:$0xff]  ;;  %s3581_s24 = sshll.u32 %s4441_s21, 7  ;;  %s4546_s0 = scalar_lea.vmem %s5184_s2, %s3579_s19 }
  0x21   : > { %672 = vperm.xlu0 %4129, %v655_v2   ;;  %660 = vperm.xlu1 %4130, %v655_v2   ;;  %v1112_v5 = vld [vmem:[%s4455_s20] sm:$0xff]  ;;  %v1118_v9 = vld [vmem:[%s4455_s20 + $0x30] sm:$0xff]  ;;  %v1113_v10 = vld [vmem:[%s4455_s20 + $0x8] sm:$0xff]  ;;  %s4480_s18 = scalar_lea.vmem %s5187_s5, %s3581_s24  ;;  %s4293_s30 = smov 16  }
  0x22   : > { %v1116_v8 = vld [vmem:[%s4455_s20 + $0x20] sm:$0xff]  ;;  %v1115_v11 = vld [vmem:[%s4455_s20 + $0x18] sm:$0xff]  ;;  %v1117_v12 = vld [vmem:[%s4455_s20 + $0x28] sm:$0xff]  ;;  %s654_s24 = scalar_lea.vmem %s5188_s6, %s4441_s21  ;;  %s4297_s19 = smov 96  }
  0x23   : > { %v1580_v14 = vld [vmem:[%s4480_s18 + $0x18] sm:$0xff]  ;;  %v1582_v16 = vld [vmem:[%s4480_s18 + $0x28] sm:$0xff]  ;;  %v1577_v17 = vld [vmem:[%s4480_s18] sm:$0xff] }
  0x24   : > { %v1119_v15 = vld [vmem:[%s4455_s20 + $0x38] sm:$0xff]  ;;  %v1578_v18 = vld [vmem:[%s4480_s18 + $0x8] sm:$0xff]  ;;  %v1579_v20 = vld [vmem:[%s4480_s18 + $0x10] sm:$0xff]  ;;  %s646_s20 = scalar_lea.vmem %s5186_s4, %s4441_s21  ;;  %s4295_s21 = smov 8  }
  0x25   : > { %675 = vperm.xlu0 %4129, %v656_v3   ;;  %663 = vperm.xlu1 %4130, %v656_v3   ;;  %v1584_v19 = vld [vmem:[%s4480_s18 + $0x38] sm:$0xff]  ;;  %v1581_v21 = vld [vmem:[%s4480_s18 + $0x20] sm:$0xff]  ;;  %v1586_v22 = vld [vmem:[%s4480_s18 + $0x48] sm:$0xff] }
  0x26   : > { %v1583_v23 = vld [vmem:[%s4480_s18 + $0x30] sm:$0xff]  ;;  %v1588_v24 = vld [vmem:[%s4480_s18 + $0x58] sm:$0xff]  ;;  %v1590_v25 = vld [vmem:[%s4480_s18 + $0x68] sm:$0xff] }
  0x27   : > { %v1585_v26 = vld [vmem:[%s4480_s18 + $0x40] sm:$0xff]  ;;  %v1592_v27 = vld [vmem:[%s4480_s18 + $0x78] sm:$0xff]  ;;  %v1587_v28 = vld [vmem:[%s4480_s18 + $0x50] sm:$0xff] }
  0x28   : > { %v1589_v29 = vld [vmem:[%s4480_s18 + $0x60] sm:$0xff]  ;;  %v1591_v30 = vld [vmem:[%s4480_s18 + $0x70] sm:$0xff]  ;;  %v1528_v55 = vld [vmem:[%s4546_s0 + $0x8] sm:$0xff] }
  0x29   : > { %1169 = vperm.xlu0 %4129, %v1112_v5   ;;  %4131 = vset.pattern.permute.xlu1 %v4290_v0  ;;  %v1527_v56 = vld [vmem:[%s4546_s0] sm:$0xff]  ;;  %v1530_v59 = vld [vmem:[%s4546_s0 + $0x18] sm:$0xff]  ;;  %v1529_v61 = vld [vmem:[%s4546_s0 + $0x10] sm:$0xff] }
  0x2a   : > { %1172 = vperm.xlu1 %4131, %v1113_v10  }
  0x2d   : > { %1175 = vperm.xlu0 %4129, %v1114_v7  }
  0x2e   : > { %1178 = vperm.xlu1 %4131, %v1115_v11  }
  0x31   : > { %1181 = vperm.xlu0 %4129, %v1116_v8  }
  0x32   : > { %1184 = vperm.xlu1 %4131, %v1117_v12  }
  0x35   : > { %1187 = vperm.xlu0 %4129, %v1118_v9  }
  0x36   : > { %1190 = vperm.xlu1 %4131, %v1119_v15  }
  0x39   : > { %4132 = vset.pattern.permute.xlu0 %v4291_v1 }
  0x3a   : > { %1121 = vperm.xlu0 %4132, %v1112_v5   ;;  %4133 = vset.pattern.permute.xlu1 %v4291_v1 }
  0x3b   : > { %1630 = vperm.xlu1 %4133, %v1577_v17  }
  0x3e   : > { %1124 = vperm.xlu0 %4132, %v1113_v10  }
  0x3f   : > { %1633 = vperm.xlu1 %4133, %v1578_v18  }
  0x42   : > { %1639 = vperm.xlu0 %4132, %v1580_v14  }
  0x43   : > { %1636 = vperm.xlu1 %4133, %v1579_v20  }
  0x46   : > { %1645 = vperm.xlu0 %4132, %v1582_v16   ;;  %v4603_v16 = vld [vmem:[%s646_s20] ss:$0 sm:$0xff] }
  0x47   : > { %1642 = vperm.xlu1 %4133, %v1581_v21   ;;  %v4610_v21 = vld [vmem:[%s654_s24] ss:$0 sm:$0xff]  ;;  %s628_s24 = scalar_lea.vmem %s5217_s29, %s3577_s22  ;;  %s4296_s22 = smov 64  }
  0x48   : > { %s4299_s29 = smov [#allocation3]  }
  0x4a   : > { %1130 = vperm.xlu0 %4132, %v1115_v11  }
  0x4b   : > { %1127 = vperm.xlu1 %4133, %v1114_v7  }
  0x4e   : > { %1651 = vperm.xlu0 %4132, %v1584_v19  }
  0x4f   : > { %1648 = vperm.xlu1 %4133, %v1583_v23  }
  0x52   : > { %1136 = vperm.xlu0 %4132, %v1117_v12  }
  0x53   : > { %1133 = vperm.xlu1 %4133, %v1116_v8  }
  0x56   : > { %1657 = vperm.xlu0 %4132, %v1586_v22  }
  0x57   : > { %1654 = vperm.xlu1 %4133, %v1585_v26  }
  0x5a   : > { %1142 = vperm.xlu0 %4132, %v1119_v15   ;;  %v4596_v15 = vshrl.u32 %v657_v31, 7 }
  0x5b   : > { %1139 = vperm.xlu1 %4133, %v1118_v9  }
  0x5e   : > { %1663 = vperm.xlu0 %4132, %v1588_v24  }
  0x5f   : > { %1660 = vperm.xlu1 %4133, %v1587_v28   ;;  %v4626_v28 = vadd.s32 8, %v4596_v15 }
  0x62   : > { %1669 = vperm.xlu0 %4132, %v1590_v25  }
  0x63   : > { %1666 = vperm.xlu1 %4133, %v1589_v29   ;;  %v851_v29 = vld [vmem:[%s5190_s8 + $0x10] sm:$0xff] }
  0x66   : > { %1675 = vperm.xlu0 %4132, %v1592_v27  }
  0x67   : > { %1672 = vperm.xlu1 %4133, %v1591_v30   ;;  %v852_v30 = vld [vmem:[%s5190_s8 + $0x18] sm:$0xff] }
  0x6a   : > { %1545 = vrot.lane.b32.xlu0 %v1528_v55, %s4293_s30 }
  0x6b   : > { %1543 = vrot.lane.b32.xlu1 %v1527_v56, %s4293_s30  ;;  %v4709_v56 = vadd.s32 48, %v4596_v15 }
  0x6e   : > { %1549 = vrot.lane.b32.xlu0 %v1530_v59, %s4293_s30 }
  0x6f   : > { %1547 = vrot.lane.b32.xlu1 %v1529_v61, %s4293_s30 }
  0xa0   : > { %v673_v33 = vpop.permute.xlu0 %672  ;;  %v661_v34 = vpop.permute.xlu1 %660 }
  0xa1   : > { %vm677_vm1 = vcmp.eq.s32.totalorder %v673_v33, %v4500_v32  ;;  %vm665_vm2 = vcmp.eq.s32.totalorder %v661_v34, %v4500_v32 }
  0xa2   : > { %v3421_v36 = vsel %vm677_vm1, 1.0, %v4292_v35  ;;  %v3419_v37 = vsel %vm665_vm2, 1.0, %v4292_v35 }
  0xa3   : > { %3724 = vmatprep.mubr.msk.f32.mxu1 %vm684_vm0, %v3421_v36  ;;  %3719 = vmatprep.mubr.msk.f32.mxu0 %vm684_vm0, %v3419_v37  ;;  %v3952_v37 = vpack.c.bf16 %v852_v30, %v851_v29 }
  0xa4   : > { %v676_v38 = vpop.permute.xlu0 %675  ;;  %v664_v39 = vpop.permute.xlu1 %663 }
  0xa5   : > { %vm678_vm3 = vcmp.eq.s32.totalorder %v676_v38, %v4500_v32  ;;  %vm666_vm4 = vcmp.eq.s32.totalorder %v664_v39, %v4500_v32  ;;  %v1015_v38 = vld [vmem:[%s628_s24] sm:$0xff]  ;;  %v3460_v39 = vld [vmem:[%s5189_s7 + $0x18] sm:$0xff] }
  0xa6   : > { %v3422_v40 = vsel %vm678_vm3, 1.0, %v4292_v35  ;;  %v3420_v41 = vsel %vm666_vm4, 1.0, %v4292_v35 }
  0xa7   : > { %3725 = vmatmul.mubr.msk.f32.vlgmr.msra.gmra.mrb[0].mxu1 %vm684_vm0, %v3422_v40  ;;  %3720 = vmatmul.mubr.msk.f32.vlgmr.msra.gmra.mrb[0].mxu0 %vm684_vm0, %v3420_v41  ;;  %v1016_v40 = vld [vmem:[%s628_s24 + $0x8] sm:$0xff]  ;;  %s4230_s24 = sshll.u32 %s4299_s29, 4  ;;  %s4231_s24 = int_to_ptr.vmem [resolvable:$false] %s4230_s24 }
  0xa8   : > { %3728 = vmatpush3.msra.mxu0 %v4474_v13  ;;  %v4521_v43 = vpop.permute.xlu0 %1169  ;;  %3745 = vmatpush3.msra.mxu1 %v3451_v53  ;;  %v4694_v53 = vadd.s32 24, %v4596_v15 }
  0xa9   : > { %3732 = vmatprep.subr.mxu0 %v4518_v42  ;;  %v4523_v44 = vpop.permute.xlu1 %1172 }
  0xac   : > { %v4525_v45 = vpop.permute.xlu0 %1175 }
  0xad   : > { %v4527_v46 = vpop.permute.xlu1 %1178 }
  0xb0   : > { %v4529_v47 = vpop.permute.xlu0 %1181 }
  0xb1   : > { %v4531_v48 = vpop.permute.xlu1 %1184 }
  0xb4   : > { %v4533_v49 = vpop.permute.xlu0 %1187 }
  0xb5   : > { %v4535_v50 = vpop.permute.xlu1 %1190 }
  0xb9   : > { %v1122_v52 = vpop.permute.xlu0 %1121 }
  0xba   : > { %v1631_v51 = vpop.permute.xlu1 %1630  ;;  %vm1144_vm5 = vcmp.eq.s32.totalorder %v1122_v52, %v4500_v32  ;;  %v4691_v52 = vadd.s32 16, %v4596_v15 }
  0xbb   : > { %v3435_v54 = vsel %vm1144_vm5, 1.0, %v4292_v35  ;;  %vm1677_vm6 = vcmp.eq.s32.totalorder %v4500_v32, %v1631_v51 }
  0xbc   : > { %3746 = vmatprep.mubr.msk.f32.mxu1 %vm684_vm0, %v3435_v54  ;;  %v4700_v54 = vadd.s32 40, %v4596_v15 }
  0xbd   : > { %v1125_v58 = vpop.permute.xlu0 %1124 }
  0xbe   : > { %v1634_v57 = vpop.permute.xlu1 %1633  ;;  %vm1145_vm8 = vcmp.eq.s32.totalorder %v1125_v58, %v4500_v32  ;;  %v4719_v58 = vadd.s32 56, %v4596_v15 }
  0xbf   : > { %vm1678_vm7 = vcmp.eq.s32.totalorder %v4500_v32, %v1634_v57  ;;  %v3436_v60 = vsel %vm1145_vm8, 1.0, %v4292_v35 }
  0xc0   : > { %vm3956_vm9 = vmpackc.low %vm1678_vm7, %vm1677_vm6  ;;  %3747 = vmatmul.mubr.msk.f32.vlgmr.msra.gmra.mrb[2].mxu1 %vm684_vm0, %v3436_v60 }
  0xc1   : > { %3957 = vmatprep.subr.msk.bf16.mxu1 %vm3956_vm9, %v4294_v62  ;;  %v1640_v0 = vpop.permute.xlu0 %1639 }
  0xc2   : > { %v1637_v63 = vpop.permute.xlu1 %1636  ;;  %3959 = vmatpush3.bf16.msk.msra.mxu1 %vm3956_vm9, %v4294_v62  ;;  %vm1680_vm11 = vcmp.eq.s32.totalorder %v4500_v32, %v1640_v0 }
  0xc3   : > { %vm1679_vm10 = vcmp.eq.s32.totalorder %v4500_v32, %v1637_v63 }
  0xc4   : > { %vm3960_vm12 = vmpackc.low %vm1680_vm11, %vm1679_vm10 }
  0xc5   : > { %3961 = vmatprep.subr.msk.bf16.mxu1 %vm3960_vm12, %v4294_v62  ;;  %v1646_v2 = vpop.permute.xlu0 %1645 }
  0xc6   : > { %v1643_v1 = vpop.permute.xlu1 %1642  ;;  %3963 = vmatpush3.bf16.msk.msra.mxu1 %vm3960_vm12, %v4294_v62  ;;  %vm1682_vm14 = vcmp.eq.s32.totalorder %v4500_v32, %v1646_v2 }
  0xc7   : > { %vm1681_vm13 = vcmp.eq.s32.totalorder %v4500_v32, %v1643_v1 }
  0xc8   : > { %vm3964_vm15 = vmpackc.low %vm1682_vm14, %vm1681_vm13  ;;  %vm1607_vm13 = vcmp.eq.s32.totalorder %v4596_v15, %v4603_v16 }
  0xc9   : > { %3965 = vmatprep.subr.msk.bf16.mxu1 %vm3964_vm15, %v4294_v62  ;;  %v1131_v4 = vpop.permute.xlu0 %1130 }
  0xca   : > { %v1128_v3 = vpop.permute.xlu1 %1127  ;;  %3967 = vmatpush3.bf16.msk.msra.mxu1 %vm3964_vm15, %v4294_v62  ;;  %vm1147_vm2 = vcmp.eq.s32.totalorder %v1131_v4, %v4500_v32 }
  0xcb   : > { %vm1146_vm1 = vcmp.eq.s32.totalorder %v1128_v3, %v4500_v32  ;;  %v3438_v6 = vsel %vm1147_vm2, 1.0, %v4292_v35 }
  0xcc   : > { %v3437_v5 = vsel %vm1146_vm1, 1.0, %v4292_v35 }
  0xcd   : > { %3749 = vmatprep.mubr.msk.f32.mxu1 %vm684_vm0, %v3437_v5  ;;  %v1652_v8 = vpop.permute.xlu0 %1651 }
  0xce   : > { %v1649_v7 = vpop.permute.xlu1 %1648  ;;  %3750 = vmatmul.mubr.msk.f32.gmra.mrb[4].mxu1 %vm684_vm0, %v3438_v6  ;;  %vm1684_vm4 = vcmp.eq.s32.totalorder %v4500_v32, %v1652_v8 }
  0xcf   : > { %vm1683_vm3 = vcmp.eq.s32.totalorder %v4500_v32, %v1649_v7 }
  0xd0   : > { %vm3968_vm5 = vmpackc.low %vm1684_vm4, %vm1683_vm3 }
  0xd1   : > { %3969 = vmatprep.subr.msk.bf16.mxu1 %vm3968_vm5, %v4294_v62  ;;  %v1137_v10 = vpop.permute.xlu0 %1136 }
  0xd2   : > { %v1134_v9 = vpop.permute.xlu1 %1133  ;;  %3971 = vmatpush3.bf16.msk.msra.mxu1 %vm3968_vm5, %v4294_v62  ;;  %vm1149_vm7 = vcmp.eq.s32.totalorder %v1137_v10, %v4500_v32 }
  0xd3   : > { %vm1148_vm6 = vcmp.eq.s32.totalorder %v1134_v9, %v4500_v32  ;;  %v3440_v12 = vsel %vm1149_vm7, 1.0, %v4292_v35 }
  0xd4   : > { %v3439_v11 = vsel %vm1148_vm6, 1.0, %v4292_v35 }
  0xd5   : > { %3752 = vmatprep.mubr.msk.f32.mxu1 %vm684_vm0, %v3439_v11  ;;  %v1658_v14 = vpop.permute.xlu0 %1657 }
  0xd6   : > { %v1655_v13 = vpop.permute.xlu1 %1654  ;;  %3753 = vmatmul.mubr.msk.f32.gmra.mrb[6].mxu1 %vm684_vm0, %v3440_v12  ;;  %vm1686_vm9 = vcmp.eq.s32.totalorder %v4500_v32, %v1658_v14 }
  0xd7   : > { %vm1685_vm8 = vcmp.eq.s32.totalorder %v4500_v32, %v1655_v13 }
  0xd8   : > { %vm3972_vm10 = vmpackc.low %vm1686_vm9, %vm1685_vm8  ;;  %vm1608_vm8 = vcmp.eq.s32.totalorder %v4626_v28, %v4603_v16  ;;  %vm1017_vm9 = vcmask 130048  }
  0xd9   : > { %3973 = vmatprep.subr.msk.bf16.mxu1 %vm3972_vm10, %v4294_v62  ;;  %v1143_v18 = vpop.permute.xlu0 %1142 }
  0xda   : > { %v1140_v17 = vpop.permute.xlu1 %1139  ;;  %3975 = vmatpush3.bf16.msk.msra.mxu1 %vm3972_vm10, %v4294_v62  ;;  %vm1151_vm12 = vcmp.eq.s32.totalorder %v1143_v18, %v4500_v32  ;;  %vm1192_vm10 = vcmp.eq.s32.totalorder %v4521_v43, %v4500_v32 }
  0xdb   : > { %vm1150_vm11 = vcmp.eq.s32.totalorder %v1140_v17, %v4500_v32  ;;  %v3442_v20 = vsel %vm1151_vm12, 1.0, %v4292_v35  ;;  %v3443_v41 = vsel %vm1192_vm10, 1.0, %v4292_v35  ;;  %vm1194_vm12 = vcmp.eq.s32.totalorder %v4525_v45, %v4500_v32  ;;  %v1533_v17 = vld [vmem:[%s4546_s0 + $0x30] sm:$0xff] }
  0xdc   : > { %v3441_v19 = vsel %vm1150_vm11, 1.0, %v4292_v35  ;;  %vm1193_vm11 = vcmp.eq.s32.totalorder %v4523_v44, %v4500_v32  ;;  %v3445_v51 = vsel %vm1194_vm12, 1.0, %v4292_v35  ;;  %vm1518_vm10 = vcmask 130112  }
  0xdd   : > { %3755 = vmatprep.mubr.msk.f32.mxu1 %vm684_vm0, %v3441_v19  ;;  %v1664_v23 = vpop.permute.xlu0 %1663  ;;  %vm1727_vm12 = vcmp.eq.s32.totalorder %v4691_v52, %v4500_v32 }
  0xde   : > { %v1661_v22 = vpop.permute.xlu1 %1660  ;;  %3756 = vmatmul.mubr.msk.f32.gmra.mrb[8].mxu1 %vm684_vm0, %v3442_v20  ;;  %vm1688_vm15 = vcmp.eq.s32.totalorder %v4500_v32, %v1664_v23 }
  0xdf   : > { %vm1687_vm14 = vcmp.eq.s32.totalorder %v4500_v32, %v1661_v22  ;;  %3804 = vmatprep.mubr.msk.f32.mxu1 %vm1607_vm13, %v4610_v21  ;;  %vm1195_vm13 = vcmp.eq.s32.totalorder %v4527_v46, %v4500_v32 }
  0xe0   : > { %vm3976_vm1 = vmpackc.low %vm1688_vm15, %vm1687_vm14  ;;  %vm1196_vm14 = vcmp.eq.s32.totalorder %v4529_v47, %v4500_v32  ;;  %v3446_v43 = vsel %vm1195_vm13, 1.0, %v4292_v35  ;;  %vm1197_vm15 = vcmp.eq.s32.totalorder %v4531_v48, %v4500_v32  ;;  %v1532_v48 = vld [vmem:[%s4546_s0 + $0x28] sm:$0xff]  ;;  %vm1726_vm13 = vcmp.eq.s32.totalorder %v4626_v28, %v4500_v32  ;;  %v2003_v28 = vld [vmem:[%s5192_s10 + $0x18] sm:$0xff] }
  0xe1   : > { %3977 = vmatprep.subr.msk.bf16.mxu1 %vm3976_vm1, %v4294_v62  ;;  %v1670_v25 = vpop.permute.xlu0 %1669  ;;  %v3447_v44 = vsel %vm1196_vm14, 1.0, %v4292_v35  ;;  %v3448_v45 = vsel %vm1197_vm15, 1.0, %v4292_v35  ;;  %1553 = vrot.lane.b32.xlu0 %v1532_v48, %s4293_s30  ;;  %vm1728_vm14 = vcmp.eq.s32.totalorder %v4694_v53, %v4500_v32 }
  0xe2   : > { %v1667_v24 = vpop.permute.xlu1 %1666  ;;  %3979 = vmatpush3.bf16.msk.msra.mxu1 %vm3976_vm1, %v4294_v62  ;;  %vm1690_vm3 = vcmp.eq.s32.totalorder %v4500_v32, %v1670_v25  ;;  %vm1198_vm1 = vcmp.eq.s32.totalorder %v4533_v49, %v4500_v32  ;;  %v1531_v49 = vld [vmem:[%s4546_s0 + $0x20] sm:$0xff] }
  0xe3   : > { %vm1689_vm2 = vcmp.eq.s32.totalorder %v4500_v32, %v1667_v24  ;;  %v3449_v46 = vsel %vm1198_vm1, 1.0, %v4292_v35  ;;  %1551 = vrot.lane.b32.xlu1 %v1531_v49, %s4293_s30  ;;  %vm1730_vm1 = vcmp.eq.s32.totalorder %v4700_v54, %v4500_v32 }
  0xe4   : > { %vm3980_vm4 = vmpackc.low %vm1690_vm3, %vm1689_vm2  ;;  %vm1199_vm2 = vcmp.eq.s32.totalorder %v4535_v50, %v4500_v32  ;;  %v4697_v50 = vadd.s32 32, %v4596_v15  ;;  %vm1609_vm3 = vcmp.eq.s32.totalorder %v4691_v52, %v4603_v16 }
  0xe5   : > { %3981 = vmatprep.subr.msk.bf16.mxu1 %vm3980_vm4, %v4294_v62  ;;  %v1676_v27 = vpop.permute.xlu0 %1675  ;;  %v3450_v47 = vsel %vm1199_vm2, 1.0, %v4292_v35  ;;  %vm1731_vm2 = vcmp.eq.s32.totalorder %v4709_v56, %v4500_v32 }
  0xe6   : > { %v1673_v26 = vpop.permute.xlu1 %1672  ;;  %3983 = vmatpush3.bf16.msk.msra.mxu1 %vm3980_vm4, %v4294_v62  ;;  %vm1692_vm6 = vcmp.eq.s32.totalorder %v4500_v32, %v1676_v27  ;;  %vm1610_vm4 = vcmp.eq.s32.totalorder %v4694_v53, %v4603_v16  ;;  %vm1729_vm15 = vcmp.eq.s32.totalorder %v4697_v50, %v4500_v32  ;;  %v3490_v53 = vsel %vm1728_vm14, 1.0, %v4292_v35 }
  0xe7   : > { %vm1691_vm5 = vcmp.eq.s32.totalorder %v4500_v32, %v1673_v26 }
  0xe8   : > { %vm3984_vm7 = vmpackc.low %vm1692_vm6, %vm1691_vm5  ;;  %vm1611_vm5 = vcmp.eq.s32.totalorder %v4697_v50, %v4603_v16  ;;  %vm1612_vm6 = vcmp.eq.s32.totalorder %v4700_v54, %v4603_v16  ;;  %v3491_v50 = vsel %vm1729_vm15, 1.0, %v4292_v35  ;;  %v3493_v54 = vsel %vm1731_vm2, 1.0, %v4292_v35 }
  0xe9   : > { %3985 = vmatprep.subr.msk.bf16.mxu1 %vm3984_vm7, %v4294_v62 }
  0xea   : > { %3987 = vmatpush3.bf16.msk.msra.mxu1 %vm3984_vm7, %v4294_v62  ;;  %vm1613_vm7 = vcmp.eq.s32.totalorder %v4709_v56, %v4603_v16  ;;  %v1544_v18 = vpop.permute.xlu1 %1543 }
  0xed   : > { %3805 = vmatmul.mubr.msk.f32.vlgmr.msra.gmra.mrb[10].mxu1 %vm1608_vm8, %v4610_v21  ;;  %vm1614_vm8 = vcmp.eq.s32.totalorder %v4719_v58, %v4603_v16  ;;  %v1534_v16 = vld [vmem:[%s4546_s0 + $0x38] sm:$0xff] }
  0xee   : > { %3807 = vmatprep.mubr.msk.f32.mxu1 %vm1609_vm3, %v4610_v21  ;;  %v1548_v20 = vpop.permute.xlu1 %1547  ;;  %vm1732_vm3 = vcmp.eq.s32.totalorder %v4719_v58, %v4500_v32  ;;  %v3530_v58 = vld [vmem:[%s5192_s10 + $0x28] sm:$0xff] }
  0xef   : > { %v3494_v56 = vsel %vm1732_vm3, 1.0, %v4292_v35 }
  0xf1   : > { %3808 = vmatmul.mubr.msk.f32.gmra.mrb[12].mxu1 %vm1610_vm4, %v4610_v21  ;;  %vm2004_vm4 = vcmask 261120  }
  0xf2   : > { %3810 = vmatprep.mubr.msk.f32.mxu1 %vm1611_vm5, %v4610_v21 }
  0xf5   : > { %3811 = vmatmul.mubr.msk.f32.gmra.mrb[14].mxu1 %vm1612_vm6, %v4610_v21 }
  0xf6   : > { %3813 = vmatprep.mubr.msk.f32.mxu1 %vm1613_vm7, %v4610_v21 }
  0xf9   : > { %3814 = vmatmul.mubr.msk.f32.gmra.mrb[16].mxu1 %vm1614_vm8, %v4610_v21 }
 0x155   : > { %v1552_v25 = vpop.permute.xlu1 %1551 }
 0x17a   : > { %v3726_v31 = vpop.f32.mrb[0].mxu1  ;;  %v3721_v33 = vpop.f32.mrb[0].mxu0 }
 0x17b   : > { %v840_v34 = vpop.f32.mrb[1].mxu1  ;;  %v757_v36 = vpop.f32.mrb[1].mxu0 }
 0x17c   : > { %3729 = vmatprep.mubr.msk.f32.mxu0 %vm684_vm0, %v840_v34 }
 0x17d   : > { %3730 = vmatmul.mubr.msk.f32.vlgmr.msra.gmra.mrb[2].mxu0 %vm684_vm0, %v3726_v31 }
 0x17e   : > { %3733 = vmatpush3.msra.mxu0 %v4518_v42  ;;  %3734 = vmatprep.mubr.msk.f32.mxu0 %vm684_vm0, %v757_v36  ;;  %v3444_v42 = vsel %vm1193_vm11, 1.0, %v4292_v35  ;;  %vm1567_vm11 = vcmask 261248  }
 0x17f   : > { %3953 = vmatprep.subr.bf16.mxu0 %v3952_v37 }
 0x185   : > { %3735 = vmatmul.mubr.msk.f32.vlgmr.msra.gmra.mrb[2].mxu0 %vm684_vm0, %v3721_v33 }
 0x186   : > { %3955 = vmatpush3.bf16.msra.mxu0 %v3952_v37  ;;  %3741 = vmatprep.mubr.msk.f32.mxu0 %vm1017_vm9, %v1015_v38 }
 0x187   : > { %3758 = vmatprep.subr.mxu0 %v3460_v39 }
 0x18d   : > { %3742 = vmatmul.mubr.msk.f32.vlgmr.msra.gmra.mrb[2].mxu0 %vm1017_vm9, %v1016_v40  ;;  %vm1862_vm9 = vcmask 523264  }
 0x18e   : > { %3759 = vmatpush3.msra.mxu0 %v3460_v39  ;;  %3760 = vmatprep.mubr.msk.f32.mxu0 %vm684_vm0, %v3443_v41 }
 0x191   : > { %3761 = vmatmul.mubr.msk.f32.vlgmr.msra.gmra.mrb[4].mxu0 %vm684_vm0, %v3444_v42 }
 0x192   : > { %3763 = vmatprep.mubr.msk.f32.mxu0 %vm684_vm0, %v3445_v51 }
 0x193   : > { %v3748_v55 = vpop.f32.mrb[2].mxu1 }
 0x194   : > { %1479 = vst.msk [vmem:[#allocation2 + $0x8] sm:$0xff] %vm684_vm0, %v3748_v55  ;;  %v1308_v57 = vpop.f32.mrb[3].mxu1  ;;  %v2000_v55 = vld [vmem:[%s5192_s10] sm:$0xff] }
 0x195   : > { %3764 = vmatmul.mubr.msk.f32.gmra.mrb[6].mxu0 %vm684_vm0, %v3446_v43  ;;  %1478 = vst.msk [vmem:[#allocation2] sm:$0xff] %vm684_vm0, %v1308_v57  ;;  %v2001_v57 = vld [vmem:[%s5192_s10 + $0x8] sm:$0xff] }
 0x196   : > { %3766 = vmatprep.mubr.msk.f32.mxu0 %vm684_vm0, %v3447_v44  ;;  %v4004_v52 = vpack.c.bf16 %v2001_v57, %v2000_v55  ;;  %v1992_v55 = vld [vmem:[%s5193_s11] sm:$0xff] }
 0x199   : > { %3767 = vmatmul.mubr.msk.f32.gmra.mrb[8].mxu0 %vm684_vm0, %v3448_v45 }
 0x19a   : > { %3769 = vmatprep.mubr.msk.f32.mxu0 %vm684_vm0, %v3449_v46 }
 0x19d   : > { %3770 = vmatmul.mubr.msk.f32.gmra.mrb[10].mxu0 %vm684_vm0, %v3450_v47 }
 0x1a1   : > { %v3751_v59 = vpop.f32.mrb[4].mxu1 }
 0x1a2   : > { %1481 = vst.msk [vmem:[#allocation2 + $0x18] sm:$0xff] %vm684_vm0, %v3751_v59  ;;  %v1318_v60 = vpop.f32.mrb[5].mxu1 }
 0x1a3   : > { %1480 = vst.msk [vmem:[#allocation2 + $0x10] sm:$0xff] %vm684_vm0, %v1318_v60 }
 0x1a9   : > { %v3754_v61 = vpop.f32.mrb[6].mxu1 }
 0x1aa   : > { %1483 = vst.msk [vmem:[#allocation2 + $0x28] sm:$0xff] %vm684_vm0, %v3754_v61  ;;  %v1328_v62 = vpop.f32.mrb[7].mxu1 }
 0x1ab   : > { %1482 = vst.msk [vmem:[#allocation2 + $0x20] sm:$0xff] %vm684_vm0, %v1328_v62  ;;  %v3489_v62 = vsel %vm1727_vm12, 1.0, %v4292_v35 }
 0x1b1   : > { %v3757_v63 = vpop.f32.mrb[8].mxu1 }
 0x1b2   : > { %1485 = vst.msk [vmem:[#allocation2 + $0x38] sm:$0xff] %vm684_vm0, %v3757_v63  ;;  %v1338_v0 = vpop.f32.mrb[9].mxu1  ;;  %v3488_v63 = vsel %vm1726_vm13, 1.0, %v4292_v35 }
 0x1b3   : > { %1484 = vst.msk [vmem:[#allocation2 + $0x30] sm:$0xff] %vm684_vm0, %v1338_v0  ;;  %vm1725_vm0 = vcmp.eq.s32.totalorder %v4596_v15, %v4500_v32  ;;  %v1546_v15 = vpop.permute.xlu0 %1545  ;;  %v2002_v0 = vld [vmem:[%s5192_s10 + $0x10] sm:$0xff]  ;;  %v3529_v32 = vld [vmem:[%s5192_s10 + $0x20] sm:$0xff] }
 0x1b4   : > { %v3487_v10 = vsel %vm1725_vm0, 1.0, %v4292_v35 }
 0x1b7   : > { %v1550_v19 = vpop.permute.xlu0 %1549 }
 0x1bb   : > { %v1554_v23 = vpop.permute.xlu0 %1553 }
 0x1c0   : > { %v4743_v9 = vpop.f32.mrb[10].mxu1 }
 0x1c1   : > { %v1815_v11 = vpop.f32.mrb[11].mxu1 }
 0x1c2   : > { %v1816_v14 = vadd.f32 %v3487_v10, %v1815_v11 }
 0x1c4   : > { %3832 = vmatprep.mubr.msk.f32.mxu0 %vm1862_vm9, %v1816_v14  ;;  %v4756_v21 = vpop.f32.mrb[12].mxu1  ;;  %v3532_v14 = vld [vmem:[%s5192_s10 + $0x38] sm:$0xff] }
 0x1c5   : > { %v4758_v22 = vpop.f32.mrb[13].mxu1 }
 0x1c8   : > { %v4760_v24 = vpop.f32.mrb[14].mxu1 }
 0x1c9   : > { %v4762_v26 = vpop.f32.mrb[15].mxu1 }
 0x1cc   : > { %v4764_v27 = vpop.f32.mrb[16].mxu1 }
 0x1cd   : > { %v4766_v29 = vpop.f32.mrb[17].mxu1  ;;  %v1851_v11 = vadd.f32 %v4764_v27, %v3494_v56  ;;  %v3543_v27 = vld [vmem:[%s5192_s10 + $0x70] sm:$0xff] }
 0x1ce   : > { %v1846_v10 = vadd.f32 %v3493_v54, %v4766_v29  ;;  %v3544_v29 = vld [vmem:[%s5192_s10 + $0x78] sm:$0xff] }
 0x260   : > { %v4734_v1 = vpop.f32.mrb[2].mxu0 }
 0x261   : > { %v4736_v2 = vpop.f32.mrb[3].mxu0 }
 0x264   : > { %v3762_v3 = vpop.f32.mrb[4].mxu0 }
 0x265   : > { %1496 = vrot.lane.b32.xlu0 %v3762_v3, %s4295_s21  ;;  %v1439_v4 = vpop.f32.mrb[5].mxu0  ;;  %v1826_v3 = vadd.f32 %v3489_v62, %v4758_v22  ;;  %v3537_v22 = vld [vmem:[%s5192_s10 + $0x50] sm:$0xff]  ;;  %v1995_v62 = vld [vmem:[%s5193_s11 + $0x18] sm:$0xff] }
 0x266   : > { %1494 = vrot.lane.b32.xlu1 %v1439_v4, %s4295_s21  ;;  %v1821_v4 = vadd.f32 %v4743_v9, %v3488_v63  ;;  %v1994_v63 = vld [vmem:[%s5193_s11 + $0x10] sm:$0xff] }
 0x268   : > { %v3765_v5 = vpop.f32.mrb[6].mxu0 }
 0x269   : > { %1500 = vrot.lane.b32.xlu0 %v3765_v5, %s4295_s21  ;;  %v1449_v6 = vpop.f32.mrb[7].mxu0  ;;  %v4008_v5 = vpack.c.bf16 %v2003_v28, %v2002_v0 }
 0x26a   : > { %1498 = vrot.lane.b32.xlu1 %v1449_v6, %s4295_s21  ;;  %v1831_v6 = vadd.f32 %v4756_v21, %v3490_v53 }
 0x26c   : > { %v3768_v7 = vpop.f32.mrb[8].mxu0 }
 0x26d   : > { %1504 = vrot.lane.b32.xlu0 %v3768_v7, %s4295_s21  ;;  %v1459_v8 = vpop.f32.mrb[9].mxu0  ;;  %v3492_v7 = vsel %vm1730_vm1, 1.0, %v4292_v35 }
 0x26e   : > { %1502 = vrot.lane.b32.xlu1 %v1459_v8, %s4295_s21  ;;  %v1836_v8 = vadd.f32 %v3491_v50, %v4762_v26  ;;  %v1841_v9 = vadd.f32 %v4760_v24, %v3492_v7  ;;  %v1997_v50 = vld [vmem:[%s5193_s11 + $0x28] sm:$0xff] }
 0x270   : > { %v3771_v12 = vpop.f32.mrb[10].mxu0 }
 0x271   : > { %1508 = vrot.lane.b32.xlu0 %v3771_v12, %s4295_s21  ;;  %v1469_v13 = vpop.f32.mrb[11].mxu0  ;;  %v3531_v12 = vld [vmem:[%s5192_s10 + $0x30] sm:$0xff] }
 0x272   : > { %1506 = vrot.lane.b32.xlu1 %v1469_v13, %s4295_s21  ;;  %v4012_v13 = vpack.c.bf16 %v3530_v58, %v3529_v32  ;;  %v1998_v32 = vld [vmem:[%s5193_s11 + $0x30] sm:$0xff] }
 0x274   : > { %4013 = vmatprep.subr.bf16.mxu1 %v4012_v13 }
 0x275   : > { %1557 = vrot.lane.b32.xlu0 %v1534_v16, %s4293_s30  ;;  %v3535_v16 = vld [vmem:[%s5192_s10 + $0x40] sm:$0xff]  ;;  %4015 = vmatpush3.bf16.msra.mxu1 %v4012_v13 }
 0x276   : > { %1555 = vrot.lane.b32.xlu1 %v1533_v17, %s4293_s30  ;;  %v3536_v17 = vld [vmem:[%s5192_s10 + $0x48] sm:$0xff]  ;;  %s3582_s30 = sshll.u32 %s4412_s28, 8  ;;  %s5140_s28 = scalar_lea.sflag [#allocation4], %s621_s26 }
 0x277   : > { %s5136_s20 = scalar_lea.hbm %s5199_s17, %s3582_s30 }
 0x2d7   : > { %v1497_v30 = vpop.permute.xlu0 %1496 }
 0x2d8   : > { %1520 = vst.msk [vmem:[#allocation2 + $0x8] sm:$0xff] %vm1518_vm10, %v1497_v30  ;;  %v1495_v31 = vpop.permute.xlu1 %1494 }
 0x2d9   : > { %1569 = vst.msk [vmem:[#allocation2 + $0x8] sm:$0xff] %vm1567_vm11, %v1546_v15  ;;  %v4016_v15 = vpack.c.bf16 %v3532_v14, %v3531_v12 }
 0x2da   : > { %1519 = vst.msk [vmem:[#allocation2] sm:$0xff] %vm1518_vm10, %v1495_v31 }
 0x2db   : > { %1568 = vst.msk [vmem:[#allocation2] sm:$0xff] %vm1567_vm11, %v1544_v18  ;;  %v1501_v33 = vpop.permute.xlu0 %1500  ;;  %v4020_v18 = vpack.c.bf16 %v3536_v17, %v3535_v16  ;;  %4017 = vmatprep.subr.bf16.mxu1 %v4016_v15 }
 0x2dc   : > { %1522 = vst.msk [vmem:[#allocation2 + $0x18] sm:$0xff] %vm1518_vm10, %v1501_v33  ;;  %v1499_v34 = vpop.permute.xlu1 %1498  ;;  %4019 = vmatpush3.bf16.msra.mxu1 %v4016_v15  ;;  %v4032_v33 = vpack.c.bf16 %v3544_v29, %v3543_v27 }
 0x2dd   : > { %1571 = vst.msk [vmem:[#allocation2 + $0x18] sm:$0xff] %vm1567_vm11, %v1550_v19  ;;  %v3541_v19 = vld [vmem:[%s5192_s10 + $0x60] sm:$0xff] }
 0x2de   : > { %1521 = vst.msk [vmem:[#allocation2 + $0x10] sm:$0xff] %vm1518_vm10, %v1499_v34  ;;  %v2508_v34 = vld [vmem:[%s5195_s13] sm:$0xff] }
 0x2df   : > { %1570 = vst.msk [vmem:[#allocation2 + $0x10] sm:$0xff] %vm1567_vm11, %v1548_v20  ;;  %v1505_v36 = vpop.permute.xlu0 %1504  ;;  %v3542_v20 = vld [vmem:[%s5192_s10 + $0x68] sm:$0xff] }
 0x2e0   : > { %1524 = vst.msk [vmem:[#allocation2 + $0x28] sm:$0xff] %vm1518_vm10, %v1505_v36  ;;  %v1503_v37 = vpop.permute.xlu1 %1502  ;;  %v1855_v38 = vld [vmem:[#allocation2 + $0x8] sm:$0xff]  ;;  %v4028_v21 = vpack.c.bf16 %v3542_v20, %v3541_v19 }
 0x2e1   : > { %1573 = vst.msk [vmem:[#allocation2 + $0x28] sm:$0xff] %vm1567_vm11, %v1554_v23  ;;  %v3538_v23 = vld [vmem:[%s5192_s10 + $0x58] sm:$0xff]  ;;  %v2509_v36 = vld [vmem:[%s5195_s13 + $0x8] sm:$0xff] }
 0x2e2   : > { %1523 = vst.msk [vmem:[#allocation2 + $0x20] sm:$0xff] %vm1518_vm10, %v1503_v37  ;;  %v1854_v39 = vld [vmem:[#allocation2] sm:$0xff]  ;;  %4029 = vmatprep.subr.bf16.mxu1 %v4028_v21  ;;  %v4024_v26 = vpack.c.bf16 %v3538_v23, %v3537_v22 }
 0x2e3   : > { %1572 = vst.msk [vmem:[#allocation2 + $0x20] sm:$0xff] %vm1567_vm11, %v1552_v25  ;;  %v3988_v40 = vpack.c.bf16 %v1855_v38, %v1854_v39  ;;  %v1509_v41 = vpop.permute.xlu0 %1508  ;;  %v4877_v39 = vpack.c.bf16 %v2509_v36, %v2508_v34  ;;  %v4955_v22 = vld [vmem:[%s5197_s15] ss:$0 sm:$0xff] }
 0x2e4   : > { %1526 = vst.msk [vmem:[#allocation2 + $0x38] sm:$0xff] %vm1518_vm10, %v1509_v41  ;;  %v1507_v42 = vpop.permute.xlu1 %1506  ;;  %v1857_v51 = vld [vmem:[#allocation2 + $0x18] sm:$0xff] }
 0x2e5   : > { %3989 = vmatprep.subr.bf16.mxu0 %v3988_v40  ;;  %1525 = vst.msk [vmem:[#allocation2 + $0x30] sm:$0xff] %vm1518_vm10, %v1507_v42  ;;  %v2511_v41 = vld [vmem:[%s5195_s13 + $0x18] sm:$0xff] }
 0x2e6   : > { %3991 = vmatpush3.bf16.msra.mxu0 %v3988_v40  ;;  %v1856_v43 = vld [vmem:[#allocation2 + $0x10] sm:$0xff] }
 0x2e7   : > { %v3992_v44 = vpack.c.bf16 %v1857_v51, %v1856_v43  ;;  %v1558_v45 = vpop.permute.xlu0 %1557  ;;  %v2510_v40 = vld [vmem:[%s5195_s13 + $0x10] sm:$0xff] }
 0x2e8   : > { %1575 = vst.msk [vmem:[#allocation2 + $0x38] sm:$0xff] %vm1567_vm11, %v1558_v45  ;;  %v1556_v46 = vpop.permute.xlu1 %1555  ;;  %v1859_v47 = vld [vmem:[#allocation2 + $0x28] sm:$0xff]  ;;  %v4888_v43 = vpack.c.bf16 %v2511_v41, %v2510_v40 }
 0x2e9   : > { %3993 = vmatprep.subr.bf16.mxu0 %v3992_v44  ;;  %1574 = vst.msk [vmem:[#allocation2 + $0x30] sm:$0xff] %vm1567_vm11, %v1556_v46  ;;  %v2369_v45 = vld [vmem:[%s5194_s12 + $0x8] sm:$0xff] }
 0x2ea   : > { %3995 = vmatpush3.bf16.msra.mxu0 %v3992_v44  ;;  %v1858_v48 = vld [vmem:[#allocation2 + $0x20] sm:$0xff] }
 0x2eb   : > { %v3996_v49 = vpack.c.bf16 %v1859_v47, %v1858_v48  ;;  %v2368_v44 = vld [vmem:[%s5194_s12] sm:$0xff]  ;;  %v2371_v47 = vld [vmem:[%s5194_s12 + $0x18] sm:$0xff] }
 0x2ec   : > { %v4036_v46 = vpack.c.bf16 %v2369_v45, %v2368_v44 }
 0x2ed   : > { %3997 = vmatprep.subr.bf16.mxu0 %v3996_v49 }
 0x2ee   : > { %3999 = vmatpush3.bf16.msra.mxu0 %v3996_v49  ;;  %v1993_v49 = vld [vmem:[%s5193_s11 + $0x8] sm:$0xff] }
 0x2ef   : > { %v1861_v59 = vld [vmem:[#allocation2 + $0x38] sm:$0xff] }
 0x2f0   : > { %v1860_v60 = vld [vmem:[#allocation2 + $0x30] sm:$0xff] }
 0x2f1   : > { %v4000_v61 = vpack.c.bf16 %v1861_v59, %v1860_v60 }
 0x2f3   : > { %4001 = vmatprep.subr.bf16.mxu0 %v4000_v61 }
 0x2f4   : > { %4003 = vmatpush3.bf16.msra.mxu0 %v4000_v61 }
 0x2f5   : > { %4005 = vmatprep.subr.bf16.mxu0 %v4004_v52 }
 0x2f7   : > { %3833 = vmatmul.mubr.msk.f32.vlgmr.msra.gmra.mrb[12].mxu0 %vm1862_vm9, %v1821_v4 }
 0x2f8   : > { %3835 = vmatprep.mubr.msk.f32.mxu0 %vm1862_vm9, %v1826_v3  ;;  %4007 = vmatpush3.bf16.msra.mxu0 %v4004_v52 }
 0x2f9   : > { %4009 = vmatprep.subr.bf16.mxu0 %v4008_v5 }
 0x2fb   : > { %3836 = vmatmul.mubr.msk.f32.gmra.mrb[14].mxu0 %vm1862_vm9, %v1831_v6  ;;  %v1996_v6 = vld [vmem:[%s5193_s11 + $0x20] sm:$0xff] }
 0x2fc   : > { %3838 = vmatprep.mubr.msk.f32.mxu0 %vm1862_vm9, %v1836_v8  ;;  %4011 = vmatpush3.bf16.msra.mxu0 %v4008_v5 }
 0x2fd   : > { %4021 = vmatprep.subr.bf16.mxu0 %v4020_v18 }
 0x2ff   : > { %3839 = vmatmul.mubr.msk.f32.gmra.mrb[16].mxu0 %vm1862_vm9, %v1841_v9 }
 0x300   : > { %3841 = vmatprep.mubr.msk.f32.mxu0 %vm1862_vm9, %v1846_v10  ;;  %v1999_v10 = vld [vmem:[%s5193_s11 + $0x38] sm:$0xff] }
 0x303   : > { %3842 = vmatmul.mubr.msk.f32.gmra.mrb[18].mxu0 %vm1862_vm9, %v1851_v11 }
 0x3ca   : > { %v3834_v24 = vpop.f32.mrb[12].mxu0 }
 0x3cb   : > { %v1953_v25 = vpop.f32.mrb[13].mxu0 }
 0x3cc   : > { %3852 = vmatprep.mubr.msk.f32.mxu0 %vm2004_vm4, %v1953_v25 }
 0x3cd   : > { %3853 = vmatmul.mubr.msk.f32.vlgmr.msra.gmra.mrb[20].mxu0 %vm2004_vm4, %v3834_v24 }
 0x3ce   : > { %v3837_v30 = vpop.f32.mrb[14].mxu0  ;;  %4023 = vmatpush3.bf16.msra.mxu0 %v4020_v18 }
 0x3cf   : > { %v1963_v31 = vpop.f32.mrb[15].mxu0  ;;  %4025 = vmatprep.subr.bf16.mxu0 %v4024_v26 }
 0x3d0   : > { %3863 = vmatprep.mubr.msk.f32.mxu1 %vm2004_vm4, %v1963_v31 }
 0x3d1   : > { %3864 = vmatmul.mubr.msk.f32.vlgmr.msra.gmra.mrb[18].mxu1 %vm2004_vm4, %v3837_v30 }
 0x3d2   : > { %v3840_v37 = vpop.f32.mrb[16].mxu0  ;;  %4027 = vmatpush3.bf16.msra.mxu0 %v4024_v26  ;;  %4031 = vmatpush3.bf16.msra.mxu1 %v4028_v21 }
 0x3d3   : > { %v1973_v38 = vpop.f32.mrb[17].mxu0  ;;  %4033 = vmatprep.subr.bf16.mxu1 %v4032_v33  ;;  %4037 = vmatprep.subr.bf16.mxu0 %v4036_v46 }
 0x3d4   : > { %3874 = vmatprep.mubr.msk.f32.mxu0 %vm2004_vm4, %v1973_v38 }
 0x3d5   : > { %3875 = vmatmul.mubr.msk.f32.vlgmr.msra.gmra.mrb[22].mxu0 %vm2004_vm4, %v3840_v37 }
 0x3d6   : > { %v3843_v42 = vpop.f32.mrb[18].mxu0  ;;  %4035 = vmatpush3.bf16.msra.mxu1 %v4032_v33  ;;  %4039 = vmatpush3.bf16.msra.mxu0 %v4036_v46  ;;  %v3547_v33 = vld [vmem:[%s5196_s14] ss:$0 sm:$0xff] }
 0x3d7   : > { %v1983_v51 = vpop.f32.mrb[19].mxu0  ;;  %4045 = vmatprep.subr.bf16.mxu1 %v4877_v39 }
 0x3d8   : > { %3885 = vmatprep.mubr.msk.f32.mxu1 %vm2004_vm4, %v1983_v51 }
 0x3d9   : > { %3886 = vmatmul.mubr.msk.f32.vlgmr.msra.gmra.mrb[20].mxu1 %vm2004_vm4, %v3843_v42 }
 0x3da   : > { %4047 = vmatpush3.bf16.msra.mxu1 %v4877_v39  ;;  %3916 = vmatprep.mubr.f32.mxu1 %v4292_v35 }
 0x3db   : > { %4049 = vmatprep.subr.bf16.mxu1 %v4888_v43 }
 0x3de   : > { %4051 = vmatpush3.bf16.msra.mxu1 %v4888_v43 }
 0x3df   : > { %4053 = vmatprep.subr.bf16.mxu1 %v4877_v39 }
 0x3e1   : > { %3917 = vmatmul.mubr.f32.vlgmr.msra.gmra.mrb[22].mxu1 %v4292_v35  ;;  %v2370_v35 = vld [vmem:[%s5194_s12 + $0x10] sm:$0xff] }
 0x3e2   : > { %4055 = vmatpush3.bf16.msra.mxu1 %v4877_v39  ;;  %v4040_v48 = vpack.c.bf16 %v2371_v47, %v2370_v35 }
 0x3e3   : > { %4057 = vmatprep.subr.bf16.mxu1 %v4888_v43 }
 0x3e4   : > { %4041 = vmatprep.subr.bf16.mxu0 %v4040_v48 }
 0x3e5   : > { %4043 = vmatpush3.bf16.msra.mxu0 %v4040_v48 }
 0x3e6   : > { %4059 = vmatpush3.bf16.msra.mxu1 %v4888_v43  ;;  %4061 = vmatprep.subr.bf16.mxu0 %v4877_v39 }
 0x3e7   : > { %4069 = vmatprep.subr.bf16.mxu1 %v4877_v39 }
 0x4a0   : > { %v3854_v57 = vpop.f32.mrb[20].mxu0 }
 0x4a1   : > { %v2083_v59 = vadd.f32 %v3854_v57, %v1993_v49  ;;  %v2077_v60 = vpop.f32.mrb[21].mxu0 }
 0x4a2   : > { %v2078_v61 = vadd.f32 %v2077_v60, %v1992_v55 }
 0x4a3   : > { %v2087_v52 = vmax.f32 %v2083_v59, 0.0 }
 0x4a4   : > { %v2086_v0 = vmax.f32 %v2078_v61, 0.0  ;;  %v3865_v28 = vpop.f32.mrb[18].mxu1 }
 0x4a5   : > { %2089 = vst.msk [vmem:[#allocation2 + $0x8] sm:$0xff] %vm2004_vm4, %v2087_v52  ;;  %v2173_v53 = vadd.f32 %v3865_v28, %v1995_v62  ;;  %v2167_v3 = vpop.f32.mrb[19].mxu1 }
 0x4a6   : > { %2088 = vst.msk [vmem:[#allocation2] sm:$0xff] %vm2004_vm4, %v2086_v0  ;;  %v2168_v4 = vadd.f32 %v2167_v3, %v1994_v63 }
 0x4a7   : > { %v2177_v5 = vmax.f32 %v2173_v53, 0.0 }
 0x4a8   : > { %v2176_v7 = vmax.f32 %v2168_v4, 0.0  ;;  %v3876_v8 = vpop.f32.mrb[22].mxu0 }
 0x4a9   : > { %2179 = vst.msk [vmem:[#allocation2 + $0x18] sm:$0xff] %vm2004_vm4, %v2177_v5  ;;  %v2263_v54 = vadd.f32 %v3876_v8, %v1997_v50  ;;  %v2257_v9 = vpop.f32.mrb[23].mxu0 }
 0x4aa   : > { %2178 = vst.msk [vmem:[#allocation2 + $0x10] sm:$0xff] %vm2004_vm4, %v2176_v7  ;;  %v2258_v56 = vadd.f32 %v2257_v9, %v1996_v6 }
 0x4ab   : > { %v2267_v11 = vmax.f32 %v2263_v54, 0.0 }
 0x4ac   : > { %v2266_v58 = vmax.f32 %v2258_v56, 0.0  ;;  %v3887_v12 = vpop.f32.mrb[20].mxu1  ;;  %v2361_v17 = vld [vmem:[#allocation2 + $0x8] sm:$0xff] }
 0x4ad   : > { %v2360_v13 = vld [vmem:[#allocation2] sm:$0xff]  ;;  %2269 = vst.msk [vmem:[#allocation2 + $0x28] sm:$0xff] %vm2004_vm4, %v2267_v11  ;;  %v2353_v14 = vadd.f32 %v3887_v12, %v1999_v10  ;;  %v2347_v16 = vpop.f32.mrb[21].mxu1 }
 0x4ae   : > { %3896 = vmatprep.mubr.msk.f32.mxu0 %vm2004_vm4, %v2360_v13  ;;  %2268 = vst.msk [vmem:[#allocation2 + $0x20] sm:$0xff] %vm2004_vm4, %v2266_v58  ;;  %v2348_v15 = vadd.f32 %v2347_v16, %v1998_v32 }
 0x4af   : > { %3897 = vmatmul.mubr.msk.f32.vlgmr.msra.gmra.mrb[24].mxu0 %vm2004_vm4, %v2361_v17  ;;  %v2357_v18 = vmax.f32 %v2353_v14, 0.0 }
 0x4b0   : > { %v2356_v19 = vmax.f32 %v2348_v15, 0.0  ;;  %v2363_v20 = vld [vmem:[#allocation2 + $0x18] sm:$0xff]  ;;  %4063 = vmatpush3.bf16.msra.mxu0 %v4877_v39 }
 0x4b1   : > { %2359 = vst.msk [vmem:[#allocation2 + $0x38] sm:$0xff] %vm2004_vm4, %v2357_v18  ;;  %v2362_v21 = vld [vmem:[#allocation2 + $0x10] sm:$0xff]  ;;  %4065 = vmatprep.subr.bf16.mxu0 %v4888_v43 }
 0x4b2   : > { %2358 = vst.msk [vmem:[#allocation2 + $0x30] sm:$0xff] %vm2004_vm4, %v2356_v19  ;;  %3899 = vmatprep.mubr.msk.f32.mxu0 %vm2004_vm4, %v2362_v21 }
 0x4b3   : > { %3900 = vmatmul.mubr.msk.f32.gmra.mrb[26].mxu0 %vm2004_vm4, %v2363_v20 }
 0x4b4   : > { %v2365_v23 = vld [vmem:[#allocation2 + $0x28] sm:$0xff]  ;;  %v3918_v24 = vpop.f32.mrb[22].mxu1  ;;  %4067 = vmatpush3.bf16.msra.mxu0 %v4888_v43 }
 0x4b5   : > { %v2364_v25 = vld [vmem:[#allocation2 + $0x20] sm:$0xff]  ;;  %v2594_v26 = vadd.f32 %v3918_v24, %v4955_v22  ;;  %v2588_v27 = vpop.f32.mrb[23].mxu1 }
 0x4b6   : > { %3902 = vmatprep.mubr.msk.f32.mxu0 %vm2004_vm4, %v2364_v25  ;;  %v2589_v29 = vadd.f32 %v4955_v22, %v2588_v27 }
 0x4b7   : > { %3903 = vmatmul.mubr.msk.f32.gmra.mrb[28].mxu0 %vm2004_vm4, %v2365_v23  ;;  %2615 = vrot.lane.b32.xlu0 %v2594_v26, %s4296_s22 }
 0x4b8   : > { %v2367_v30 = vld [vmem:[#allocation2 + $0x38] sm:$0xff]  ;;  %2613 = vrot.lane.b32.xlu1 %v2589_v29, %s4296_s22 }
 0x4b9   : > { %v2366_v31 = vld [vmem:[#allocation2 + $0x30] sm:$0xff] }
 0x4ba   : > { %3905 = vmatprep.mubr.msk.f32.mxu0 %vm2004_vm4, %v2366_v31 }
 0x4bb   : > { %3906 = vmatmul.mubr.msk.f32.gmra.mrb[30].mxu0 %vm2004_vm4, %v2367_v30 }
 0x529   : > { %v2616_v28 = vpop.permute.xlu0 %2615 }
 0x52a   : > { %v2614_v53 = vpop.permute.xlu1 %2613 }
 0x582   : > { %v3898_v34 = vpop.f32.mrb[24].mxu0 }
 0x583   : > { %v2475_v36 = vadd.f32 %v3898_v34, %v3547_v33  ;;  %v2469_v37 = vpop.f32.mrb[25].mxu0 }
 0x584   : > { %v2470_v38 = vadd.f32 %v3547_v33, %v2469_v37 }
 0x585   : > { %v2598_v40 = vadd.f32 %v2594_v26, %v2475_v36 }
 0x586   : > { %v2597_v41 = vadd.f32 %v2589_v29, %v2470_v38  ;;  %v3901_v42 = vpop.f32.mrb[26].mxu0 }
 0x587   : > { %v3558_v51 = vmul.f32 -1.442695, %v2598_v40  ;;  %v4970_v44 = vadd.f32 %v3901_v42, %v3547_v33  ;;  %v2479_v45 = vpop.f32.mrb[27].mxu0 }
 0x588   : > { %v3557_v46 = vmul.f32 -1.442695, %v2597_v41  ;;  %v4972_v35 = vadd.f32 %v3547_v33, %v2479_v45 }
 0x589   : > { %4134 = vpow2.f32 %v3558_v51 }
 0x58a   : > { %4136 = vpow2.f32 %v3557_v46  ;;  %v3904_v47 = vpop.f32.mrb[28].mxu0 }
 0x58b   : > { %v4974_v48 = vadd.f32 %v3904_v47, %v3547_v33  ;;  %v2489_v49 = vpop.f32.mrb[29].mxu0 }
 0x58c   : > { %v4976_v55 = vadd.f32 %v3547_v33, %v2489_v49 }
 0x58e   : > { %v3907_v57 = vpop.f32.mrb[30].mxu0 }
 0x58f   : > { %v4978_v59 = vadd.f32 %v3907_v57, %v3547_v33  ;;  %v2499_v60 = vpop.f32.mrb[31].mxu0 }
 0x590   : > { %v4980_v61 = vadd.f32 %v3547_v33, %v2499_v60 }
 0x593   : > { %v4135_v62 = vpop.eup %4134 }
 0x594   : > { %v4137_v52 = vpop.eup %4136  ;;  %v2606_v63 = vadd.f32 1.0, %v4135_v62 }
 0x595   : > { %v2605_v0 = vadd.f32 1.0, %v4137_v52 }
 0x596   : > { %4138 = vrcp.f32 %v2606_v63 }
 0x597   : > { %4140 = vrcp.f32 %v2605_v0 }
 0x5a0   : > { %v4139_v3 = vpop.eup %4138 }
 0x5a1   : > { %v4141_v4 = vpop.eup %4140  ;;  %v2620_v50 = vmul.f32 %v4139_v3, %v2616_v28  ;;  %v2634_v10 = vsub.f32 1.0, %v4139_v3  ;;  %v2646_v58 = vmul.f32 0.0, %v4139_v3 }
 0x5a2   : > { %v2619_v5 = vmul.f32 %v4141_v4, %v2614_v53  ;;  %v2633_v32 = vsub.f32 1.0, %v4141_v4  ;;  %v2645_v14 = vmul.f32 0.0, %v4141_v4 }
 0x5a3   : > { %2625 = vrot.lane.b32.xlu0 %v2620_v50, %s4296_s22 }
 0x5a4   : > { %2623 = vrot.lane.b32.xlu1 %v2619_v5, %s4296_s22 }
 0x615   : > { %v2626_v6 = vpop.permute.xlu0 %2625 }
 0x616   : > { %v2630_v7 = vadd.f32 %v2626_v6, %v2475_v36  ;;  %v2624_v8 = vpop.permute.xlu1 %2623 }
 0x617   : > { %v2629_v54 = vadd.f32 %v2624_v8, %v2470_v38 }
 0x618   : > { %4142 = vtanh.f32 %v2630_v7 }
 0x619   : > { %4144 = vtanh.f32 %v2629_v54 }
 0x622   : > { %v4143_v9 = vpop.eup %4142 }
 0x623   : > { %v4145_v56 = vpop.eup %4144  ;;  %2639 = vrot.lane.b32.xlu0 %v4143_v9, %s4297_s19 }
 0x624   : > { %2637 = vrot.lane.b32.xlu1 %v4145_v56, %s4297_s19 }
 0x695   : > { %v2640_v11 = vpop.permute.xlu0 %2639 }
 0x696   : > { %v2644_v12 = vmul.f32 %v2640_v11, %v2634_v10  ;;  %v2638_v13 = vpop.permute.xlu1 %2637 }
 0x697   : > { %v2643_v16 = vmul.f32 %v2638_v13, %v2633_v32 }
 0x698   : > { %v4986_v17 = vadd.f32 %v2646_v58, %v2644_v12 }
 0x699   : > { %v4988_v15 = vadd.f32 %v2645_v14, %v2643_v16 }
 0x69a   : > { %2653 = vrot.lane.b32.xlu0 %v4986_v17, %s4297_s19 }
 0x69b   : > { %2651 = vrot.lane.b32.xlu1 %v4988_v15, %s4297_s19 }
 0x70c   : > { %v2654_v19 = vpop.permute.xlu0 %2653 }
 0x70d   : > { %v2652_v18 = vpop.permute.xlu1 %2651 }
 0x70e   : > { %3927 = vmatprep.mubr.msk.f32.mxu1 %vm2004_vm4, %v2652_v18 }
 0x70f   : > { %3928 = vmatmul.mubr.msk.f32.vlgmr.msra.gmra.mrb[24].mxu1 %vm2004_vm4, %v2654_v19 }
 0x710   : > { %4071 = vmatpush3.bf16.msra.mxu1 %v4877_v39 }
 0x711   : > { %4073 = vmatprep.subr.bf16.mxu1 %v4888_v43 }
 0x714   : > { %4075 = vmatpush3.bf16.msra.mxu1 %v4888_v43 }
 0x7e2   : > { %v3929_v20 = vpop.f32.mrb[24].mxu1 }
 0x7e3   : > { %v2731_v21 = vadd.f32 %v3929_v20, %v4955_v22  ;;  %v2725_v23 = vpop.f32.mrb[25].mxu1 }
 0x7e4   : > { %v2726_v24 = vadd.f32 %v4955_v22, %v2725_v23 }
 0x7e5   : > { %2752 = vrot.lane.b32.xlu0 %v2731_v21, %s4296_s22  ;;  %v2735_v25 = vadd.f32 %v2731_v21, %v4970_v44 }
 0x7e6   : > { %2750 = vrot.lane.b32.xlu1 %v2726_v24, %s4296_s22  ;;  %v2734_v26 = vadd.f32 %v2726_v24, %v4972_v35 }
 0x7e7   : > { %v3562_v27 = vmul.f32 -1.442695, %v2735_v25 }
 0x7e8   : > { %v3561_v39 = vmul.f32 -1.442695, %v2734_v26 }
 0x7e9   : > { %4146 = vpow2.f32 %v3562_v27 }
 0x7ea   : > { %4148 = vpow2.f32 %v3561_v39 }
 0x7f3   : > { %v4147_v29 = vpop.eup %4146 }
 0x7f4   : > { %v4149_v43 = vpop.eup %4148  ;;  %v2743_v30 = vadd.f32 1.0, %v4147_v29 }
 0x7f5   : > { %v2742_v31 = vadd.f32 1.0, %v4149_v43 }
 0x7f6   : > { %4150 = vrcp.f32 %v2743_v30 }
 0x7f7   : > { %4152 = vrcp.f32 %v2742_v31 }
 0x800   : > { %v4151_v33 = vpop.eup %4150 }
 0x801   : > { %v4153_v36 = vpop.eup %4152  ;;  %v2771_v49 = vsub.f32 1.0, %v4151_v33  ;;  %v2783_v62 = vmul.f32 %v4151_v33, %v4986_v17 }
 0x802   : > { %v2770_v60 = vsub.f32 1.0, %v4153_v36 }
 0x857   : > { %v2753_v34 = vpop.permute.xlu0 %2752 }
 0x858   : > { %v2757_v37 = vmul.f32 %v4151_v33, %v2753_v34  ;;  %v2751_v38 = vpop.permute.xlu1 %2750 }
 0x859   : > { %v2756_v40 = vmul.f32 %v4153_v36, %v2751_v38 }
 0x85a   : > { %2762 = vrot.lane.b32.xlu0 %v2757_v37, %s4296_s22 }
 0x85b   : > { %2760 = vrot.lane.b32.xlu1 %v2756_v40, %s4296_s22 }
 0x8cc   : > { %v2763_v41 = vpop.permute.xlu0 %2762 }
 0x8cd   : > { %v2767_v42 = vadd.f32 %v2763_v41, %v4970_v44  ;;  %v2761_v51 = vpop.permute.xlu1 %2760  ;;  %v2782_v44 = vmul.f32 %v4153_v36, %v4988_v15 }
 0x8ce   : > { %v2766_v45 = vadd.f32 %v2761_v51, %v4972_v35 }
 0x8cf   : > { %4154 = vtanh.f32 %v2767_v42 }
 0x8d0   : > { %4156 = vtanh.f32 %v2766_v45 }
 0x8d9   : > { %v4155_v46 = vpop.eup %4154 }
 0x8da   : > { %v4157_v47 = vpop.eup %4156  ;;  %2776 = vrot.lane.b32.xlu0 %v4155_v46, %s4297_s19 }
 0x8db   : > { %2774 = vrot.lane.b32.xlu1 %v4157_v47, %s4297_s19 }
 0x94c   : > { %v2777_v57 = vpop.permute.xlu0 %2776 }
 0x94d   : > { %v2781_v52 = vmul.f32 %v2777_v57, %v2771_v49  ;;  %v2775_v63 = vpop.permute.xlu1 %2774 }
 0x94e   : > { %v2780_v0 = vmul.f32 %v2775_v63, %v2770_v60 }
 0x94f   : > { %v5013_v28 = vadd.f32 %v2783_v62, %v2781_v52 }
 0x950   : > { %v5015_v35 = vadd.f32 %v2782_v44, %v2780_v0 }
 0x951   : > { %2790 = vrot.lane.b32.xlu0 %v5013_v28, %s4297_s19 }
 0x952   : > { %2788 = vrot.lane.b32.xlu1 %v5015_v35, %s4297_s19 }
 0x9c3   : > { %v2791_v3 = vpop.permute.xlu0 %2790 }
 0x9c4   : > { %v2789_v53 = vpop.permute.xlu1 %2788 }
 0x9c5   : > { %3938 = vmatprep.mubr.msk.f32.mxu0 %vm2004_vm4, %v2789_v53 }
 0x9c6   : > { %3939 = vmatmul.mubr.msk.f32.vlgmr.msra.gmra.mrb[32].mxu0 %vm2004_vm4, %v2791_v3 }
 0xa99   : > { %v3940_v4 = vpop.f32.mrb[32].mxu0 }
 0xa9a   : > { %v2868_v50 = vadd.f32 %v3940_v4, %v4955_v22  ;;  %v2862_v5 = vpop.f32.mrb[33].mxu0 }
 0xa9b   : > { %v2863_v6 = vadd.f32 %v4955_v22, %v2862_v5 }
 0xa9c   : > { %2889 = vrot.lane.b32.xlu0 %v2868_v50, %s4296_s22  ;;  %v2872_v7 = vadd.f32 %v2868_v50, %v4974_v48 }
 0xa9d   : > { %2887 = vrot.lane.b32.xlu1 %v2863_v6, %s4296_s22  ;;  %v2871_v8 = vadd.f32 %v2863_v6, %v4976_v55 }
 0xa9e   : > { %v3566_v54 = vmul.f32 -1.442695, %v2872_v7  ;;  %v3571_v7 = vld [vmem:[%s5198_s16] ss:$0 sm:$0xff] }
 0xa9f   : > { %v3565_v9 = vmul.f32 -1.442695, %v2871_v8 }
 0xaa0   : > { %4158 = vpow2.f32 %v3566_v54 }
 0xaa1   : > { %4160 = vpow2.f32 %v3565_v9 }
 0xaaa   : > { %v4159_v56 = vpop.eup %4158 }
 0xaab   : > { %v4161_v10 = vpop.eup %4160  ;;  %v2880_v11 = vadd.f32 1.0, %v4159_v56 }
 0xaac   : > { %v2879_v32 = vadd.f32 1.0, %v4161_v10 }
 0xaad   : > { %4162 = vrcp.f32 %v2880_v11 }
 0xaae   : > { %4164 = vrcp.f32 %v2879_v32 }
 0xab7   : > { %v4163_v58 = vpop.eup %4162 }
 0xab8   : > { %v4165_v13 = vpop.eup %4164  ;;  %v2908_v26 = vsub.f32 1.0, %v4163_v58  ;;  %v2920_v29 = vmul.f32 %v4163_v58, %v5013_v28 }
 0xab9   : > { %v2907_v39 = vsub.f32 1.0, %v4165_v13 }
 0xb0e   : > { %v2890_v12 = vpop.permute.xlu0 %2889 }
 0xb0f   : > { %v2894_v14 = vmul.f32 %v4163_v58, %v2890_v12  ;;  %v2888_v16 = vpop.permute.xlu1 %2887 }
 0xb10   : > { %v2893_v18 = vmul.f32 %v4165_v13, %v2888_v16 }
 0xb11   : > { %2899 = vrot.lane.b32.xlu0 %v2894_v14, %s4296_s22 }
 0xb12   : > { %2897 = vrot.lane.b32.xlu1 %v2893_v18, %s4296_s22 }
 0xb83   : > { %v2900_v19 = vpop.permute.xlu0 %2899 }
 0xb84   : > { %v2904_v20 = vadd.f32 %v2900_v19, %v4974_v48  ;;  %v2898_v21 = vpop.permute.xlu1 %2897  ;;  %v2919_v48 = vmul.f32 %v4165_v13, %v5015_v35 }
 0xb85   : > { %v2903_v23 = vadd.f32 %v2898_v21, %v4976_v55 }
 0xb86   : > { %4166 = vtanh.f32 %v2904_v20 }
 0xb87   : > { %4168 = vtanh.f32 %v2903_v23 }
 0xb90   : > { %v4167_v24 = vpop.eup %4166 }
 0xb91   : > { %v4169_v25 = vpop.eup %4168  ;;  %2913 = vrot.lane.b32.xlu0 %v4167_v24, %s4297_s19 }
 0xb92   : > { %2911 = vrot.lane.b32.xlu1 %v4169_v25, %s4297_s19 }
 0xc03   : > { %v2914_v27 = vpop.permute.xlu0 %2913 }
 0xc04   : > { %v2918_v43 = vmul.f32 %v2914_v27, %v2908_v26  ;;  %v2912_v30 = vpop.permute.xlu1 %2911 }
 0xc05   : > { %v2917_v31 = vmul.f32 %v2912_v30, %v2907_v39 }
 0xc06   : > { %v5037_v33 = vadd.f32 %v2920_v29, %v2918_v43 }
 0xc07   : > { %v5039_v55 = vadd.f32 %v2919_v48, %v2917_v31  ;;  %v3434_v48 = vld [vmem:[%s5191_s9] ss:$0 sm:$0xff] }
 0xc08   : > { %2927 = vrot.lane.b32.xlu0 %v5037_v33, %s4297_s19  ;;  %v5088_v31 = vadd.f32 %v3434_v48, %v4736_v2 }
 0xc09   : > { %2925 = vrot.lane.b32.xlu1 %v5039_v55, %s4297_s19 }
 0xc7a   : > { %v2928_v36 = vpop.permute.xlu0 %2927 }
 0xc7b   : > { %v2926_v34 = vpop.permute.xlu1 %2925 }
 0xc7c   : > { %3949 = vmatprep.mubr.msk.f32.mxu1 %vm2004_vm4, %v2926_v34  ;;  %v1110_v34 = vmax.f32 %v5088_v31, 0.0 }
 0xc7d   : > { %3950 = vmatmul.mubr.msk.f32.vlgmr.msra.gmra.mrb[26].mxu1 %vm2004_vm4, %v2928_v36  ;;  %v5092_v36 = vadd.f32 %v4734_v1, %v3434_v48 }
 0xd50   : > { %v3951_v37 = vpop.f32.mrb[26].mxu1 }
 0xd51   : > { %v3005_v38 = vadd.f32 %v3951_v37, %v4955_v22  ;;  %v2999_v40 = vpop.f32.mrb[27].mxu1  ;;  %v1111_v37 = vmax.f32 %v5092_v36, 0.0 }
 0xd52   : > { %v3000_v41 = vadd.f32 %v4955_v22, %v2999_v40 }
 0xd53   : > { %3026 = vrot.lane.b32.xlu0 %v3005_v38, %s4296_s22  ;;  %v3009_v42 = vadd.f32 %v3005_v38, %v4978_v59 }
 0xd54   : > { %3024 = vrot.lane.b32.xlu1 %v3000_v41, %s4296_s22  ;;  %v3008_v51 = vadd.f32 %v3000_v41, %v4980_v61 }
 0xd55   : > { %v3570_v45 = vmul.f32 -1.442695, %v3009_v42 }
 0xd56   : > { %v3569_v46 = vmul.f32 -1.442695, %v3008_v51 }
 0xd57   : > { %4170 = vpow2.f32 %v3570_v45 }
 0xd58   : > { %4172 = vpow2.f32 %v3569_v46 }
 0xd61   : > { %v4171_v47 = vpop.eup %4170 }
 0xd62   : > { %v4173_v49 = vpop.eup %4172  ;;  %v3017_v57 = vadd.f32 1.0, %v4171_v47 }
 0xd63   : > { %v3016_v60 = vadd.f32 1.0, %v4173_v49 }
 0xd64   : > { %4174 = vrcp.f32 %v3017_v57 }
 0xd65   : > { %4176 = vrcp.f32 %v3016_v60 }
 0xd6e   : > { %v4175_v62 = vpop.eup %4174 }
 0xd6f   : > { %v4177_v52 = vpop.eup %4176  ;;  %v3057_v54 = vmul.f32 %v4175_v62, %v5037_v33 }
 0xd70   : > { %v3044_v8 = vsub.f32 1.0, %v4177_v52  ;;  %v3056_v10 = vmul.f32 %v4177_v52, %v5039_v55 }
 0xdc5   : > { %v3027_v22 = vpop.permute.xlu0 %3026 }
 0xdc6   : > { %v3031_v63 = vmul.f32 %v4175_v62, %v3027_v22  ;;  %v3025_v44 = vpop.permute.xlu1 %3024 }
 0xdc7   : > { %v3030_v0 = vmul.f32 %v4177_v52, %v3025_v44 }
 0xdc8   : > { %3036 = vrot.lane.b32.xlu0 %v3031_v63, %s4296_s22 }
 0xdc9   : > { %3034 = vrot.lane.b32.xlu1 %v3030_v0, %s4296_s22  ;;  %s623_s22 = scalar_lea.vmem [#allocation3], %s3408_s27  ;;  %s4232_s27 = scalar_lea.vmem %s4231_s24, 512 }
 0xdca   : > { %s3276_s0 = sshll.u32 %s623_s22, 4  ;;  %s5131_s0 = int_to_ptr.vmem [resolvable:$true] %s3276_s0 }
 0xdcb   : > { %p4233_p0 = scmp.lt.s32.totalorder %s5131_s0, %s4231_s24 }
 0xe3a   : > { %v3037_v53 = vpop.permute.xlu0 %3036 }
 0xe3b   : > { %v3041_v3 = vadd.f32 %v3037_v53, %v4978_v59  ;;  %v3035_v4 = vpop.permute.xlu1 %3034  ;;  %v3045_v59 = vsub.f32 1.0, %v4175_v62 }
 0xe3c   : > { %v3040_v50 = vadd.f32 %v3035_v4, %v4980_v61 }
 0xe3d   : > { %4178 = vtanh.f32 %v3041_v3 }
 0xe3e   : > { %4180 = vtanh.f32 %v3040_v50 }
 0xe3f   : > { %4182 = vtanh.f32 %v4986_v17 }
 0xe40   : > { %4184 = vtanh.f32 %v4988_v15 }
 0xe41   : > { %4186 = vtanh.f32 %v5013_v28 }
 0xe42   : > { %4188 = vtanh.f32 %v5015_v35 }
 0xe43   : > { %4190 = vtanh.f32 %v5037_v33 }
 0xe44   : > { %4192 = vtanh.f32 %v5039_v55 }
 0xe47   : > { %v4179_v5 = vpop.eup %4178 }
 0xe48   : > { %v4181_v6 = vpop.eup %4180  ;;  %3050 = vrot.lane.b32.xlu0 %v4179_v5, %s4297_s19 }
 0xe49   : > { %3048 = vrot.lane.b32.xlu1 %v4181_v6, %s4297_s19  ;;  %v4183_v58 = vpop.eup %4182 }
 0xe4a   : > { %v4185_v13 = vpop.eup %4184 }
 0xe4b   : > { %v4187_v19 = vpop.eup %4186 }
 0xe4c   : > { %v4189_v20 = vpop.eup %4188 }
 0xe4d   : > { %3079 = vrot.lane.b32.xlu1 %v3571_v7, %s4298_s23  ;;  %v4191_v24 = vpop.eup %4190  ;;  %s4226_s23 = scalar_lea.vmem %s5131_s0, 256 }
 0xe4e   : > { %v4193_v25 = vpop.eup %4192  ;;  %p4227_p11 = scmp.ne.s32.totalorder %s5131_s0, %s4226_s23  ;;  %p4234_p1 = scmp.lt.s32.totalorder %s4232_s27, %s4226_s23 }
 0xe50   : > { %p4228_p12 = pnand %p4227_p11, %p4429_p5  ;;  %p4235_p2 = por %p4234_p1, %p4233_p0 }
 0xe52   : > { %p4229_p13 = pneg %p4228_p12 }
 0xe54   : > { %p4236_p3 = pnand %p4235_p2, %p4229_p13 }
 0xeba   : > { %v3051_v61 = vpop.permute.xlu0 %3050 }
 0xebb   : > { %v3055_v9 = vmul.f32 %v3051_v61, %v3045_v59  ;;  %v3049_v56 = vpop.permute.xlu1 %3048 }
 0xebc   : > { %v3054_v11 = vmul.f32 %v3049_v56, %v3044_v8 }
 0xebd   : > { %v5070_v32 = vadd.f32 %v3057_v54, %v3055_v9 }
 0xebe   : > { %v5072_v12 = vadd.f32 %v3056_v10, %v3054_v11 }
 0xebf   : > { %4194 = vtanh.f32 %v5070_v32  ;;  %v3080_v14 = vpop.permute.xlu1 %3079 }
 0xec0   : > { %4196 = vtanh.f32 %v5072_v12  ;;  %v3083_v16 = vmul.f32 %v4183_v58, %v3080_v14  ;;  %v3082_v18 = vmul.f32 %v4185_v13, %v3080_v14  ;;  %v3101_v21 = vmul.f32 %v4187_v19, %v3080_v14 }
 0xec1   : > { %v3100_v23 = vmul.f32 %v4189_v20, %v3080_v14  ;;  %v3119_v26 = vmul.f32 %v4191_v24, %v3080_v14  ;;  %v3118_v27 = vmul.f32 %v4193_v25, %v3080_v14  ;;  %4198 = vtanh.f32 %v1110_v34 }
 0xec2   : > { %3088 = vrot.lane.b32.xlu1 %v3083_v16, %s4297_s19  ;;  %3086 = vrot.lane.b32.xlu0 %v3082_v18, %s4297_s19  ;;  %4200 = vtanh.f32 %v1111_v37 }
 0xec6   : > { %3106 = vrot.lane.b32.xlu1 %v3101_v21, %s4297_s19  ;;  %3104 = vrot.lane.b32.xlu0 %v3100_v23, %s4297_s19 }
 0xec9   : > { %v4195_v39 = vpop.eup %4194 }
 0xeca   : > { %v4197_v29 = vpop.eup %4196  ;;  %3124 = vrot.lane.b32.xlu1 %v3119_v26, %s4297_s19  ;;  %3122 = vrot.lane.b32.xlu0 %v3118_v27, %s4297_s19  ;;  %v3137_v30 = vmul.f32 %v4195_v39, %v3080_v14 }
 0xecb   : > { %v3136_v43 = vmul.f32 %v4197_v29, %v3080_v14  ;;  %v4199_v38 = vpop.eup %4198 }
 0xecc   : > { %v3069_v40 = vmul.f32 %v4199_v38, %v3571_v7  ;;  %v4201_v41 = vpop.eup %4200 }
 0xecd   : > { %v3070_v2 = vmul.f32 %v4201_v41, %v3571_v7 }
 0xece   : > { %3142 = vrot.lane.b32.xlu1 %v3137_v30, %s4297_s19  ;;  %3140 = vrot.lane.b32.xlu0 %v3136_v43, %s4297_s19  ;;  %v3071_v42 = vsel %vm2004_vm4, %v3069_v40, 0.0 }
 0xecf   : > { %v3074_v51 = vsel %vm2004_vm4, %v3070_v2, 0.0 }
 0xeed   : > { %3072 = vadd.xlane.f32.xlu0 %v3071_v42 }
 0xef2   : > { %3075 = vadd.xlane.f32.xlu1 %v3074_v51 }
 0xf34   : > { %v3089_v1 = vpop.permute.xlu1 %3088  ;;  %v3087_v45 = vpop.permute.xlu0 %3086 }
 0xf35   : > { %v3092_v46 = vsel %vm2004_vm4, %v3087_v45, 0.0  ;;  %v3095_v60 = vsel %vm2004_vm4, %v3089_v1, 0.0 }
 0xf36   : > { %3093 = vadd.xlane.f32.xlu0 %v3092_v46 }
 0xf38   : > { %v3107_v47 = vpop.permute.xlu1 %3106  ;;  %v3105_v49 = vpop.permute.xlu0 %3104 }
 0xf39   : > { %v3110_v57 = vsel %vm2004_vm4, %v3105_v49, 0.0  ;;  %v3113_v63 = vsel %vm2004_vm4, %v3107_v47, 0.0 }
 0xf3a   : > { %3111 = vadd.xlane.f32.xlu1 %v3110_v57  ;;  %3096 = vadd.xlane.f32.xlu0 %v3095_v60 }
 0xf3c   : > { %v3125_v62 = vpop.permute.xlu1 %3124  ;;  %v3123_v22 = vpop.permute.xlu0 %3122 }
 0xf3d   : > { %v3128_v52 = vsel %vm2004_vm4, %v3123_v22, 0.0  ;;  %v3131_v0 = vsel %vm2004_vm4, %v3125_v62, 0.0 }
 0xf3e   : > { %3129 = vadd.xlane.f32.xlu1 %v3128_v52  ;;  %3114 = vadd.xlane.f32.xlu0 %v3113_v63 }
 0xf40   : > { %v3141_v44 = vpop.permute.xlu0 %3140  ;;  %v3143_v3 = vpop.permute.xlu1 %3142 }
 0xf41   : > { %v3146_v53 = vsel %vm2004_vm4, %v3141_v44, 0.0  ;;  %v3149_v4 = vsel %vm2004_vm4, %v3143_v3, 0.0 }
 0xf42   : > { %3147 = vadd.xlane.f32.xlu1 %v3146_v53  ;;  %3132 = vadd.xlane.f32.xlu0 %v3131_v0 }
 0xf46   : > { %3150 = vadd.xlane.f32.xlu0 %v3149_v4 }
 0xf7a   : > { %v3073_v50 = vpop.xlane.xlu0 %3072 }
 0xf7f   : > { %v3076_v5 = vpop.xlane.xlu1 %3075 }
 0xfc3   : > { %v3094_v6 = vpop.xlane.xlu0 %3093 }
 0xfc4   : > { %v3152_v61 = vmax.f32 %v3073_v50, %v3094_v6 }
 0xfc7   : > { %v3112_v7 = vpop.xlane.xlu1 %3111  ;;  %v3097_v59 = vpop.xlane.xlu0 %3096 }
 0xfc8   : > { %v3154_v9 = vmax.f32 %v3152_v61, %v3112_v7  ;;  %v3153_v56 = vmax.f32 %v3076_v5, %v3097_v59 }
 0xfcb   : > { %v3130_v8 = vpop.xlane.xlu1 %3129  ;;  %v3115_v54 = vpop.xlane.xlu0 %3114 }
 0xfcc   : > { %v3156_v10 = vmax.f32 %v3154_v9, %v3130_v8  ;;  %v3155_v11 = vmax.f32 %v3153_v56, %v3115_v54 }
 0xfcf   : > { %v3148_v58 = vpop.xlane.xlu1 %3147  ;;  %v3133_v13 = vpop.xlane.xlu0 %3132 }
 0xfd0   : > { %v3158_v14 = vmax.f32 %v3156_v10, %v3148_v58  ;;  %v3157_v16 = vmax.f32 %v3155_v11, %v3133_v13 }
 0xfd2   : > { %v3160_v18 = vsub.f32 %v3073_v50, %v3158_v14  ;;  %v3166_v19 = vsub.f32 %v3094_v6, %v3158_v14  ;;  %v3172_v20 = vsub.f32 %v3112_v7, %v3158_v14  ;;  %v3178_v21 = vsub.f32 %v3130_v8, %v3158_v14 }
 0xfd3   : > { %v3151_v23 = vpop.xlane.xlu0 %3150  ;;  %v3184_v29 = vsub.f32 %v3148_v58, %v3158_v14 }
 0xfd4   : > { %v3162_v24 = vmul.f32 1.442695, %v3160_v18  ;;  %v3168_v25 = vmul.f32 1.442695, %v3166_v19  ;;  %v3159_v26 = vmax.f32 %v3157_v16, %v3151_v23  ;;  %v3174_v27 = vmul.f32 1.442695, %v3172_v20 }
 0xfd5   : > { %v3180_v39 = vmul.f32 1.442695, %v3178_v21  ;;  %v3186_v42 = vmul.f32 1.442695, %v3184_v29 }
 0xfd6   : > { %4202 = vpow2.f32 %v3162_v24  ;;  %v3161_v43 = vsub.f32 %v3076_v5, %v3159_v26  ;;  %v3167_v30 = vsub.f32 %v3097_v59, %v3159_v26  ;;  %v3173_v48 = vsub.f32 %v3115_v54, %v3159_v26 }
 0xfd7   : > { %4204 = vpow2.f32 %v3168_v25  ;;  %v3179_v41 = vsub.f32 %v3133_v13, %v3159_v26  ;;  %v3185_v51 = vsub.f32 %v3151_v23, %v3159_v26 }
 0xfd8   : > { %v3164_v38 = vmul.f32 1.442695, %v3161_v43  ;;  %v3170_v40 = vmul.f32 1.442695, %v3167_v30  ;;  %4206 = vpow2.f32 %v3174_v27  ;;  %v3176_v2 = vmul.f32 1.442695, %v3173_v48 }
 0xfd9   : > { %4208 = vpow2.f32 %v3180_v39  ;;  %v3182_v1 = vmul.f32 1.442695, %v3179_v41  ;;  %v3188_v45 = vmul.f32 1.442695, %v3185_v51 }
 0xfda   : > { %4210 = vpow2.f32 %v3164_v38 }
 0xfdb   : > { %4212 = vpow2.f32 %v3170_v40 }
 0xfdc   : > { %4214 = vpow2.f32 %v3186_v42 }
 0xfdd   : > { %4216 = vpow2.f32 %v3176_v2 }
 0xfde   : > { %4218 = vpow2.f32 %v3182_v1 }
 0xfdf   : > { %4220 = vpow2.f32 %v3188_v45 }
 0xfe0   : > { %v4203_v46 = vpop.eup %4202 }
 0xfe1   : > { %v4205_v47 = vpop.eup %4204 }
 0xfe2   : > { %v3190_v49 = vadd.f32 %v4205_v47, %v4203_v46  ;;  %v4207_v57 = vpop.eup %4206 }
 0xfe3   : > { %v4209_v60 = vpop.eup %4208 }
 0xfe4   : > { %v3192_v62 = vadd.f32 %v4207_v57, %v3190_v49  ;;  %v4211_v22 = vpop.eup %4210 }
 0xfe5   : > { %v4213_v52 = vpop.eup %4212 }
 0xfe6   : > { %v3194_v63 = vadd.f32 %v4209_v60, %v3192_v62  ;;  %v4215_v44 = vpop.eup %4214  ;;  %v3191_v0 = vadd.f32 %v4213_v52, %v4211_v22 }
 0xfe7   : > { %v4217_v53 = vpop.eup %4216 }
 0xfe8   : > { %v3196_v3 = vadd.f32 %v4215_v44, %v3194_v63  ;;  %v3193_v4 = vadd.f32 %v4217_v53, %v3191_v0  ;;  %v4219_v50 = vpop.eup %4218 }
 0xfe9   : > { %v4221_v6 = vpop.eup %4220 }
 0xfea   : > { %4222 = vrcp.f32 %v3196_v3  ;;  %v3195_v5 = vadd.f32 %v4219_v50, %v3193_v4 }
 0xfec   : > { %v3197_v7 = vadd.f32 %v4221_v6, %v3195_v5 }
 0xfee   : > { %4224 = vrcp.f32 %v3197_v7 }
 0xff4   : > { %v4223_v59 = vpop.eup %4222 }
 0xff5   : > { %v3200_v61 = vmul.f32 %v4223_v59, %v4203_v46  ;;  %v3232_v13 = vmul.f32 %v4223_v59, %v4209_v60  ;;  %v3204_v18 = vmul.f32 %v4223_v59, %v4205_v47  ;;  %v3246_v19 = vmul.f32 %v4223_v59, %v4215_v44 }
 0xff6   : > { %v3218_v20 = vmul.f32 %v4223_v59, %v4207_v57 }
 0xff7   : > { %v3234_v16 = vmul.f32 %v3232_v13, %v5039_v55 }
 0xff8   : > { %v4225_v8 = vpop.eup %4224 }
 0xff9   : > { %v3219_v54 = vmul.f32 %v4225_v8, %v4217_v53  ;;  %v3205_v9 = vmul.f32 %v4225_v8, %v4213_v52  ;;  %v3201_v56 = vmul.f32 %v4225_v8, %v4211_v22  ;;  %v3233_v58 = vmul.f32 %v4225_v8, %v4219_v50 }
 0xffa   : > { %v3247_v21 = vmul.f32 %v4225_v8, %v4221_v6 }
 0xffb   : > { %v3221_v10 = vmul.f32 %v3219_v54, %v5013_v28  ;;  %v3207_v11 = vmul.f32 %v3205_v9, %v4986_v17  ;;  %v3235_v14 = vmul.f32 %v3233_v58, %v5037_v33  ;;  %v3206_v28 = vmul.f32 %v3204_v18, %v4988_v15 }
 0xffc   : > { %v3248_v17 = vmul.f32 %v3246_v19, %v5072_v12  ;;  %v3220_v33 = vmul.f32 %v3218_v20, %v5015_v35  ;;  %v3249_v55 = vmul.f32 %v3247_v21, %v5070_v32  ;;  %v3203_v12 = vmul.f32 %v3201_v56, %v1111_v37 }
 0xffd   : > { %3226 = vrot.lane.b32.xlu1 %v3221_v10, %s4297_s19  ;;  %3212 = vrot.lane.b32.xlu0 %v3207_v11, %s4297_s19  ;;  %v3202_v35 = vmul.f32 %v3200_v61, %v1110_v34 }
0x1001   : > { %3240 = vrot.lane.b32.xlu1 %v3235_v14, %s4297_s19  ;;  %3238 = vrot.lane.b32.xlu0 %v3234_v16, %s4297_s19 }
0x1005   : > { %3210 = vrot.lane.b32.xlu1 %v3206_v28, %s4297_s19  ;;  %3252 = vrot.lane.b32.xlu0 %v3248_v17, %s4297_s19 }
0x1009   : > { %3224 = vrot.lane.b32.xlu1 %v3220_v33, %s4297_s19 }
0x100d   : > { %3254 = vrot.lane.b32.xlu1 %v3249_v55, %s4297_s19 }
0x106f   : > { %v3227_v23 = vpop.permute.xlu1 %3226  ;;  %v3213_v24 = vpop.permute.xlu0 %3212 }
0x1070   : > { %v3217_v25 = vadd.f32 %v3213_v24, %v3203_v12 }
0x1072   : > { %v3231_v39 = vadd.f32 %v3227_v23, %v3217_v25 }
0x1073   : > { %v3241_v15 = vpop.permute.xlu1 %3240  ;;  %v3239_v27 = vpop.permute.xlu0 %3238 }
0x1074   : > { %v3245_v30 = vadd.f32 %v3241_v15, %v3231_v39 }
0x1077   : > { %v3211_v26 = vpop.permute.xlu1 %3210  ;;  %v3253_v38 = vpop.permute.xlu0 %3252 }
0x1078   : > { %v3216_v29 = vadd.f32 %v3211_v26, %v3202_v35 }
0x107b   : > { %v3225_v32 = vpop.permute.xlu1 %3224 }
0x107c   : > { %v3230_v43 = vadd.f32 %v3225_v32, %v3216_v29 }
0x107e   : > { %v3244_v48 = vadd.f32 %v3239_v27, %v3230_v43 }
0x107f   : > { %v3255_v36 = vpop.permute.xlu1 %3254 }
0x1080   : > { %v3258_v31 = vadd.f32 %v3253_v38, %v3244_v48  ;;  %v3259_v34 = vadd.f32 %v3255_v36, %v3245_v30 }
0x1082   : > { %3260 = vst.msk [vmem:[%s623_s22] sm:$0xff] %vm2004_vm4, %v3258_v31  ;;  %3261 = vst.msk [vmem:[%s623_s22 + $0x8] sm:$0xff] %vm2004_vm4, %v3259_v34 }
0x1083   : > { %4239 = shalt.err (!%p4236_p3)
}
0x1084   : > { %s4240_s26 = scalar_lea.hbm %s5136_s20, 256  ;;  %s4244_s19 = scalar_lea.hbm %s5199_s17, 512 }
0x1085   : > { %p4241_p4 = scmp.ne.s32.totalorder %s5136_s20, %s4240_s26  ;;  %p4245_p9 = scmp.lt.u32.totalorder %s5136_s20, %s5199_s17 }
0x1086   : > { %p4246_p10 = scmp.lt.u32.totalorder %s4244_s19, %s4240_s26  ;;  %p4248_p12 = scmp.lt.u32.totalorder %s4240_s26, %s5136_s20 }
0x1087   : > { %p4242_p7 = pnand %p4241_p4, %p4429_p5 }
0x1088   : > { %p4247_p11 = por %p4246_p10, %p4245_p9 }
0x1089   : > { %p4243_p8 = pneg %p4242_p7 }
0x108a   : > { %p4249_p13 = por %p4248_p12, %p4247_p11 }
0x108c   : > { %p4250_p0 = pnand %p4249_p13, %p4243_p8 }
0x108e   : > { %4253 = shalt.err (!%p4250_p0)
}
0x108f   : > { %s4300_s23 = smov 128  }
0x1090   : > { %4080 = dma.vmem_to_hbm [thread:$0]  (%p4429_p5), %s5131_s0, 256, %s5136_s20, %s5140_s28, %s4300_s23, %s4300_s23, %s4295_s21  }
0x1091 PF: > { %s5218_s24 = sld [smem:[#allocation8_spill]]  ;;  %s5219_s27 = sld [smem:[#allocation6_spill]] }
0x1097   : > { %p4086_p1 = scmp.ge.s32.totalorder %s5218_s24, 2  ;;  %s3291_s30 = sand.u32 1, %s5219_s27  }
0x1098   : > { %s3292_s26 = scalar_lea.sflag [#allocation4], %s3291_s30 }
0x1099   : > { %p4083_p2 = pnand %p4086_p1, %p4433_p6 }
0x109b   : > { %4271 = dma.done.wait (!%p4083_p2), %s3292_s26, 256  }
0x109c   : > { %4273 = vsyncadd (!%p4083_p2), %s3292_s26, 4294967040  ;;  %s5221_s27 = sld [smem:[#allocation9_spill]]  ;;  %s5222_s19 = sld [smem:[#allocation7_spill]] }
0x109d   : > { %s5223_s26 = sld [smem:[#allocation10_spill]]  ;;  %s5224_s24 = smov %s4280_s25 }
0x10a2   : > { %p27_p3 = scmp.ge.s32.totalorder %s5221_s27, 4   ;;  %s5225_s25 = smov %s5222_s19 }
0x10a4   :  { %29 = sbr.rel (!%p27_p3) target bundleno = 6 (0x6), region = 147 }
0x10ab   :  { %3297 = vsyncpa [#allocation4], 1 }
0x10ac   :  { %3299 = vsyncpa [#allocation4 + $0x1], 1 }

</bundles_post_ra>
